<compile_context>
chip_gen: v7x
topology: tpu7x:2x2x1
jax: 0.10.0
libtpu: 0.0.40
codegen_flags: <defaults>
</compile_context>

<pallas_src>
import functools

import jax
import jax.numpy as jnp
from jax.experimental import pallas as pl
from jax.experimental.pallas import tpu as pltpu

BN_EPS = 1e-5          # nn.BatchNorm2d default eps
LEAKY_SLOPE = 0.2      # nn.LeakyReLU(0.2)
PAD = 2
KSIZE = 4


def _round_up(x, m):
    return -(-x // m) * m


@functools.lru_cache()
def _device_kind():
    try:
        return jax.devices()[0].device_kind.lower()
    except Exception:
        return ""


@functools.lru_cache()
def _vmem_capacity_bytes():
    try:
        info = pltpu.get_tpu_info()
        cap = int(getattr(info, "vmem_capacity_bytes", 0) or 0)
        if cap > 0:
            return cap
    except Exception:
        pass
    # Fallback: v7x has 64 MiB / TensorCore, v5e/v6e have 128 MiB.
    return 64 * 1024 * 1024 if "v7" in _device_kind() else 128 * 1024 * 1024


@functools.lru_cache()
def _vmem_limit_bytes():
    # Leave ~25% of physical VMEM for compiler scratch / double-buffer slack.
    return int(_vmem_capacity_bytes() * 3 // 4)


@functools.lru_cache()
def _preferred_cout_tile():
    kind = _device_kind()
    # v5e: 4x(128x128) MXUs -> 128-wide weight tiles; v6e/v7x: 2x(256x256).
    if "v5e" in kind or "v5 lite" in kind or "v5lite" in kind:
        return 128
    return 256


def _pick_cout_tile(cout):
    pref = _preferred_cout_tile()
    for t in (pref, 256, 128):
        if cout % t == 0:
            return t
    return cout


# ---------------------------------------------------------------------------
# Pallas kernel: KHxKW stride-1 "valid" conv on a flattened zero-padded row
# block with fused per-channel affine (bias + eval-BatchNorm) and LeakyReLU.
# ---------------------------------------------------------------------------
def _conv_affine_kernel(x_ref, w_ref, scale_ref, shift_ref, o_ref, *,
                        kh, kw, wp, m, neg_slope):
    # x_ref:     (S, Cin)         bf16, S = (TH + halo) * Wp flattened rows
    # w_ref:     (kh*kw, Cin, TCo) bf16
    # scale_ref: (1, TCo)          f32   (BN gamma / sqrt(var+eps), or 1)
    # shift_ref: (1, TCo)          f32   (bias / BN shift, folded)
    # o_ref:     (M, TCo)          M = TH * Wp
    tco = o_ref.shape[-1]
    acc = jnp.zeros((m, tco), jnp.float32)
    if kh == 1 and kw == 1:
        # Pointwise path (tap-packed layer): a single full-depth MXU matmul.
        acc = acc + jnp.dot(x_ref[...], w_ref[0],
                            preferred_element_type=jnp.float32)
    else:
        shifted_rows = (kh - 1) * wp + m
        for dw in range(kw):
            # Hoist the sub-sublane (dw) shift: one shifted slab per dw; every
            # dh tap is then an 8-aligned row-offset slice (wp % 8 == 0).
            xs = None if dw == 0 else x_ref[dw:dw + shifted_rows, :]
            for dh in range(kh):
                off = dh * wp
                patch = (x_ref[off:off + m, :] if dw == 0
                         else xs[off:off + m, :])
                acc = acc + jnp.dot(patch, w_ref[dh * kw + dw],
                                    preferred_element_type=jnp.float32)
    y = acc * scale_ref[...] + shift_ref[...]        # fused bias + BatchNorm
    if neg_slope is not None:
        y = jnp.where(y >= 0.0, y, neg_slope * y)    # LeakyReLU(0.2)
    o_ref[...] = y.astype(o_ref.dtype)


# ---------------------------------------------------------------------------
# Wrapper-side layout plumbing (pure XLA, cheap).
# ---------------------------------------------------------------------------
def _space_to_depth2(x):
    """(N, H, W, C) -> (N, ceil(H/2), ceil(W/2), 4C), zero-padding to even."""
    n, h, w, c = x.shape
    he, we = h + (h % 2), w + (w % 2)
    x = jnp.pad(x, ((0, 0), (0, he - h), (0, we - w), (0, 0)))
    x = x.reshape(n, he // 2, 2, we // 2, 2, c)
    x = x.transpose(0, 1, 3, 2, 4, 5)                # (n, i, j, ph, pw, c)
    return x.reshape(n, he // 2, we // 2, 4 * c)


def _weight_space_to_depth2(w):
    """(4, 4, Cin, Cout) -> (2, 2, 4*Cin, Cout) matching _space_to_depth2."""
    kh, kw, cin, cout = w.shape
    w = w.reshape(2, 2, 2, 2, cin, cout)             # (ah, ph, aw, pw, ci, co)
    w = w.transpose(0, 2, 1, 3, 4, 5)                # (ah, aw, ph, pw, ci, co)
    return w.reshape(2, 2, 4 * cin, cout)


def conv4x4_affine_lrelu(x, weight, scale, shift, *, stride, neg_slope,
                         out_dtype=jnp.bfloat16):
    """One layer: Conv2d(k=4, stride, pad=2) + folded affine (+ LeakyReLU).

    x:      (N, H, W, Cin) NHWC.
    weight: (4, 4, Cin, Cout) HWIO (PyTorch OIHW -> transpose(2, 3, 1, 0)).
    scale, shift: (Cout,) folded conv-bias / eval-BatchNorm affine.
    """
    n, h, w, _ = x.shape
    cout = weight.shape[-1]
    ho = (h + 2 * PAD - KSIZE) // stride + 1
    wo = (w + 2 * PAD - KSIZE) // stride + 1

    x = x.astype(jnp.bfloat16)                       # bf16 MXU operands
    xp = jnp.pad(x, ((0, 0), (PAD, PAD), (PAD, PAD), (0, 0)))
    if stride == 2:
        xp = _space_to_depth2(xp)                    # 2x2 conv, 4*Cin lanes
        w_eff = _weight_space_to_depth2(weight)
        kh = kw = 2
    elif stride == 1:
        w_eff = weight
        kh = kw = 4
    else:
        raise ValueError("stride must be 1 or 2")
    ck = xp.shape[-1]

    # ---- tap packing (layer 1): fold the kh*kw taps into the channel axis ---
    # Free when the packed contraction fits one 128-lane tile (the unpacked
    # channel count is lane-padded to 128 anyway); the layer becomes pointwise.
    if kh * kw * ck <= 128:
        wp = _round_up(max(wo, 8), 8)
        hs, ws = xp.shape[1], xp.shape[2]
        need_h, need_w = ho + kh - 1, wp + kw - 1
        xp = jnp.pad(xp, ((0, 0), (0, max(0, need_h - hs)),
                          (0, max(0, need_w - ws)), (0, 0)))
        xp = jnp.concatenate(
            [xp[:, dh:dh + ho, dw:dw + wp, :]
             for dh in range(kh) for dw in range(kw)], axis=-1)
        w_eff = w_eff.reshape(1, 1, kh * kw * ck, cout)
        kh = kw = 1
        ck = xp.shape[-1]
    else:
        # Pad the width so dh*wp tap offsets are sublane-aligned and the flat
        # row-offset trick stays in bounds (wp >= wo + kw - 1, wp % 8 == 0).
        wp = _round_up(max(wo + kw - 1, 8), 8)
        ws = xp.shape[2]
        if ws < wp:
            xp = jnp.pad(xp, ((0, 0), (0, 0), (0, wp - ws), (0, 0)))
        elif ws > wp:
            xp = xp[:, :, :wp, :]

    taps = kh * kw
    halo = kh if kh > 1 else 0
    tco = _pick_cout_tile(cout)
    out_bytes = jnp.dtype(out_dtype).itemsize

    # ---- output-row tiling: largest row block that fits the VMEM budget ----
    ck_pad = _round_up(ck, 128)
    tco_pad = _round_up(tco, 128)
    x_row = wp * ck_pad * 2                          # bf16 activation bytes/row
    out_row = wp * tco_pad * out_bytes
    acc_row = wp * tco_pad * 4                       # f32 accumulator
    w_bytes = taps * ck_pad * tco_pad * 2
    shift_scratch = x_row if taps > 1 else 0         # dw-shifted slab copy
    budget = int(_vmem_limit_bytes() * 0.6)
    fixed = 2 * (halo * x_row + w_bytes) + halo * shift_scratch
    per_row = 2 * (x_row + out_row) + acc_row + shift_scratch
    th = (budget - fixed) // per_row if budget > fixed else 1
    th = max(1, min(ho, th))
    rb = -(-ho // th)
    ho_pad = rb * th

    hs = xp.shape[1]
    rows_needed = ho_pad + halo
    if hs < rows_needed:
        xp = jnp.pad(xp, ((0, 0), (0, rows_needed - hs), (0, 0), (0, 0)))
    elif hs > rows_needed:
        xp = xp[:, :rows_needed]

    s_rows = (th + halo) * wp
    m = th * wp
    if halo == 0:
        x_tiles = xp.reshape(n, rb, s_rows, ck)
    elif rb == 1:
        x_tiles = xp.reshape(n, 1, s_rows, ck)
    else:
        # Duplicate the kh-row halo per row block in the wrapper (one XLA
        # gather) so kernel tap slices never cross block boundaries.
        row_idx = jnp.arange(rb)[:, None] * th + jnp.arange(th + halo)[None, :]
        x_tiles = xp[:, row_idx].reshape(n, rb, s_rows, ck)

    w_flat = w_eff.reshape(taps, ck, cout).astype(jnp.bfloat16)
    scale2 = scale.reshape(1, cout).astype(jnp.float32)
    shift2 = shift.reshape(1, cout).astype(jnp.float32)

    x_spec_kwargs = {}
    if "v7" in _device_kind() and rb >= 3:
        # v7x: 2 TCs share HBM; a 3-deep pipeline on the row tile hides DMA
        # issue latency for the smaller (64 MiB-budgeted) row blocks.
        x_spec_kwargs = dict(pipeline_mode=pl.Buffered(3))

    kernel = functools.partial(_conv_affine_kernel, kh=kh, kw=kw, wp=wp, m=m,
                               neg_slope=neg_slope)
    out = pl.pallas_call(
        kernel,
        out_shape=jax.ShapeDtypeStruct((n, rb, m, cout), out_dtype),
        grid=(n, rb, cout // tco),                   # cout tiles innermost ->
        in_specs=[                                   # x row block stays resident
            pl.BlockSpec((None, None, s_rows, ck),
                         lambda b, r, c: (b, r, 0, 0), **x_spec_kwargs),
            pl.BlockSpec((taps, ck, tco), lambda b, r, c: (0, 0, c)),
            pl.BlockSpec((1, tco), lambda b, r, c: (0, c)),
            pl.BlockSpec((1, tco), lambda b, r, c: (0, c)),
        ],
        out_specs=pl.BlockSpec((None, None, m, tco),
                               lambda b, r, c: (b, r, 0, c)),
        compiler_params=pltpu.CompilerParams(
            dimension_semantics=("parallel", "parallel", "arbitrary"),
            vmem_limit_bytes=_vmem_limit_bytes()),
    )(x_tiles, w_flat, scale2, shift2)

    # Un-flatten at padded width, crop the valid rows / columns.
    return out.reshape(n, ho_pad, wp, cout)[:, :ho, :wo, :]


# ---------------------------------------------------------------------------
# Model: parameters, affine folding, full forward.
# ---------------------------------------------------------------------------
def build_discriminator_params(key, input_nc, ndf, n_layers):
    """Deterministic synthetic parameters (weights in HWIO)."""
    cfgs = [dict(cin=input_nc, cout=ndf, stride=2, bn=False, act=True)]
    nf = ndf
    for _ in range(1, n_layers):
        nf_prev, nf = nf, min(nf * 2, 512)
        cfgs.append(dict(cin=nf_prev, cout=nf, stride=2, bn=True, act=True))
    nf_prev, nf = nf, min(nf * 2, 512)
    cfgs.append(dict(cin=nf_prev, cout=nf, stride=1, bn=True, act=True))
    cfgs.append(dict(cin=nf, cout=1, stride=1, bn=False, act=False))

    params = []
    for cfg in cfgs:
        key, k_w, k_b, k_g, k_bt, k_m, k_v = jax.random.split(key, 7)
        cin, cout = cfg["cin"], cfg["cout"]
        bound = 1.0 / float(jnp.sqrt(cin * 4 * 4))
        p = dict(cfg)
        p["weight"] = jax.random.uniform(k_w, (4, 4, cin, cout), jnp.float32,
                                         -bound, bound)
        p["bias"] = jax.random.uniform(k_b, (cout,), jnp.float32, -bound, bound)
        if cfg["bn"]:
            p["gamma"] = jax.random.uniform(k_g, (cout,), jnp.float32, 0.5, 1.5)
            p["beta"] = jax.random.uniform(k_bt, (cout,), jnp.float32, -0.5, 0.5)
            p["mean"] = jax.random.uniform(k_m, (cout,), jnp.float32, -0.5, 0.5)
            p["var"] = jax.random.uniform(k_v, (cout,), jnp.float32, 0.5, 1.5)
        params.append(p)
    return params


def _fold_affine(p):
    """Fold conv bias and eval-mode BatchNorm into per-channel (scale, shift)."""
    if p["bn"]:
        s = p["gamma"] * jax.lax.rsqrt(p["var"] + BN_EPS)
        return s, p["beta"] + (p["bias"] - p["mean"]) * s
    return jnp.ones_like(p["bias"]), p["bias"]


def nlayer_discriminator(x, params):
    h = x
    for i, p in enumerate(params):
        scale, shift = _fold_affine(p)
        last = i == len(params) - 1
        h = conv4x4_affine_lrelu(
            h, p["weight"], scale, shift, stride=p["stride"],
            neg_slope=LEAKY_SLOPE if p["act"] else None,
            out_dtype=jnp.float32 if last else jnp.bfloat16)
    return h


def reference(x, params):
    """Pure-JAX reference (same bf16-operand / f32-accumulate / folded-affine
    convention with bf16 intermediates)."""
    h = x
    for i, p in enumerate(params):
        scale, shift = _fold_affine(p)
        hp = jnp.pad(h.astype(jnp.bfloat16), ((0, 0), (2, 2), (2, 2), (0, 0)))
        z = jax.lax.conv_general_dilated(
            hp, p["weight"].astype(jnp.bfloat16),
            window_strides=(p["stride"], p["stride"]), padding="VALID",
            dimension_numbers=("NHWC", "HWIO", "NHWC"),
            preferred_element_type=jnp.float32)
        z = z * scale + shift
        if p["act"]:
            z = jnp.where(z >= 0.0, z, LEAKY_SLOPE * z)
        h = z if i == len(params) - 1 else z.astype(jnp.bfloat16)
    return h


if __name__ == "__main__":
    # PyTorch input would be (2, 4, 16, 16) NCHW; the kernels use NHWC.
    N, H, W, input_nc = 2, 16, 16, 4
    ndf, n_layers = 8, 3

    key = jax.random.PRNGKey(0)
    key, kx = jax.random.split(key)
    x = jax.random.normal(kx, (N, H, W, input_nc), jnp.float32)
    params = build_discriminator_params(key, input_nc, ndf, n_layers)

    forward = jax.jit(lambda inp: nlayer_discriminator(inp, params))
    out = jax.block_until_ready(forward(x))

    ref = reference(x, params)
    assert out.shape == ref.shape, (out.shape, ref.shape)
    assert jnp.allclose(out, ref, atol=1e-2, rtol=1e-2), \
        float(jnp.max(jnp.abs(out - ref)))

    print("KERNEL_OK")
</pallas_src>

<mosaic_0001>
module attributes {stable_mosaic.version = 11 : i64} {
  func.func @_conv_affine_kernel(%arg0: i32, %arg1: i32, %arg2: i32, %arg3: memref<1x1x144x64xbf16, #tpu.memory_space<vmem>>, %arg4: memref<1x64x8xbf16, #tpu.memory_space<vmem>>, %arg5: memref<1x8xf32, #tpu.memory_space<vmem>>, %arg6: memref<1x8xf32, #tpu.memory_space<vmem>>, %arg7: memref<1x1x144x8xbf16, #tpu.memory_space<vmem>>) attributes {dimension_semantics = [#tpu.dimension_semantics<parallel>, #tpu.dimension_semantics<parallel>, #tpu.dimension_semantics<arbitrary>], iteration_bounds = array<i64: 2, 1, 1>, scalar_prefetch = 0 : i64, scratch_operands = 0 : i64, tpu.core_type = #tpu.core_type<tc>, window_params = [{transform_indices = @transform_0, window_bounds = array<i64: 1, 1, 144, 64>}, {transform_indices = @transform_1, window_bounds = array<i64: 1, 64, 8>}, {transform_indices = @transform_2, window_bounds = array<i64: 1, 8>}, {transform_indices = @transform_3, window_bounds = array<i64: 1, 8>}, {transform_indices = @transform_4, window_bounds = array<i64: 1, 1, 144, 8>}]} {
    %cst = arith.constant 0.000000e+00 : f32
    %0 = vector.broadcast %cst : f32 to vector<144x8xf32>
    %c0 = arith.constant 0 : index
    %c0_0 = arith.constant 0 : index
    %c0_1 = arith.constant 0 : index
    %c0_2 = arith.constant 0 : index
    %1 = vector.load %arg3[%c0, %c0_0, %c0_1, %c0_2] : memref<1x1x144x64xbf16, #tpu.memory_space<vmem>>, vector<1x1x144x64xbf16>
    %2 = vector.shape_cast %1 : vector<1x1x144x64xbf16> to vector<144x64xbf16>
    %c0_3 = arith.constant 0 : index
    %c0_4 = arith.constant 0 : index
    %c0_5 = arith.constant 0 : index
    %3 = vector.load %arg4[%c0_3, %c0_4, %c0_5] : memref<1x64x8xbf16, #tpu.memory_space<vmem>>, vector<1x64x8xbf16>
    %4 = vector.shape_cast %3 : vector<1x64x8xbf16> to vector<64x8xbf16>
    %cst_6 = arith.constant dense<0.000000e+00> : vector<144x8xf32>
    %5 = tpu.matmul %2, %4, %cst_6 {dimension_numbers = #tpu.dot_dimension_numbers<[1], [0], [0], [1], [0, 0, 1, 1], [], []>} : vector<144x64xbf16>, vector<64x8xbf16>, vector<144x8xf32> -> vector<144x8xf32>
    %6 = arith.addf %0, %5 : vector<144x8xf32>
    %c0_7 = arith.constant 0 : index
    %c0_8 = arith.constant 0 : index
    %7 = vector.load %arg5[%c0_7, %c0_8] : memref<1x8xf32, #tpu.memory_space<vmem>>, vector<1x8xf32>
    %8 = vector.broadcast %7 : vector<1x8xf32> to vector<144x8xf32>
    %9 = arith.mulf %6, %8 : vector<144x8xf32>
    %c0_9 = arith.constant 0 : index
    %c0_10 = arith.constant 0 : index
    %10 = vector.load %arg6[%c0_9, %c0_10] : memref<1x8xf32, #tpu.memory_space<vmem>>, vector<1x8xf32>
    %11 = vector.broadcast %10 : vector<1x8xf32> to vector<144x8xf32>
    %12 = arith.addf %9, %11 : vector<144x8xf32>
    %cst_11 = arith.constant 0.000000e+00 : f32
    %13 = vector.broadcast %cst_11 : f32 to vector<144x8xf32>
    %14 = arith.cmpf oge, %12, %13 : vector<144x8xf32>
    %cst_12 = arith.constant 2.000000e-01 : f32
    %15 = vector.broadcast %cst_12 : f32 to vector<144x8xf32>
    %16 = arith.mulf %15, %12 : vector<144x8xf32>
    %17 = arith.select %14, %12, %16 : vector<144x8xi1>, vector<144x8xf32>
    %18 = arith.truncf %17 : vector<144x8xf32> to vector<144x8xbf16>
    %c0_13 = arith.constant 0 : index
    %c0_14 = arith.constant 0 : index
    %c0_15 = arith.constant 0 : index
    %c0_16 = arith.constant 0 : index
    %19 = vector.load %arg7[%c0_13, %c0_14, %c0_15, %c0_16] : memref<1x1x144x8xbf16, #tpu.memory_space<vmem>>, vector<1x1x144x8xbf16>
    %20 = vector.shape_cast %19 : vector<1x1x144x8xbf16> to vector<144x8xbf16>
    %21 = vector.shape_cast %18 : vector<144x8xbf16> to vector<1x1x144x8xbf16>
    tpu.vector_store %arg7[%c0_13, %c0_14, %c0_15, %c0_16], %21 {strides = array<i32>} : memref<1x1x144x8xbf16, #tpu.memory_space<vmem>>, vector<1x1x144x8xbf16>,
    return
  }
  func.func @transform_0(%arg0: i32, %arg1: i32, %arg2: i32) -> (i32, i32, i32, i32) {
    %c0_i32 = arith.constant 0 : i32
    %c0_i32_0 = arith.constant 0 : i32
    %c0_i32_1 = arith.constant 0 : i32
    return %arg0, %arg1, %c0_i32, %c0_i32_0 : i32, i32, i32, i32
  }
  func.func @transform_1(%arg0: i32, %arg1: i32, %arg2: i32) -> (i32, i32, i32) {
    %c0_i32 = arith.constant 0 : i32
    %c0_i32_0 = arith.constant 0 : i32
    %c0_i32_1 = arith.constant 0 : i32
    return %c0_i32, %c0_i32_0, %arg2 : i32, i32, i32
  }
  func.func @transform_2(%arg0: i32, %arg1: i32, %arg2: i32) -> (i32, i32) {
    %c0_i32 = arith.constant 0 : i32
    %c0_i32_0 = arith.constant 0 : i32
    return %c0_i32, %arg2 : i32, i32
  }
  func.func @transform_3(%arg0: i32, %arg1: i32, %arg2: i32) -> (i32, i32) {
    %c0_i32 = arith.constant 0 : i32
    %c0_i32_0 = arith.constant 0 : i32
    return %c0_i32, %arg2 : i32, i32
  }
  func.func @transform_4(%arg0: i32, %arg1: i32, %arg2: i32) -> (i32, i32, i32, i32) {
    %c0_i32 = arith.constant 0 : i32
    %c0_i32_0 = arith.constant 0 : i32
    return %arg0, %arg1, %c0_i32, %arg2 : i32, i32, i32, i32
  }
}

module attributes {stable_mosaic.version = 11 : i64} {
  func.func @_conv_affine_kernel(%arg0: i32, %arg1: i32, %arg2: i32, %arg3: memref<1x1x40x128xbf16, #tpu.memory_space<vmem>>, %arg4: memref<1x128x16xbf16, #tpu.memory_space<vmem>>, %arg5: memref<1x16xf32, #tpu.memory_space<vmem>>, %arg6: memref<1x16xf32, #tpu.memory_space<vmem>>, %arg7: memref<1x1x40x16xbf16, #tpu.memory_space<vmem>>) attributes {dimension_semantics = [#tpu.dimension_semantics<parallel>, #tpu.dimension_semantics<parallel>, #tpu.dimension_semantics<arbitrary>], iteration_bounds = array<i64: 2, 1, 1>, scalar_prefetch = 0 : i64, scratch_operands = 0 : i64, tpu.core_type = #tpu.core_type<tc>, window_params = [{transform_indices = @transform_0, window_bounds = array<i64: 1, 1, 40, 128>}, {transform_indices = @transform_1, window_bounds = array<i64: 1, 128, 16>}, {transform_indices = @transform_2, window_bounds = array<i64: 1, 16>}, {transform_indices = @transform_3, window_bounds = array<i64: 1, 16>}, {transform_indices = @transform_4, window_bounds = array<i64: 1, 1, 40, 16>}]} {
    %cst = arith.constant 0.000000e+00 : f32
    %0 = vector.broadcast %cst : f32 to vector<40x16xf32>
    %c0 = arith.constant 0 : index
    %c0_0 = arith.constant 0 : index
    %c0_1 = arith.constant 0 : index
    %c0_2 = arith.constant 0 : index
    %1 = vector.load %arg3[%c0, %c0_0, %c0_1, %c0_2] : memref<1x1x40x128xbf16, #tpu.memory_space<vmem>>, vector<1x1x40x128xbf16>
    %2 = vector.shape_cast %1 : vector<1x1x40x128xbf16> to vector<40x128xbf16>
    %c0_3 = arith.constant 0 : index
    %c0_4 = arith.constant 0 : index
    %c0_5 = arith.constant 0 : index
    %3 = vector.load %arg4[%c0_3, %c0_4, %c0_5] : memref<1x128x16xbf16, #tpu.memory_space<vmem>>, vector<1x128x16xbf16>
    %4 = vector.shape_cast %3 : vector<1x128x16xbf16> to vector<128x16xbf16>
    %cst_6 = arith.constant dense<0.000000e+00> : vector<40x16xf32>
    %5 = tpu.matmul %2, %4, %cst_6 {dimension_numbers = #tpu.dot_dimension_numbers<[1], [0], [0], [1], [0, 0, 1, 1], [], []>} : vector<40x128xbf16>, vector<128x16xbf16>, vector<40x16xf32> -> vector<40x16xf32>
    %6 = arith.addf %0, %5 : vector<40x16xf32>
    %c0_7 = arith.constant 0 : index
    %c0_8 = arith.constant 0 : index
    %7 = vector.load %arg5[%c0_7, %c0_8] : memref<1x16xf32, #tpu.memory_space<vmem>>, vector<1x16xf32>
    %8 = vector.broadcast %7 : vector<1x16xf32> to vector<40x16xf32>
    %9 = arith.mulf %6, %8 : vector<40x16xf32>
    %c0_9 = arith.constant 0 : index
    %c0_10 = arith.constant 0 : index
    %10 = vector.load %arg6[%c0_9, %c0_10] : memref<1x16xf32, #tpu.memory_space<vmem>>, vector<1x16xf32>
    %11 = vector.broadcast %10 : vector<1x16xf32> to vector<40x16xf32>
    %12 = arith.addf %9, %11 : vector<40x16xf32>
    %cst_11 = arith.constant 0.000000e+00 : f32
    %13 = vector.broadcast %cst_11 : f32 to vector<40x16xf32>
    %14 = arith.cmpf oge, %12, %13 : vector<40x16xf32>
    %cst_12 = arith.constant 2.000000e-01 : f32
    %15 = vector.broadcast %cst_12 : f32 to vector<40x16xf32>
    %16 = arith.mulf %15, %12 : vector<40x16xf32>
    %17 = arith.select %14, %12, %16 : vector<40x16xi1>, vector<40x16xf32>
    %18 = arith.truncf %17 : vector<40x16xf32> to vector<40x16xbf16>
    %c0_13 = arith.constant 0 : index
    %c0_14 = arith.constant 0 : index
    %c0_15 = arith.constant 0 : index
    %c0_16 = arith.constant 0 : index
    %19 = vector.load %arg7[%c0_13, %c0_14, %c0_15, %c0_16] : memref<1x1x40x16xbf16, #tpu.memory_space<vmem>>, vector<1x1x40x16xbf16>
    %20 = vector.shape_cast %19 : vector<1x1x40x16xbf16> to vector<40x16xbf16>
    %21 = vector.shape_cast %18 : vector<40x16xbf16> to vector<1x1x40x16xbf16>
    tpu.vector_store %arg7[%c0_13, %c0_14, %c0_15, %c0_16], %21 {strides = array<i32>} : memref<1x1x40x16xbf16, #tpu.memory_space<vmem>>, vector<1x1x40x16xbf16>,
    return
  }
  func.func @transform_0(%arg0: i32, %arg1: i32, %arg2: i32) -> (i32, i32, i32, i32) {
    %c0_i32 = arith.constant 0 : i32
    %c0_i32_0 = arith.constant 0 : i32
    %c0_i32_1 = arith.constant 0 : i32
    return %arg0, %arg1, %c0_i32, %c0_i32_0 : i32, i32, i32, i32
  }
  func.func @transform_1(%arg0: i32, %arg1: i32, %arg2: i32) -> (i32, i32, i32) {
    %c0_i32 = arith.constant 0 : i32
    %c0_i32_0 = arith.constant 0 : i32
    %c0_i32_1 = arith.constant 0 : i32
    return %c0_i32, %c0_i32_0, %arg2 : i32, i32, i32
  }
  func.func @transform_2(%arg0: i32, %arg1: i32, %arg2: i32) -> (i32, i32) {
    %c0_i32 = arith.constant 0 : i32
    %c0_i32_0 = arith.constant 0 : i32
    return %c0_i32, %arg2 : i32, i32
  }
  func.func @transform_3(%arg0: i32, %arg1: i32, %arg2: i32) -> (i32, i32) {
    %c0_i32 = arith.constant 0 : i32
    %c0_i32_0 = arith.constant 0 : i32
    return %c0_i32, %arg2 : i32, i32
  }
  func.func @transform_4(%arg0: i32, %arg1: i32, %arg2: i32) -> (i32, i32, i32, i32) {
    %c0_i32 = arith.constant 0 : i32
    %c0_i32_0 = arith.constant 0 : i32
    return %arg0, %arg1, %c0_i32, %arg2 : i32, i32, i32, i32
  }
}

module attributes {stable_mosaic.version = 11 : i64} {
  func.func @_conv_affine_kernel(%arg0: i32, %arg1: i32, %arg2: i32, %arg3: memref<1x1x40x64xbf16, #tpu.memory_space<vmem>>, %arg4: memref<4x64x32xbf16, #tpu.memory_space<vmem>>, %arg5: memref<1x32xf32, #tpu.memory_space<vmem>>, %arg6: memref<1x32xf32, #tpu.memory_space<vmem>>, %arg7: memref<1x1x24x32xbf16, #tpu.memory_space<vmem>>) attributes {dimension_semantics = [#tpu.dimension_semantics<parallel>, #tpu.dimension_semantics<parallel>, #tpu.dimension_semantics<arbitrary>], iteration_bounds = array<i64: 2, 1, 1>, scalar_prefetch = 0 : i64, scratch_operands = 0 : i64, tpu.core_type = #tpu.core_type<tc>, window_params = [{transform_indices = @transform_0, window_bounds = array<i64: 1, 1, 40, 64>}, {transform_indices = @transform_1, window_bounds = array<i64: 4, 64, 32>}, {transform_indices = @transform_2, window_bounds = array<i64: 1, 32>}, {transform_indices = @transform_3, window_bounds = array<i64: 1, 32>}, {transform_indices = @transform_4, window_bounds = array<i64: 1, 1, 24, 32>}]} {
    %cst = arith.constant 0.000000e+00 : f32
    %0 = vector.broadcast %cst : f32 to vector<24x32xf32>
    %c0 = arith.constant 0 : index
    %c0_0 = arith.constant 0 : index
    %c0_1 = arith.constant 0 : index
    %c0_2 = arith.constant 0 : index
    %1 = vector.load %arg3[%c0, %c0_0, %c0_1, %c0_2] : memref<1x1x40x64xbf16, #tpu.memory_space<vmem>>, vector<1x1x24x64xbf16>
    %2 = vector.shape_cast %1 : vector<1x1x24x64xbf16> to vector<24x64xbf16>
    %c0_3 = arith.constant 0 : index
    %c0_4 = arith.constant 0 : index
    %c0_5 = arith.constant 0 : index
    %3 = vector.load %arg4[%c0_3, %c0_4, %c0_5] : memref<4x64x32xbf16, #tpu.memory_space<vmem>>, vector<1x64x32xbf16>
    %4 = vector.shape_cast %3 : vector<1x64x32xbf16> to vector<64x32xbf16>
    %cst_6 = arith.constant dense<0.000000e+00> : vector<24x32xf32>
    %5 = tpu.matmul %2, %4, %cst_6 {dimension_numbers = #tpu.dot_dimension_numbers<[1], [0], [0], [1], [0, 0, 1, 1], [], []>} : vector<24x64xbf16>, vector<64x32xbf16>, vector<24x32xf32> -> vector<24x32xf32>
    %6 = arith.addf %0, %5 : vector<24x32xf32>
    %c0_7 = arith.constant 0 : index
    %c0_8 = arith.constant 0 : index
    %c8 = arith.constant 8 : index
    %c0_9 = arith.constant 0 : index
    %7 = vector.load %arg3[%c0_7, %c0_8, %c8, %c0_9] : memref<1x1x40x64xbf16, #tpu.memory_space<vmem>>, vector<1x1x24x64xbf16>
    %8 = vector.shape_cast %7 : vector<1x1x24x64xbf16> to vector<24x64xbf16>
    %c2 = arith.constant 2 : index
    %c0_10 = arith.constant 0 : index
    %c0_11 = arith.constant 0 : index
    %9 = vector.load %arg4[%c2, %c0_10, %c0_11] : memref<4x64x32xbf16, #tpu.memory_space<vmem>>, vector<1x64x32xbf16>
    %10 = vector.shape_cast %9 : vector<1x64x32xbf16> to vector<64x32xbf16>
    %cst_12 = arith.constant dense<0.000000e+00> : vector<24x32xf32>
    %11 = tpu.matmul %8, %10, %cst_12 {dimension_numbers = #tpu.dot_dimension_numbers<[1], [0], [0], [1], [0, 0, 1, 1], [], []>} : vector<24x64xbf16>, vector<64x32xbf16>, vector<24x32xf32> -> vector<24x32xf32>
    %12 = arith.addf %6, %11 : vector<24x32xf32>
    %c0_13 = arith.constant 0 : index
    %c0_14 = arith.constant 0 : index
    %c1 = arith.constant 1 : index
    %c0_15 = arith.constant 0 : index
    %13 = vector.load %arg3[%c0_13, %c0_14, %c1, %c0_15] : memref<1x1x40x64xbf16, #tpu.memory_space<vmem>>, vector<1x1x32x64xbf16>
    %14 = vector.shape_cast %13 : vector<1x1x32x64xbf16> to vector<32x64xbf16>
    %15 = vector.extract_strided_slice %14 {offsets = [0, 0], sizes = [24, 64], strides = [1, 1]} : vector<32x64xbf16> to vector<24x64xbf16>
    %c1_16 = arith.constant 1 : index
    %c0_17 = arith.constant 0 : index
    %c0_18 = arith.constant 0 : index
    %16 = vector.load %arg4[%c1_16, %c0_17, %c0_18] : memref<4x64x32xbf16, #tpu.memory_space<vmem>>, vector<1x64x32xbf16>
    %17 = vector.shape_cast %16 : vector<1x64x32xbf16> to vector<64x32xbf16>
    %cst_19 = arith.constant dense<0.000000e+00> : vector<24x32xf32>
    %18 = tpu.matmul %15, %17, %cst_19 {dimension_numbers = #tpu.dot_dimension_numbers<[1], [0], [0], [1], [0, 0, 1, 1], [], []>} : vector<24x64xbf16>, vector<64x32xbf16>, vector<24x32xf32> -> vector<24x32xf32>
    %19 = arith.addf %12, %18 : vector<24x32xf32>
    %20 = vector.extract_strided_slice %14 {offsets = [8, 0], sizes = [24, 64], strides = [1, 1]} : vector<32x64xbf16> to vector<24x64xbf16>
    %c3 = arith.constant 3 : index
    %c0_20 = arith.constant 0 : index
    %c0_21 = arith.constant 0 : index
    %21 = vector.load %arg4[%c3, %c0_20, %c0_21] : memref<4x64x32xbf16, #tpu.memory_space<vmem>>, vector<1x64x32xbf16>
    %22 = vector.shape_cast %21 : vector<1x64x32xbf16> to vector<64x32xbf16>
    %cst_22 = arith.constant dense<0.000000e+00> : vector<24x32xf32>
    %23 = tpu.matmul %20, %22, %cst_22 {dimension_numbers = #tpu.dot_dimension_numbers<[1], [0], [0], [1], [0, 0, 1, 1], [], []>} : vector<24x64xbf16>, vector<64x32xbf16>, vector<24x32xf32> -> vector<24x32xf32>
    %24 = arith.addf %19, %23 : vector<24x32xf32>
    %c0_23 = arith.constant 0 : index
    %c0_24 = arith.constant 0 : index
    %25 = vector.load %arg5[%c0_23, %c0_24] : memref<1x32xf32, #tpu.memory_space<vmem>>, vector<1x32xf32>
    %26 = vector.broadcast %25 : vector<1x32xf32> to vector<24x32xf32>
    %27 = arith.mulf %24, %26 : vector<24x32xf32>
    %c0_25 = arith.constant 0 : index
    %c0_26 = arith.constant 0 : index
    %28 = vector.load %arg6[%c0_25, %c0_26] : memref<1x32xf32, #tpu.memory_space<vmem>>, vector<1x32xf32>
    %29 = vector.broadcast %28 : vector<1x32xf32> to vector<24x32xf32>
    %30 = arith.addf %27, %29 : vector<24x32xf32>
    %cst_27 = arith.constant 0.000000e+00 : f32
    %31 = vector.broadcast %cst_27 : f32 to vector<24x32xf32>
    %32 = arith.cmpf oge, %30, %31 : vector<24x32xf32>
    %cst_28 = arith.constant 2.000000e-01 : f32
    %33 = vector.broadcast %cst_28 : f32 to vector<24x32xf32>
    %34 = arith.mulf %33, %30 : vector<24x32xf32>
    %35 = arith.select %32, %30, %34 : vector<24x32xi1>, vector<24x32xf32>
    %36 = arith.truncf %35 : vector<24x32xf32> to vector<24x32xbf16>
    %c0_29 = arith.constant 0 : index
    %c0_30 = arith.constant 0 : index
    %c0_31 = arith.constant 0 : index
    %c0_32 = arith.constant 0 : index
    %37 = vector.load %arg7[%c0_29, %c0_30, %c0_31, %c0_32] : memref<1x1x24x32xbf16, #tpu.memory_space<vmem>>, vector<1x1x24x32xbf16>
    %38 = vector.shape_cast %37 : vector<1x1x24x32xbf16> to vector<24x32xbf16>
    %39 = vector.shape_cast %36 : vector<24x32xbf16> to vector<1x1x24x32xbf16>
    tpu.vector_store %arg7[%c0_29, %c0_30, %c0_31, %c0_32], %39 {strides = array<i32>} : memref<1x1x24x32xbf16, #tpu.memory_space<vmem>>, vector<1x1x24x32xbf16>,
    return
  }
  func.func @transform_0(%arg0: i32, %arg1: i32, %arg2: i32) -> (i32, i32, i32, i32) {
    %c0_i32 = arith.constant 0 : i32
    %c0_i32_0 = arith.constant 0 : i32
    %c0_i32_1 = arith.constant 0 : i32
    return %arg0, %arg1, %c0_i32, %c0_i32_0 : i32, i32, i32, i32
  }
  func.func @transform_1(%arg0: i32, %arg1: i32, %arg2: i32) -> (i32, i32, i32) {
    %c0_i32 = arith.constant 0 : i32
    %c0_i32_0 = arith.constant 0 : i32
    %c0_i32_1 = arith.constant 0 : i32
    return %c0_i32, %c0_i32_0, %arg2 : i32, i32, i32
  }
  func.func @transform_2(%arg0: i32, %arg1: i32, %arg2: i32) -> (i32, i32) {
    %c0_i32 = arith.constant 0 : i32
    %c0_i32_0 = arith.constant 0 : i32
    return %c0_i32, %arg2 : i32, i32
  }
  func.func @transform_3(%arg0: i32, %arg1: i32, %arg2: i32) -> (i32, i32) {
    %c0_i32 = arith.constant 0 : i32
    %c0_i32_0 = arith.constant 0 : i32
    return %c0_i32, %arg2 : i32, i32
  }
  func.func @transform_4(%arg0: i32, %arg1: i32, %arg2: i32) -> (i32, i32, i32, i32) {
    %c0_i32 = arith.constant 0 : i32
    %c0_i32_0 = arith.constant 0 : i32
    return %arg0, %arg1, %c0_i32, %arg2 : i32, i32, i32, i32
  }
}

module attributes {stable_mosaic.version = 11 : i64} {
  func.func @_conv_affine_kernel(%arg0: i32, %arg1: i32, %arg2: i32, %arg3: memref<1x1x64x32xbf16, #tpu.memory_space<vmem>>, %arg4: memref<16x32x64xbf16, #tpu.memory_space<vmem>>, %arg5: memref<1x64xf32, #tpu.memory_space<vmem>>, %arg6: memref<1x64xf32, #tpu.memory_space<vmem>>, %arg7: memref<1x1x32x64xbf16, #tpu.memory_space<vmem>>) attributes {dimension_semantics = [#tpu.dimension_semantics<parallel>, #tpu.dimension_semantics<parallel>, #tpu.dimension_semantics<arbitrary>], iteration_bounds = array<i64: 2, 1, 1>, scalar_prefetch = 0 : i64, scratch_operands = 0 : i64, tpu.core_type = #tpu.core_type<tc>, window_params = [{transform_indices = @transform_0, window_bounds = array<i64: 1, 1, 64, 32>}, {transform_indices = @transform_1, window_bounds = array<i64: 16, 32, 64>}, {transform_indices = @transform_2, window_bounds = array<i64: 1, 64>}, {transform_indices = @transform_3, window_bounds = array<i64: 1, 64>}, {transform_indices = @transform_4, window_bounds = array<i64: 1, 1, 32, 64>}]} {
    %cst = arith.constant 0.000000e+00 : f32
    %0 = vector.broadcast %cst : f32 to vector<32x64xf32>
    %c0 = arith.constant 0 : index
    %c0_0 = arith.constant 0 : index
    %c0_1 = arith.constant 0 : index
    %c0_2 = arith.constant 0 : index
    %1 = vector.load %arg3[%c0, %c0_0, %c0_1, %c0_2] : memref<1x1x64x32xbf16, #tpu.memory_space<vmem>>, vector<1x1x32x32xbf16>
    %2 = vector.shape_cast %1 : vector<1x1x32x32xbf16> to vector<32x32xbf16>
    %c0_3 = arith.constant 0 : index
    %c0_4 = arith.constant 0 : index
    %c0_5 = arith.constant 0 : index
    %3 = vector.load %arg4[%c0_3, %c0_4, %c0_5] : memref<16x32x64xbf16, #tpu.memory_space<vmem>>, vector<1x32x64xbf16>
    %4 = vector.shape_cast %3 : vector<1x32x64xbf16> to vector<32x64xbf16>
    %cst_6 = arith.constant dense<0.000000e+00> : vector<32x64xf32>
    %5 = tpu.matmul %2, %4, %cst_6 {dimension_numbers = #tpu.dot_dimension_numbers<[1], [0], [0], [1], [0, 0, 1, 1], [], []>} : vector<32x32xbf16>, vector<32x64xbf16>, vector<32x64xf32> -> vector<32x64xf32>
    %6 = arith.addf %0, %5 : vector<32x64xf32>
    %c0_7 = arith.constant 0 : index
    %c0_8 = arith.constant 0 : index
    %c8 = arith.constant 8 : index
    %c0_9 = arith.constant 0 : index
    %7 = vector.load %arg3[%c0_7, %c0_8, %c8, %c0_9] : memref<1x1x64x32xbf16, #tpu.memory_space<vmem>>, vector<1x1x32x32xbf16>
    %8 = vector.shape_cast %7 : vector<1x1x32x32xbf16> to vector<32x32xbf16>
    %c4 = arith.constant 4 : index
    %c0_10 = arith.constant 0 : index
    %c0_11 = arith.constant 0 : index
    %9 = vector.load %arg4[%c4, %c0_10, %c0_11] : memref<16x32x64xbf16, #tpu.memory_space<vmem>>, vector<1x32x64xbf16>
    %10 = vector.shape_cast %9 : vector<1x32x64xbf16> to vector<32x64xbf16>
    %cst_12 = arith.constant dense<0.000000e+00> : vector<32x64xf32>
    %11 = tpu.matmul %8, %10, %cst_12 {dimension_numbers = #tpu.dot_dimension_numbers<[1], [0], [0], [1], [0, 0, 1, 1], [], []>} : vector<32x32xbf16>, vector<32x64xbf16>, vector<32x64xf32> -> vector<32x64xf32>
    %12 = arith.addf %6, %11 : vector<32x64xf32>
    %c0_13 = arith.constant 0 : index
    %c0_14 = arith.constant 0 : index
    %c16 = arith.constant 16 : index
    %c0_15 = arith.constant 0 : index
    %13 = vector.load %arg3[%c0_13, %c0_14, %c16, %c0_15] : memref<1x1x64x32xbf16, #tpu.memory_space<vmem>>, vector<1x1x32x32xbf16>
    %14 = vector.shape_cast %13 : vector<1x1x32x32xbf16> to vector<32x32xbf16>
    %c8_16 = arith.constant 8 : index
    %c0_17 = arith.constant 0 : index
    %c0_18 = arith.constant 0 : index
    %15 = vector.load %arg4[%c8_16, %c0_17, %c0_18] : memref<16x32x64xbf16, #tpu.memory_space<vmem>>, vector<1x32x64xbf16>
    %16 = vector.shape_cast %15 : vector<1x32x64xbf16> to vector<32x64xbf16>
    %cst_19 = arith.constant dense<0.000000e+00> : vector<32x64xf32>
    %17 = tpu.matmul %14, %16, %cst_19 {dimension_numbers = #tpu.dot_dimension_numbers<[1], [0], [0], [1], [0, 0, 1, 1], [], []>} : vector<32x32xbf16>, vector<32x64xbf16>, vector<32x64xf32> -> vector<32x64xf32>
    %18 = arith.addf %12, %17 : vector<32x64xf32>
    %c0_20 = arith.constant 0 : index
    %c0_21 = arith.constant 0 : index
    %c24 = arith.constant 24 : index
    %c0_22 = arith.constant 0 : index
    %19 = vector.load %arg3[%c0_20, %c0_21, %c24, %c0_22] : memref<1x1x64x32xbf16, #tpu.memory_space<vmem>>, vector<1x1x32x32xbf16>
    %20 = vector.shape_cast %19 : vector<1x1x32x32xbf16> to vector<32x32xbf16>
    %c12 = arith.constant 12 : index
    %c0_23 = arith.constant 0 : index
    %c0_24 = arith.constant 0 : index
    %21 = vector.load %arg4[%c12, %c0_23, %c0_24] : memref<16x32x64xbf16, #tpu.memory_space<vmem>>, vector<1x32x64xbf16>
    %22 = vector.shape_cast %21 : vector<1x32x64xbf16> to vector<32x64xbf16>
    %cst_25 = arith.constant dense<0.000000e+00> : vector<32x64xf32>
    %23 = tpu.matmul %20, %22, %cst_25 {dimension_numbers = #tpu.dot_dimension_numbers<[1], [0], [0], [1], [0, 0, 1, 1], [], []>} : vector<32x32xbf16>, vector<32x64xbf16>, vector<32x64xf32> -> vector<32x64xf32>
    %24 = arith.addf %18, %23 : vector<32x64xf32>
    %c0_26 = arith.constant 0 : index
    %c0_27 = arith.constant 0 : index
    %c1 = arith.constant 1 : index
    %c0_28 = arith.constant 0 : index
    %25 = vector.load %arg3[%c0_26, %c0_27, %c1, %c0_28] : memref<1x1x64x32xbf16, #tpu.memory_space<vmem>>, vector<1x1x56x32xbf16>
    %26 = vector.shape_cast %25 : vector<1x1x56x32xbf16> to vector<56x32xbf16>
    %27 = vector.extract_strided_slice %26 {offsets = [0, 0], sizes = [32, 32], strides = [1, 1]} : vector<56x32xbf16> to vector<32x32xbf16>
    %c1_29 = arith.constant 1 : index
    %c0_30 = arith.constant 0 : index
    %c0_31 = arith.constant 0 : index
    %28 = vector.load %arg4[%c1_29, %c0_30, %c0_31] : memref<16x32x64xbf16, #tpu.memory_space<vmem>>, vector<1x32x64xbf16>
    %29 = vector.shape_cast %28 : vector<1x32x64xbf16> to vector<32x64xbf16>
    %cst_32 = arith.constant dense<0.000000e+00> : vector<32x64xf32>
    %30 = tpu.matmul %27, %29, %cst_32 {dimension_numbers = #tpu.dot_dimension_numbers<[1], [0], [0], [1], [0, 0, 1, 1], [], []>} : vector<32x32xbf16>, vector<32x64xbf16>, vector<32x64xf32> -> vector<32x64xf32>
    %31 = arith.addf %24, %30 : vector<32x64xf32>
    %32 = vector.extract_strided_slice %26 {offsets = [8, 0], sizes = [32, 32], strides = [1, 1]} : vector<56x32xbf16> to vector<32x32xbf16>
    %c5 = arith.constant 5 : index
    %c0_33 = arith.constant 0 : index
    %c0_34 = arith.constant 0 : index
    %33 = vector.load %arg4[%c5, %c0_33, %c0_34] : memref<16x32x64xbf16, #tpu.memory_space<vmem>>, vector<1x32x64xbf16>
    %34 = vector.shape_cast %33 : vector<1x32x64xbf16> to vector<32x64xbf16>
    %cst_35 = arith.constant dense<0.000000e+00> : vector<32x64xf32>
    %35 = tpu.matmul %32, %34, %cst_35 {dimension_numbers = #tpu.dot_dimension_numbers<[1], [0], [0], [1], [0, 0, 1, 1], [], []>} : vector<32x32xbf16>, vector<32x64xbf16>, vector<32x64xf32> -> vector<32x64xf32>
    %36 = arith.addf %31, %35 : vector<32x64xf32>
    %37 = vector.extract_strided_slice %26 {offsets = [16, 0], sizes = [32, 32], strides = [1, 1]} : vector<56x32xbf16> to vector<32x32xbf16>
    %c9 = arith.constant 9 : index
    %c0_36 = arith.constant 0 : index
    %c0_37 = arith.constant 0 : index
    %38 = vector.load %arg4[%c9, %c0_36, %c0_37] : memref<16x32x64xbf16, #tpu.memory_space<vmem>>, vector<1x32x64xbf16>
    %39 = vector.shape_cast %38 : vector<1x32x64xbf16> to vector<32x64xbf16>
    %cst_38 = arith.constant dense<0.000000e+00> : vector<32x64xf32>
    %40 = tpu.matmul %37, %39, %cst_38 {dimension_numbers = #tpu.dot_dimension_numbers<[1], [0], [0], [1], [0, 0, 1, 1], [], []>} : vector<32x32xbf16>, vector<32x64xbf16>, vector<32x64xf32> -> vector<32x64xf32>
    %41 = arith.addf %36, %40 : vector<32x64xf32>
    %42 = vector.extract_strided_slice %26 {offsets = [24, 0], sizes = [32, 32], strides = [1, 1]} : vector<56x32xbf16> to vector<32x32xbf16>
    %c13 = arith.constant 13 : index
    %c0_39 = arith.constant 0 : index
    %c0_40 = arith.constant 0 : index
    %43 = vector.load %arg4[%c13, %c0_39, %c0_40] : memref<16x32x64xbf16, #tpu.memory_space<vmem>>, vector<1x32x64xbf16>
    %44 = vector.shape_cast %43 : vector<1x32x64xbf16> to vector<32x64xbf16>
    %cst_41 = arith.constant dense<0.000000e+00> : vector<32x64xf32>
    %45 = tpu.matmul %42, %44, %cst_41 {dimension_numbers = #tpu.dot_dimension_numbers<[1], [0], [0], [1], [0, 0, 1, 1], [], []>} : vector<32x32xbf16>, vector<32x64xbf16>, vector<32x64xf32> -> vector<32x64xf32>
    %46 = arith.addf %41, %45 : vector<32x64xf32>
    %c0_42 = arith.constant 0 : index
    %c0_43 = arith.constant 0 : index
    %c2 = arith.constant 2 : index
    %c0_44 = arith.constant 0 : index
    %47 = vector.load %arg3[%c0_42, %c0_43, %c2, %c0_44] : memref<1x1x64x32xbf16, #tpu.memory_space<vmem>>, vector<1x1x56x32xbf16>
    %48 = vector.shape_cast %47 : vector<1x1x56x32xbf16> to vector<56x32xbf16>
    %49 = vector.extract_strided_slice %48 {offsets = [0, 0], sizes = [32, 32], strides = [1, 1]} : vector<56x32xbf16> to vector<32x32xbf16>
    %c2_45 = arith.constant 2 : index
    %c0_46 = arith.constant 0 : index
    %c0_47 = arith.constant 0 : index
    %50 = vector.load %arg4[%c2_45, %c0_46, %c0_47] : memref<16x32x64xbf16, #tpu.memory_space<vmem>>, vector<1x32x64xbf16>
    %51 = vector.shape_cast %50 : vector<1x32x64xbf16> to vector<32x64xbf16>
    %cst_48 = arith.constant dense<0.000000e+00> : vector<32x64xf32>
    %52 = tpu.matmul %49, %51, %cst_48 {dimension_numbers = #tpu.dot_dimension_numbers<[1], [0], [0], [1], [0, 0, 1, 1], [], []>} : vector<32x32xbf16>, vector<32x64xbf16>, vector<32x64xf32> -> vector<32x64xf32>
    %53 = arith.addf %46, %52 : vector<32x64xf32>
    %54 = vector.extract_strided_slice %48 {offsets = [8, 0], sizes = [32, 32], strides = [1, 1]} : vector<56x32xbf16> to vector<32x32xbf16>
    %c6 = arith.constant 6 : index
    %c0_49 = arith.constant 0 : index
    %c0_50 = arith.constant 0 : index
    %55 = vector.load %arg4[%c6, %c0_49, %c0_50] : memref<16x32x64xbf16, #tpu.memory_space<vmem>>, vector<1x32x64xbf16>
    %56 = vector.shape_cast %55 : vector<1x32x64xbf16> to vector<32x64xbf16>
    %cst_51 = arith.constant dense<0.000000e+00> : vector<32x64xf32>
    %57 = tpu.matmul %54, %56, %cst_51 {dimension_numbers = #tpu.dot_dimension_numbers<[1], [0], [0], [1], [0, 0, 1, 1], [], []>} : vector<32x32xbf16>, vector<32x64xbf16>, vector<32x64xf32> -> vector<32x64xf32>
    %58 = arith.addf %53, %57 : vector<32x64xf32>
    %59 = vector.extract_strided_slice %48 {offsets = [16, 0], sizes = [32, 32], strides = [1, 1]} : vector<56x32xbf16> to vector<32x32xbf16>
    %c10 = arith.constant 10 : index
    %c0_52 = arith.constant 0 : index
    %c0_53 = arith.constant 0 : index
    %60 = vector.load %arg4[%c10, %c0_52, %c0_53] : memref<16x32x64xbf16, #tpu.memory_space<vmem>>, vector<1x32x64xbf16>
    %61 = vector.shape_cast %60 : vector<1x32x64xbf16> to vector<32x64xbf16>
    %cst_54 = arith.constant dense<0.000000e+00> : vector<32x64xf32>
    %62 = tpu.matmul %59, %61, %cst_54 {dimension_numbers = #tpu.dot_dimension_numbers<[1], [0], [0], [1], [0, 0, 1, 1], [], []>} : vector<32x32xbf16>, vector<32x64xbf16>, vector<32x64xf32> -> vector<32x64xf32>
    %63 = arith.addf %58, %62 : vector<32x64xf32>
    %64 = vector.extract_strided_slice %48 {offsets = [24, 0], sizes = [32, 32], strides = [1, 1]} : vector<56x32xbf16> to vector<32x32xbf16>
    %c14 = arith.constant 14 : index
    %c0_55 = arith.constant 0 : index
    %c0_56 = arith.constant 0 : index
    %65 = vector.load %arg4[%c14, %c0_55, %c0_56] : memref<16x32x64xbf16, #tpu.memory_space<vmem>>, vector<1x32x64xbf16>
    %66 = vector.shape_cast %65 : vector<1x32x64xbf16> to vector<32x64xbf16>
    %cst_57 = arith.constant dense<0.000000e+00> : vector<32x64xf32>
    %67 = tpu.matmul %64, %66, %cst_57 {dimension_numbers = #tpu.dot_dimension_numbers<[1], [0], [0], [1], [0, 0, 1, 1], [], []>} : vector<32x32xbf16>, vector<32x64xbf16>, vector<32x64xf32> -> vector<32x64xf32>
    %68 = arith.addf %63, %67 : vector<32x64xf32>
    %c0_58 = arith.constant 0 : index
    %c0_59 = arith.constant 0 : index
    %c3 = arith.constant 3 : index
    %c0_60 = arith.constant 0 : index
    %69 = vector.load %arg3[%c0_58, %c0_59, %c3, %c0_60] : memref<1x1x64x32xbf16, #tpu.memory_space<vmem>>, vector<1x1x56x32xbf16>
    %70 = vector.shape_cast %69 : vector<1x1x56x32xbf16> to vector<56x32xbf16>
    %71 = vector.extract_strided_slice %70 {offsets = [0, 0], sizes = [32, 32], strides = [1, 1]} : vector<56x32xbf16> to vector<32x32xbf16>
    %c3_61 = arith.constant 3 : index
    %c0_62 = arith.constant 0 : index
    %c0_63 = arith.constant 0 : index
    %72 = vector.load %arg4[%c3_61, %c0_62, %c0_63] : memref<16x32x64xbf16, #tpu.memory_space<vmem>>, vector<1x32x64xbf16>
    %73 = vector.shape_cast %72 : vector<1x32x64xbf16> to vector<32x64xbf16>
    %cst_64 = arith.constant dense<0.000000e+00> : vector<32x64xf32>
    %74 = tpu.matmul %71, %73, %cst_64 {dimension_numbers = #tpu.dot_dimension_numbers<[1], [0], [0], [1], [0, 0, 1, 1], [], []>} : vector<32x32xbf16>, vector<32x64xbf16>, vector<32x64xf32> -> vector<32x64xf32>
    %75 = arith.addf %68, %74 : vector<32x64xf32>
    %76 = vector.extract_strided_slice %70 {offsets = [8, 0], sizes = [32, 32], strides = [1, 1]} : vector<56x32xbf16> to vector<32x32xbf16>
    %c7 = arith.constant 7 : index
    %c0_65 = arith.constant 0 : index
    %c0_66 = arith.constant 0 : index
    %77 = vector.load %arg4[%c7, %c0_65, %c0_66] : memref<16x32x64xbf16, #tpu.memory_space<vmem>>, vector<1x32x64xbf16>
    %78 = vector.shape_cast %77 : vector<1x32x64xbf16> to vector<32x64xbf16>
    %cst_67 = arith.constant dense<0.000000e+00> : vector<32x64xf32>
    %79 = tpu.matmul %76, %78, %cst_67 {dimension_numbers = #tpu.dot_dimension_numbers<[1], [0], [0], [1], [0, 0, 1, 1], [], []>} : vector<32x32xbf16>, vector<32x64xbf16>, vector<32x64xf32> -> vector<32x64xf32>
    %80 = arith.addf %75, %79 : vector<32x64xf32>
    %81 = vector.extract_strided_slice %70 {offsets = [16, 0], sizes = [32, 32], strides = [1, 1]} : vector<56x32xbf16> to vector<32x32xbf16>
    %c11 = arith.constant 11 : index
    %c0_68 = arith.constant 0 : index
    %c0_69 = arith.constant 0 : index
    %82 = vector.load %arg4[%c11, %c0_68, %c0_69] : memref<16x32x64xbf16, #tpu.memory_space<vmem>>, vector<1x32x64xbf16>
    %83 = vector.shape_cast %82 : vector<1x32x64xbf16> to vector<32x64xbf16>
    %cst_70 = arith.constant dense<0.000000e+00> : vector<32x64xf32>
    %84 = tpu.matmul %81, %83, %cst_70 {dimension_numbers = #tpu.dot_dimension_numbers<[1], [0], [0], [1], [0, 0, 1, 1], [], []>} : vector<32x32xbf16>, vector<32x64xbf16>, vector<32x64xf32> -> vector<32x64xf32>
    %85 = arith.addf %80, %84 : vector<32x64xf32>
    %86 = vector.extract_strided_slice %70 {offsets = [24, 0], sizes = [32, 32], strides = [1, 1]} : vector<56x32xbf16> to vector<32x32xbf16>
    %c15 = arith.constant 15 : index
    %c0_71 = arith.constant 0 : index
    %c0_72 = arith.constant 0 : index
    %87 = vector.load %arg4[%c15, %c0_71, %c0_72] : memref<16x32x64xbf16, #tpu.memory_space<vmem>>, vector<1x32x64xbf16>
    %88 = vector.shape_cast %87 : vector<1x32x64xbf16> to vector<32x64xbf16>
    %cst_73 = arith.constant dense<0.000000e+00> : vector<32x64xf32>
    %89 = tpu.matmul %86, %88, %cst_73 {dimension_numbers = #tpu.dot_dimension_numbers<[1], [0], [0], [1], [0, 0, 1, 1], [], []>} : vector<32x32xbf16>, vector<32x64xbf16>, vector<32x64xf32> -> vector<32x64xf32>
    %90 = arith.addf %85, %89 : vector<32x64xf32>
    %c0_74 = arith.constant 0 : index
    %c0_75 = arith.constant 0 : index
    %91 = vector.load %arg5[%c0_74, %c0_75] : memref<1x64xf32, #tpu.memory_space<vmem>>, vector<1x64xf32>
    %92 = vector.broadcast %91 : vector<1x64xf32> to vector<32x64xf32>
    %93 = arith.mulf %90, %92 : vector<32x64xf32>
    %c0_76 = arith.constant 0 : index
    %c0_77 = arith.constant 0 : index
    %94 = vector.load %arg6[%c0_76, %c0_77] : memref<1x64xf32, #tpu.memory_space<vmem>>, vector<1x64xf32>
    %95 = vector.broadcast %94 : vector<1x64xf32> to vector<32x64xf32>
    %96 = arith.addf %93, %95 : vector<32x64xf32>
    %cst_78 = arith.constant 0.000000e+00 : f32
    %97 = vector.broadcast %cst_78 : f32 to vector<32x64xf32>
    %98 = arith.cmpf oge, %96, %97 : vector<32x64xf32>
    %cst_79 = arith.constant 2.000000e-01 : f32
    %99 = vector.broadcast %cst_79 : f32 to vector<32x64xf32>
    %100 = arith.mulf %99, %96 : vector<32x64xf32>
    %101 = arith.select %98, %96, %100 : vector<32x64xi1>, vector<32x64xf32>
    %102 = arith.truncf %101 : vector<32x64xf32> to vector<32x64xbf16>
    %c0_80 = arith.constant 0 : index
    %c0_81 = arith.constant 0 : index
    %c0_82 = arith.constant 0 : index
    %c0_83 = arith.constant 0 : index
    %103 = vector.load %arg7[%c0_80, %c0_81, %c0_82, %c0_83] : memref<1x1x32x64xbf16, #tpu.memory_space<vmem>>, vector<1x1x32x64xbf16>
    %104 = vector.shape_cast %103 : vector<1x1x32x64xbf16> to vector<32x64xbf16>
    %105 = vector.shape_cast %102 : vector<32x64xbf16> to vector<1x1x32x64xbf16>
    tpu.vector_store %arg7[%c0_80, %c0_81, %c0_82, %c0_83], %105 {strides = array<i32>} : memref<1x1x32x64xbf16, #tpu.memory_space<vmem>>, vector<1x1x32x64xbf16>,
    return
  }
  func.func @transform_0(%arg0: i32, %arg1: i32, %arg2: i32) -> (i32, i32, i32, i32) {
    %c0_i32 = arith.constant 0 : i32
    %c0_i32_0 = arith.constant 0 : i32
    %c0_i32_1 = arith.constant 0 : i32
    return %arg0, %arg1, %c0_i32, %c0_i32_0 : i32, i32, i32, i32
  }
  func.func @transform_1(%arg0: i32, %arg1: i32, %arg2: i32) -> (i32, i32, i32) {
    %c0_i32 = arith.constant 0 : i32
    %c0_i32_0 = arith.constant 0 : i32
    %c0_i32_1 = arith.constant 0 : i32
    return %c0_i32, %c0_i32_0, %arg2 : i32, i32, i32
  }
  func.func @transform_2(%arg0: i32, %arg1: i32, %arg2: i32) -> (i32, i32) {
    %c0_i32 = arith.constant 0 : i32
    %c0_i32_0 = arith.constant 0 : i32
    return %c0_i32, %arg2 : i32, i32
  }
  func.func @transform_3(%arg0: i32, %arg1: i32, %arg2: i32) -> (i32, i32) {
    %c0_i32 = arith.constant 0 : i32
    %c0_i32_0 = arith.constant 0 : i32
    return %c0_i32, %arg2 : i32, i32
  }
  func.func @transform_4(%arg0: i32, %arg1: i32, %arg2: i32) -> (i32, i32, i32, i32) {
    %c0_i32 = arith.constant 0 : i32
    %c0_i32_0 = arith.constant 0 : i32
    return %arg0, %arg1, %c0_i32, %arg2 : i32, i32, i32, i32
  }
}

module attributes {stable_mosaic.version = 11 : i64} {
  func.func @_conv_affine_kernel(%arg0: i32, %arg1: i32, %arg2: i32, %arg3: memref<1x1x72x64xbf16, #tpu.memory_space<vmem>>, %arg4: memref<16x64x1xbf16, #tpu.memory_space<vmem>>, %arg5: memref<1x1xf32, #tpu.memory_space<vmem>>, %arg6: memref<1x1xf32, #tpu.memory_space<vmem>>, %arg7: memref<1x1x40x1xf32, #tpu.memory_space<vmem>>) attributes {dimension_semantics = [#tpu.dimension_semantics<parallel>, #tpu.dimension_semantics<parallel>, #tpu.dimension_semantics<arbitrary>], iteration_bounds = array<i64: 2, 1, 1>, scalar_prefetch = 0 : i64, scratch_operands = 0 : i64, tpu.core_type = #tpu.core_type<tc>, window_params = [{transform_indices = @transform_0, window_bounds = array<i64: 1, 1, 72, 64>}, {transform_indices = @transform_1, window_bounds = array<i64: 16, 64, 1>}, {transform_indices = @transform_2, window_bounds = array<i64: 1, 1>}, {transform_indices = @transform_3, window_bounds = array<i64: 1, 1>}, {transform_indices = @transform_4, window_bounds = array<i64: 1, 1, 40, 1>}]} {
    %cst = arith.constant 0.000000e+00 : f32
    %0 = vector.broadcast %cst : f32 to vector<40x1xf32>
    %c0 = arith.constant 0 : index
    %c0_0 = arith.constant 0 : index
    %c0_1 = arith.constant 0 : index
    %c0_2 = arith.constant 0 : index
    %1 = vector.load %arg3[%c0, %c0_0, %c0_1, %c0_2] : memref<1x1x72x64xbf16, #tpu.memory_space<vmem>>, vector<1x1x40x64xbf16>
    %2 = vector.shape_cast %1 : vector<1x1x40x64xbf16> to vector<40x64xbf16>
    %c0_3 = arith.constant 0 : index
    %c0_4 = arith.constant 0 : index
    %c0_5 = arith.constant 0 : index
    %3 = vector.load %arg4[%c0_3, %c0_4, %c0_5] : memref<16x64x1xbf16, #tpu.memory_space<vmem>>, vector<1x64x1xbf16>
    %4 = vector.shape_cast %3 : vector<1x64x1xbf16> to vector<64x1xbf16>
    %cst_6 = arith.constant dense<0.000000e+00> : vector<40x1xf32>
    %5 = tpu.matmul %2, %4, %cst_6 {dimension_numbers = #tpu.dot_dimension_numbers<[1], [0], [0], [1], [0, 0, 1, 1], [], []>} : vector<40x64xbf16>, vector<64x1xbf16>, vector<40x1xf32> -> vector<40x1xf32>
    %6 = arith.addf %0, %5 : vector<40x1xf32>
    %c0_7 = arith.constant 0 : index
    %c0_8 = arith.constant 0 : index
    %c8 = arith.constant 8 : index
    %c0_9 = arith.constant 0 : index
    %7 = vector.load %arg3[%c0_7, %c0_8, %c8, %c0_9] : memref<1x1x72x64xbf16, #tpu.memory_space<vmem>>, vector<1x1x40x64xbf16>
    %8 = vector.shape_cast %7 : vector<1x1x40x64xbf16> to vector<40x64xbf16>
    %c4 = arith.constant 4 : index
    %c0_10 = arith.constant 0 : index
    %c0_11 = arith.constant 0 : index
    %9 = vector.load %arg4[%c4, %c0_10, %c0_11] : memref<16x64x1xbf16, #tpu.memory_space<vmem>>, vector<1x64x1xbf16>
    %10 = vector.shape_cast %9 : vector<1x64x1xbf16> to vector<64x1xbf16>
    %cst_12 = arith.constant dense<0.000000e+00> : vector<40x1xf32>
    %11 = tpu.matmul %8, %10, %cst_12 {dimension_numbers = #tpu.dot_dimension_numbers<[1], [0], [0], [1], [0, 0, 1, 1], [], []>} : vector<40x64xbf16>, vector<64x1xbf16>, vector<40x1xf32> -> vector<40x1xf32>
    %12 = arith.addf %6, %11 : vector<40x1xf32>
    %c0_13 = arith.constant 0 : index
    %c0_14 = arith.constant 0 : index
    %c16 = arith.constant 16 : index
    %c0_15 = arith.constant 0 : index
    %13 = vector.load %arg3[%c0_13, %c0_14, %c16, %c0_15] : memref<1x1x72x64xbf16, #tpu.memory_space<vmem>>, vector<1x1x40x64xbf16>
    %14 = vector.shape_cast %13 : vector<1x1x40x64xbf16> to vector<40x64xbf16>
    %c8_16 = arith.constant 8 : index
    %c0_17 = arith.constant 0 : index
    %c0_18 = arith.constant 0 : index
    %15 = vector.load %arg4[%c8_16, %c0_17, %c0_18] : memref<16x64x1xbf16, #tpu.memory_space<vmem>>, vector<1x64x1xbf16>
    %16 = vector.shape_cast %15 : vector<1x64x1xbf16> to vector<64x1xbf16>
    %cst_19 = arith.constant dense<0.000000e+00> : vector<40x1xf32>
    %17 = tpu.matmul %14, %16, %cst_19 {dimension_numbers = #tpu.dot_dimension_numbers<[1], [0], [0], [1], [0, 0, 1, 1], [], []>} : vector<40x64xbf16>, vector<64x1xbf16>, vector<40x1xf32> -> vector<40x1xf32>
    %18 = arith.addf %12, %17 : vector<40x1xf32>
    %c0_20 = arith.constant 0 : index
    %c0_21 = arith.constant 0 : index
    %c24 = arith.constant 24 : index
    %c0_22 = arith.constant 0 : index
    %19 = vector.load %arg3[%c0_20, %c0_21, %c24, %c0_22] : memref<1x1x72x64xbf16, #tpu.memory_space<vmem>>, vector<1x1x40x64xbf16>
    %20 = vector.shape_cast %19 : vector<1x1x40x64xbf16> to vector<40x64xbf16>
    %c12 = arith.constant 12 : index
    %c0_23 = arith.constant 0 : index
    %c0_24 = arith.constant 0 : index
    %21 = vector.load %arg4[%c12, %c0_23, %c0_24] : memref<16x64x1xbf16, #tpu.memory_space<vmem>>, vector<1x64x1xbf16>
    %22 = vector.shape_cast %21 : vector<1x64x1xbf16> to vector<64x1xbf16>
    %cst_25 = arith.constant dense<0.000000e+00> : vector<40x1xf32>
    %23 = tpu.matmul %20, %22, %cst_25 {dimension_numbers = #tpu.dot_dimension_numbers<[1], [0], [0], [1], [0, 0, 1, 1], [], []>} : vector<40x64xbf16>, vector<64x1xbf16>, vector<40x1xf32> -> vector<40x1xf32>
    %24 = arith.addf %18, %23 : vector<40x1xf32>
    %c0_26 = arith.constant 0 : index
    %c0_27 = arith.constant 0 : index
    %c1 = arith.constant 1 : index
    %c0_28 = arith.constant 0 : index
    %25 = vector.load %arg3[%c0_26, %c0_27, %c1, %c0_28] : memref<1x1x72x64xbf16, #tpu.memory_space<vmem>>, vector<1x1x64x64xbf16>
    %26 = vector.shape_cast %25 : vector<1x1x64x64xbf16> to vector<64x64xbf16>
    %27 = vector.extract_strided_slice %26 {offsets = [0, 0], sizes = [40, 64], strides = [1, 1]} : vector<64x64xbf16> to vector<40x64xbf16>
    %c1_29 = arith.constant 1 : index
    %c0_30 = arith.constant 0 : index
    %c0_31 = arith.constant 0 : index
    %28 = vector.load %arg4[%c1_29, %c0_30, %c0_31] : memref<16x64x1xbf16, #tpu.memory_space<vmem>>, vector<1x64x1xbf16>
    %29 = vector.shape_cast %28 : vector<1x64x1xbf16> to vector<64x1xbf16>
    %cst_32 = arith.constant dense<0.000000e+00> : vector<40x1xf32>
    %30 = tpu.matmul %27, %29, %cst_32 {dimension_numbers = #tpu.dot_dimension_numbers<[1], [0], [0], [1], [0, 0, 1, 1], [], []>} : vector<40x64xbf16>, vector<64x1xbf16>, vector<40x1xf32> -> vector<40x1xf32>
    %31 = arith.addf %24, %30 : vector<40x1xf32>
    %32 = vector.extract_strided_slice %26 {offsets = [8, 0], sizes = [40, 64], strides = [1, 1]} : vector<64x64xbf16> to vector<40x64xbf16>
    %c5 = arith.constant 5 : index
    %c0_33 = arith.constant 0 : index
    %c0_34 = arith.constant 0 : index
    %33 = vector.load %arg4[%c5, %c0_33, %c0_34] : memref<16x64x1xbf16, #tpu.memory_space<vmem>>, vector<1x64x1xbf16>
    %34 = vector.shape_cast %33 : vector<1x64x1xbf16> to vector<64x1xbf16>
    %cst_35 = arith.constant dense<0.000000e+00> : vector<40x1xf32>
    %35 = tpu.matmul %32, %34, %cst_35 {dimension_numbers = #tpu.dot_dimension_numbers<[1], [0], [0], [1], [0, 0, 1, 1], [], []>} : vector<40x64xbf16>, vector<64x1xbf16>, vector<40x1xf32> -> vector<40x1xf32>
    %36 = arith.addf %31, %35 : vector<40x1xf32>
    %37 = vector.extract_strided_slice %26 {offsets = [16, 0], sizes = [40, 64], strides = [1, 1]} : vector<64x64xbf16> to vector<40x64xbf16>
    %c9 = arith.constant 9 : index
    %c0_36 = arith.constant 0 : index
    %c0_37 = arith.constant 0 : index
    %38 = vector.load %arg4[%c9, %c0_36, %c0_37] : memref<16x64x1xbf16, #tpu.memory_space<vmem>>, vector<1x64x1xbf16>
    %39 = vector.shape_cast %38 : vector<1x64x1xbf16> to vector<64x1xbf16>
    %cst_38 = arith.constant dense<0.000000e+00> : vector<40x1xf32>
    %40 = tpu.matmul %37, %39, %cst_38 {dimension_numbers = #tpu.dot_dimension_numbers<[1], [0], [0], [1], [0, 0, 1, 1], [], []>} : vector<40x64xbf16>, vector<64x1xbf16>, vector<40x1xf32> -> vector<40x1xf32>
    %41 = arith.addf %36, %40 : vector<40x1xf32>
    %42 = vector.extract_strided_slice %26 {offsets = [24, 0], sizes = [40, 64], strides = [1, 1]} : vector<64x64xbf16> to vector<40x64xbf16>
    %c13 = arith.constant 13 : index
    %c0_39 = arith.constant 0 : index
    %c0_40 = arith.constant 0 : index
    %43 = vector.load %arg4[%c13, %c0_39, %c0_40] : memref<16x64x1xbf16, #tpu.memory_space<vmem>>, vector<1x64x1xbf16>
    %44 = vector.shape_cast %43 : vector<1x64x1xbf16> to vector<64x1xbf16>
    %cst_41 = arith.constant dense<0.000000e+00> : vector<40x1xf32>
    %45 = tpu.matmul %42, %44, %cst_41 {dimension_numbers = #tpu.dot_dimension_numbers<[1], [0], [0], [1], [0, 0, 1, 1], [], []>} : vector<40x64xbf16>, vector<64x1xbf16>, vector<40x1xf32> -> vector<40x1xf32>
    %46 = arith.addf %41, %45 : vector<40x1xf32>
    %c0_42 = arith.constant 0 : index
    %c0_43 = arith.constant 0 : index
    %c2 = arith.constant 2 : index
    %c0_44 = arith.constant 0 : index
    %47 = vector.load %arg3[%c0_42, %c0_43, %c2, %c0_44] : memref<1x1x72x64xbf16, #tpu.memory_space<vmem>>, vector<1x1x64x64xbf16>
    %48 = vector.shape_cast %47 : vector<1x1x64x64xbf16> to vector<64x64xbf16>
    %49 = vector.extract_strided_slice %48 {offsets = [0, 0], sizes = [40, 64], strides = [1, 1]} : vector<64x64xbf16> to vector<40x64xbf16>
    %c2_45 = arith.constant 2 : index
    %c0_46 = arith.constant 0 : index
    %c0_47 = arith.constant 0 : index
    %50 = vector.load %arg4[%c2_45, %c0_46, %c0_47] : memref<16x64x1xbf16, #tpu.memory_space<vmem>>, vector<1x64x1xbf16>
    %51 = vector.shape_cast %50 : vector<1x64x1xbf16> to vector<64x1xbf16>
    %cst_48 = arith.constant dense<0.000000e+00> : vector<40x1xf32>
    %52 = tpu.matmul %49, %51, %cst_48 {dimension_numbers = #tpu.dot_dimension_numbers<[1], [0], [0], [1], [0, 0, 1, 1], [], []>} : vector<40x64xbf16>, vector<64x1xbf16>, vector<40x1xf32> -> vector<40x1xf32>
    %53 = arith.addf %46, %52 : vector<40x1xf32>
    %54 = vector.extract_strided_slice %48 {offsets = [8, 0], sizes = [40, 64], strides = [1, 1]} : vector<64x64xbf16> to vector<40x64xbf16>
    %c6 = arith.constant 6 : index
    %c0_49 = arith.constant 0 : index
    %c0_50 = arith.constant 0 : index
    %55 = vector.load %arg4[%c6, %c0_49, %c0_50] : memref<16x64x1xbf16, #tpu.memory_space<vmem>>, vector<1x64x1xbf16>
    %56 = vector.shape_cast %55 : vector<1x64x1xbf16> to vector<64x1xbf16>
    %cst_51 = arith.constant dense<0.000000e+00> : vector<40x1xf32>
    %57 = tpu.matmul %54, %56, %cst_51 {dimension_numbers = #tpu.dot_dimension_numbers<[1], [0], [0], [1], [0, 0, 1, 1], [], []>} : vector<40x64xbf16>, vector<64x1xbf16>, vector<40x1xf32> -> vector<40x1xf32>
    %58 = arith.addf %53, %57 : vector<40x1xf32>
    %59 = vector.extract_strided_slice %48 {offsets = [16, 0], sizes = [40, 64], strides = [1, 1]} : vector<64x64xbf16> to vector<40x64xbf16>
    %c10 = arith.constant 10 : index
    %c0_52 = arith.constant 0 : index
    %c0_53 = arith.constant 0 : index
    %60 = vector.load %arg4[%c10, %c0_52, %c0_53] : memref<16x64x1xbf16, #tpu.memory_space<vmem>>, vector<1x64x1xbf16>
    %61 = vector.shape_cast %60 : vector<1x64x1xbf16> to vector<64x1xbf16>
    %cst_54 = arith.constant dense<0.000000e+00> : vector<40x1xf32>
    %62 = tpu.matmul %59, %61, %cst_54 {dimension_numbers = #tpu.dot_dimension_numbers<[1], [0], [0], [1], [0, 0, 1, 1], [], []>} : vector<40x64xbf16>, vector<64x1xbf16>, vector<40x1xf32> -> vector<40x1xf32>
    %63 = arith.addf %58, %62 : vector<40x1xf32>
    %64 = vector.extract_strided_slice %48 {offsets = [24, 0], sizes = [40, 64], strides = [1, 1]} : vector<64x64xbf16> to vector<40x64xbf16>
    %c14 = arith.constant 14 : index
    %c0_55 = arith.constant 0 : index
    %c0_56 = arith.constant 0 : index
    %65 = vector.load %arg4[%c14, %c0_55, %c0_56] : memref<16x64x1xbf16, #tpu.memory_space<vmem>>, vector<1x64x1xbf16>
    %66 = vector.shape_cast %65 : vector<1x64x1xbf16> to vector<64x1xbf16>
    %cst_57 = arith.constant dense<0.000000e+00> : vector<40x1xf32>
    %67 = tpu.matmul %64, %66, %cst_57 {dimension_numbers = #tpu.dot_dimension_numbers<[1], [0], [0], [1], [0, 0, 1, 1], [], []>} : vector<40x64xbf16>, vector<64x1xbf16>, vector<40x1xf32> -> vector<40x1xf32>
    %68 = arith.addf %63, %67 : vector<40x1xf32>
    %c0_58 = arith.constant 0 : index
    %c0_59 = arith.constant 0 : index
    %c3 = arith.constant 3 : index
    %c0_60 = arith.constant 0 : index
    %69 = vector.load %arg3[%c0_58, %c0_59, %c3, %c0_60] : memref<1x1x72x64xbf16, #tpu.memory_space<vmem>>, vector<1x1x64x64xbf16>
    %70 = vector.shape_cast %69 : vector<1x1x64x64xbf16> to vector<64x64xbf16>
    %71 = vector.extract_strided_slice %70 {offsets = [0, 0], sizes = [40, 64], strides = [1, 1]} : vector<64x64xbf16> to vector<40x64xbf16>
    %c3_61 = arith.constant 3 : index
    %c0_62 = arith.constant 0 : index
    %c0_63 = arith.constant 0 : index
    %72 = vector.load %arg4[%c3_61, %c0_62, %c0_63] : memref<16x64x1xbf16, #tpu.memory_space<vmem>>, vector<1x64x1xbf16>
    %73 = vector.shape_cast %72 : vector<1x64x1xbf16> to vector<64x1xbf16>
    %cst_64 = arith.constant dense<0.000000e+00> : vector<40x1xf32>
    %74 = tpu.matmul %71, %73, %cst_64 {dimension_numbers = #tpu.dot_dimension_numbers<[1], [0], [0], [1], [0, 0, 1, 1], [], []>} : vector<40x64xbf16>, vector<64x1xbf16>, vector<40x1xf32> -> vector<40x1xf32>
    %75 = arith.addf %68, %74 : vector<40x1xf32>
    %76 = vector.extract_strided_slice %70 {offsets = [8, 0], sizes = [40, 64], strides = [1, 1]} : vector<64x64xbf16> to vector<40x64xbf16>
    %c7 = arith.constant 7 : index
    %c0_65 = arith.constant 0 : index
    %c0_66 = arith.constant 0 : index
    %77 = vector.load %arg4[%c7, %c0_65, %c0_66] : memref<16x64x1xbf16, #tpu.memory_space<vmem>>, vector<1x64x1xbf16>
    %78 = vector.shape_cast %77 : vector<1x64x1xbf16> to vector<64x1xbf16>
    %cst_67 = arith.constant dense<0.000000e+00> : vector<40x1xf32>
    %79 = tpu.matmul %76, %78, %cst_67 {dimension_numbers = #tpu.dot_dimension_numbers<[1], [0], [0], [1], [0, 0, 1, 1], [], []>} : vector<40x64xbf16>, vector<64x1xbf16>, vector<40x1xf32> -> vector<40x1xf32>
    %80 = arith.addf %75, %79 : vector<40x1xf32>
    %81 = vector.extract_strided_slice %70 {offsets = [16, 0], sizes = [40, 64], strides = [1, 1]} : vector<64x64xbf16> to vector<40x64xbf16>
    %c11 = arith.constant 11 : index
    %c0_68 = arith.constant 0 : index
    %c0_69 = arith.constant 0 : index
    %82 = vector.load %arg4[%c11, %c0_68, %c0_69] : memref<16x64x1xbf16, #tpu.memory_space<vmem>>, vector<1x64x1xbf16>
    %83 = vector.shape_cast %82 : vector<1x64x1xbf16> to vector<64x1xbf16>
    %cst_70 = arith.constant dense<0.000000e+00> : vector<40x1xf32>
    %84 = tpu.matmul %81, %83, %cst_70 {dimension_numbers = #tpu.dot_dimension_numbers<[1], [0], [0], [1], [0, 0, 1, 1], [], []>} : vector<40x64xbf16>, vector<64x1xbf16>, vector<40x1xf32> -> vector<40x1xf32>
    %85 = arith.addf %80, %84 : vector<40x1xf32>
    %86 = vector.extract_strided_slice %70 {offsets = [24, 0], sizes = [40, 64], strides = [1, 1]} : vector<64x64xbf16> to vector<40x64xbf16>
    %c15 = arith.constant 15 : index
    %c0_71 = arith.constant 0 : index
    %c0_72 = arith.constant 0 : index
    %87 = vector.load %arg4[%c15, %c0_71, %c0_72] : memref<16x64x1xbf16, #tpu.memory_space<vmem>>, vector<1x64x1xbf16>
    %88 = vector.shape_cast %87 : vector<1x64x1xbf16> to vector<64x1xbf16>
    %cst_73 = arith.constant dense<0.000000e+00> : vector<40x1xf32>
    %89 = tpu.matmul %86, %88, %cst_73 {dimension_numbers = #tpu.dot_dimension_numbers<[1], [0], [0], [1], [0, 0, 1, 1], [], []>} : vector<40x64xbf16>, vector<64x1xbf16>, vector<40x1xf32> -> vector<40x1xf32>
    %90 = arith.addf %85, %89 : vector<40x1xf32>
    %c0_74 = arith.constant 0 : index
    %c0_75 = arith.constant 0 : index
    %91 = vector.load %arg5[%c0_74, %c0_75] : memref<1x1xf32, #tpu.memory_space<vmem>>, vector<1x1xf32>
    %92 = vector.broadcast %91 : vector<1x1xf32> to vector<40x1xf32>
    %93 = arith.mulf %90, %92 : vector<40x1xf32>
    %c0_76 = arith.constant 0 : index
    %c0_77 = arith.constant 0 : index
    %94 = vector.load %arg6[%c0_76, %c0_77] : memref<1x1xf32, #tpu.memory_space<vmem>>, vector<1x1xf32>
    %95 = vector.broadcast %94 : vector<1x1xf32> to vector<40x1xf32>
    %96 = arith.addf %93, %95 : vector<40x1xf32>
    %c0_78 = arith.constant 0 : index
    %c0_79 = arith.constant 0 : index
    %c0_80 = arith.constant 0 : index
    %c0_81 = arith.constant 0 : index
    %97 = vector.load %arg7[%c0_78, %c0_79, %c0_80, %c0_81] : memref<1x1x40x1xf32, #tpu.memory_space<vmem>>, vector<1x1x40x1xf32>
    %98 = vector.shape_cast %97 : vector<1x1x40x1xf32> to vector<40x1xf32>
    %99 = vector.shape_cast %96 : vector<40x1xf32> to vector<1x1x40x1xf32>
    tpu.vector_store %arg7[%c0_78, %c0_79, %c0_80, %c0_81], %99 {strides = array<i32>} : memref<1x1x40x1xf32, #tpu.memory_space<vmem>>, vector<1x1x40x1xf32>,
    return
  }
  func.func @transform_0(%arg0: i32, %arg1: i32, %arg2: i32) -> (i32, i32, i32, i32) {
    %c0_i32 = arith.constant 0 : i32
    %c0_i32_0 = arith.constant 0 : i32
    %c0_i32_1 = arith.constant 0 : i32
    return %arg0, %arg1, %c0_i32, %c0_i32_0 : i32, i32, i32, i32
  }
  func.func @transform_1(%arg0: i32, %arg1: i32, %arg2: i32) -> (i32, i32, i32) {
    %c0_i32 = arith.constant 0 : i32
    %c0_i32_0 = arith.constant 0 : i32
    %c0_i32_1 = arith.constant 0 : i32
    return %c0_i32, %c0_i32_0, %arg2 : i32, i32, i32
  }
  func.func @transform_2(%arg0: i32, %arg1: i32, %arg2: i32) -> (i32, i32) {
    %c0_i32 = arith.constant 0 : i32
    %c0_i32_0 = arith.constant 0 : i32
    return %c0_i32, %arg2 : i32, i32
  }
  func.func @transform_3(%arg0: i32, %arg1: i32, %arg2: i32) -> (i32, i32) {
    %c0_i32 = arith.constant 0 : i32
    %c0_i32_0 = arith.constant 0 : i32
    return %c0_i32, %arg2 : i32, i32
  }
  func.func @transform_4(%arg0: i32, %arg1: i32, %arg2: i32) -> (i32, i32, i32, i32) {
    %c0_i32 = arith.constant 0 : i32
    %c0_i32_0 = arith.constant 0 : i32
    return %arg0, %arg1, %c0_i32, %arg2 : i32, i32, i32, i32
  }
}

</mosaic_0001>

<bundles_post_ra>
// kernel: _lambda_.5
= control target key start
LH: loop header
LB: loop body
LE: loop exit
PB: predicated region body
PF: predicated region fallthrough
CT: control target
= control target key end

     0   :  { %9 = vsyncpa [#allocation3], 0  ;;  %s1766_s0 = inlined_call_operand.hbm [shape: bf16[2,1,144,64], index: 0, kind: input, shape index: {}]   ;;  %s1767_s1 = inlined_call_operand.hbm [shape: bf16[1,64,8], index: 1, kind: input, shape index: {}]   ;;  %s1768_s2 = inlined_call_operand.hbm [shape: f32[1,8], index: 2, kind: input, shape index: {}]   ;;  %s1769_s3 = inlined_call_operand.hbm [shape: f32[1,8], index: 3, kind: input, shape index: {}]   ;;  %s1770_s4 = inlined_call_operand.hbm [shape: bf16[2,1,144,8], index: 4, kind: output, shape index: {}]  }
   0x1   :  { %11 = vsyncpa [#allocation3 + $0x1], 0 }
   0x2   :  { %12 = vsyncpa [#allocation6], 0 }
   0x3   :  { %13 = vsyncpa [#allocation9], 0 }
   0x4   :  { %14 = vsyncpa [#allocation4], 0 }
   0x5   :  { %16 = vsyncpa [#allocation4 + $0x1], 0  ;;  %s1369_s15 = smov 0   ;;  %s1371_s16 = smov 0  }
   0x6   :  { %s1373_s17 = smov 0   ;;  %s1375_s18 = smov 0  }
   0x7   :  { %s1377_s19 = smov 0   ;;  %s1379_s20 = smov 0  }
   0x8 LB: > { %s871_s21 = sadd.s32 4294967295, %s1331_s20   ;;  %s872_s22 = sadd.s32 4294967294, %s1331_s20   ;;  %s1331_s20 = sphi %s1379_s20, %s22_s20   ;;  %s1327_s19 = sphi %s1377_s19, %s1799_s19   ;;  %s1323_s18 = sphi %s1375_s18, %s1798_s18   ;;  %s1319_s17 = sphi %s1373_s17, %s1797_s17   ;;  %s1315_s16 = sphi %s1371_s16, %s1796_s16   ;;  %s1311_s15 = sphi %s1369_s15, %s1795_s15  }
   0x9   : > { %p63_p0 = scmp.ne.s32.totalorder %s1315_s16, %s1311_s15  ;;  %p1403_p1 = scmp.eq.s32.totalorder %s871_s21, 0 }
   0xa   : > { %p1407_p2 = scmp.eq.s32.totalorder %s871_s21, 1  ;;  %p175_p3 = scmp.eq.s32.totalorder %s872_s22, 1 }
   0xb   : > { %s1777_s23 = scalar_select %p1403_p1, 1, 0 }
   0xc   : > { %s1778_s24 = scalar_select %p1407_p2, 1, 0 }
   0xd   : > { %p1413_p4 = por %p1403_p1, %p63_p0  ;;  %p873_p5 = scmp.ge.s32.totalorder %s1331_s20, 1 }
   0xe   : > { %p1418_p6 = por %p175_p3, %p63_p0  ;;  %p182_p7 = scmp.lt.s32.totalorder %s1331_s20, 3 }
   0xf   : > { %s1779_s25 = scalar_select %p1413_p4, 1, 0 }
  0x10   : > { %s1780_s26 = scalar_select %p1418_p6, 1, 0 }
  0x11   : > { %p1423_p8 = pnand %p873_p5, %p182_p7  ;;  %s1333_s28 = smov [#allocation5]  }
  0x12   : > { %1781 = sst [smem:[#allocation15_spill]] %s1780_s26  ;;  %s196_s29 = sshll.u32 %s1333_s28, 4  ;;  %s1427_s29 = int_to_ptr.vmem [resolvable:$true] %s196_s29 }
  0x13   : > { %s1782_s27 = scalar_select %p1423_p8, 1, 0 }
  0x14   : > { %p1031_p9 = pneg %p1423_p8  ;;  %s1334_s5 = smov [#allocation7]  }
  0x15   : > { %s212_s6 = sshll.u32 %s1334_s5, 4  ;;  %s1335_s7 = smov [#allocation8]   ;;  %s1438_s6 = int_to_ptr.vmem [resolvable:$true] %s212_s6 }
  0x16   : > { %p1434_p11 = pnand %p1031_p9, %p1403_p1  ;;  %s1440_s8 = sshll.u32 %s1335_s7, 4  ;;  %s226_s8 = int_to_ptr.vmem [resolvable:$true] %s1440_s8 }
  0x17   : > { %s1127_s11 = scalar_lea.hbm %s1767_s1, 512 }
  0x18   : > { %p1128_p12 = scmp.ne.s32.totalorder %s1767_s1, %s1127_s11  ;;  %p1450_p13 = pneg %p1434_p11 }
  0x19   : > { %p1134_p5 = scmp.lt.u32.totalorder %s1127_s11, %s1767_s1 }
  0x1a   : > { %p1130_p0 = pnand %p1450_p13, %p1128_p12 }
  0x1c   : > { %p1131_p3 = pneg %p1130_p0 }
  0x1e   : > { %p1136_p7 = pnand %p1134_p5, %p1131_p3 }
  0x20   : > { %1139 = shalt.err (!%p1136_p7)
}
  0x21   : > { %s1140_s28 = scalar_lea.vmem %s1427_s29, 512  ;;  %p1148_p1 = scmp.lt.s32.totalorder %s1427_s29, %s1427_s29 }
  0x22   : > { %p1141_p9 = scmp.ne.s32.totalorder %s1427_s29, %s1140_s28  ;;  %p1149_p4 = scmp.lt.s32.totalorder %s1140_s28, %s1140_s28 }
  0x24   : > { %p1143_p10 = pnand %p1141_p9, %p1450_p13  ;;  %p1150_p12 = por %p1149_p4, %p1148_p1 }
  0x26   : > { %p1144_p6 = pneg %p1143_p10 }
  0x28   : > { %p1151_p0 = pnand %p1150_p12, %p1144_p6 }
  0x2a   : > { %1154 = shalt.err (!%p1151_p0)
}
  0x2b   : > { %s1776_s5 = smov 64   ;;  %s1337_s7 = smov 4  }
  0x2c   : > { %1034 = dma.hbm_to_vmem [thread:$0]  (!%p1434_p11), %s1767_s1, 512, %s1427_s29, [#allocation6], %s1776_s5, %s1776_s5, %s1337_s7  }
  0x2d   : > { %s1155_s13 = scalar_lea.hbm %s1768_s2, 16 }
  0x2e   : > { %p1156_p1 = scmp.ne.s32.totalorder %s1768_s2, %s1155_s13  ;;  %p1162_p10 = scmp.lt.u32.totalorder %s1155_s13, %s1768_s2 }
  0x30   : > { %p1158_p4 = pnand %p1156_p1, %p1450_p13 }
  0x32   : > { %p1159_p6 = pneg %p1158_p4 }
  0x34   : > { %p1164_p3 = pnand %p1162_p10, %p1159_p6 }
  0x36   : > { %1167 = shalt.err (!%p1164_p3)
}
  0x37   : > { %s1168_s29 = scalar_lea.vmem %s1438_s6, 16  ;;  %s1175_s9 = scalar_lea.vmem %s1438_s6, 32 }
  0x38   : > { %p1169_p5 = scmp.ne.s32.totalorder %s1438_s6, %s1168_s29  ;;  %p1176_p12 = scmp.lt.s32.totalorder %s1438_s6, %s1438_s6 }
  0x39   : > { %p1177_p0 = scmp.lt.s32.totalorder %s1175_s9, %s1168_s29 }
  0x3a   : > { %p1171_p7 = pnand %p1169_p5, %p1450_p13 }
  0x3b   : > { %p1178_p1 = por %p1177_p0, %p1176_p12 }
  0x3c   : > { %p1172_p9 = pneg %p1171_p7 }
  0x3e   : > { %p1179_p4 = pnand %p1178_p1, %p1172_p9 }
  0x40   : > { %1182 = shalt.err (!%p1179_p4)
}
  0x41   : > { %1037 = dma.hbm_to_vmem [thread:$0]  (!%p1434_p11), %s1768_s2, 16, %s1438_s6, [#allocation6]  }
  0x42   : > { %s1183_s13 = scalar_lea.hbm %s1769_s3, 16 }
  0x43   : > { %p1184_p6 = scmp.ne.s32.totalorder %s1769_s3, %s1183_s13  ;;  %p1190_p5 = scmp.lt.u32.totalorder %s1183_s13, %s1769_s3 }
  0x45   : > { %p1186_p10 = pnand %p1184_p6, %p1450_p13 }
  0x47   : > { %p1187_p3 = pneg %p1186_p10 }
  0x49   : > { %p1192_p7 = pnand %p1190_p5, %p1187_p3 }
  0x4b   : > { %1195 = shalt.err (!%p1192_p7)
}
  0x4c   : > { %s1196_s9 = scalar_lea.vmem %s226_s8, 16  ;;  %s1203_s6 = scalar_lea.vmem %s226_s8, 32 }
  0x4d   : > { %p1197_p9 = scmp.ne.s32.totalorder %s226_s8, %s1196_s9  ;;  %p1204_p1 = scmp.lt.s32.totalorder %s226_s8, %s226_s8 }
  0x4e   : > { %p1205_p4 = scmp.lt.s32.totalorder %s1203_s6, %s1196_s9 }
  0x4f   : > { %p1199_p12 = pnand %p1197_p9, %p1450_p13 }
  0x50   : > { %p1206_p8 = por %p1205_p4, %p1204_p1 }
  0x51   : > { %p1200_p0 = pneg %p1199_p12 }
  0x53   : > { %p1207_p2 = pnand %p1206_p8, %p1200_p0 }
  0x55   : > { %1210 = shalt.err (!%p1207_p2)
}
  0x56   : > { %1040 = dma.hbm_to_vmem [thread:$0]  (!%p1434_p11), %s1769_s3, 16, %s226_s8, [#allocation9]  }
  0x57   : > { %s50_s14 = sadd.s32 1, %s1319_s17  ;;  %s41_s11 = sadd.s32 1, %s1327_s19 }
  0x58   : > { %p57_p2 = scmp.ne.s32.totalorder %s1319_s17, %s1315_s16  ;;  %p43_p8 = scmp.ge.s32.totalorder %s41_s11, 2 }
  0x59   : > { %p58_p13 = scmp.eq.s32.totalorder %s1331_s20, 0  ;;  %p1785_p6 = scmp.ne.s32.totalorder %s1778_s24, 0 }
  0x5a   : > { %p1052_p3 = scmp.lt.s32.totalorder %s1331_s20, 2  ;;  %s1801_s11 = smov (%p43_p8, %s41_s11), 0 }
  0x5b   : > { %p1524_p10 = por %p1785_p6, %p57_p2  ;;  %p59_p5 = por %p58_p13, %p57_p2 }
  0x5c   : > { %s236_s12 = sand.u32 1, %s1319_s17   ;;  %s45_s13 = ssub.s32 %s1327_s19, %s1801_s11 }
  0x5d   : > { %p48_p7 = scmp.eq.s32.totalorder %s45_s13, 0  ;;  %s1011_s8 = smul.u32 72, %s236_s12 }
  0x5e   : > { %s1012_s21 = smul.u32 1152, %s1327_s19  ;;  %p1535_p11 = pnand %p1052_p3, %p59_p5 }
  0x5f   : > { %s1540_s24 = scalar_select %p48_p7, %s1319_s17, %s50_s14  }
  0x60   : > { %s1545_s9 = scalar_lea.hbm %s1766_s0, %s1012_s21  ;;  %s240_s6 = scalar_lea.vmem [#allocation2], %s1011_s8 }
  0x61   : > { %s249_s26 = sshll.u32 %s240_s6, 4  ;;  %s1549_s10 = scalar_lea.sflag [#allocation3], %s236_s12  ;;  %s1547_s26 = int_to_ptr.vmem [resolvable:$true] %s249_s26 }
  0x62   : > { %s1211_s13 = scalar_lea.hbm %s1545_s9, 1152  ;;  %p1213_p12 = pneg %p1535_p11 }
  0x63   : > { %p1212_p9 = scmp.ne.s32.totalorder %s1545_s9, %s1211_s13  ;;  %s1216_s28 = scalar_lea.hbm %s1766_s0, 2304 }
  0x64   : > { %p1217_p4 = scmp.lt.u32.totalorder %s1545_s9, %s1766_s0  ;;  %p1218_p2 = scmp.lt.u32.totalorder %s1216_s28, %s1211_s13 }
  0x65   : > { %p1214_p0 = pnand %p1213_p12, %p1212_p9  ;;  %p1220_p13 = scmp.lt.u32.totalorder %s1211_s13, %s1545_s9 }
  0x66   : > { %p1219_p8 = por %p1218_p2, %p1217_p4 }
  0x67   : > { %p1215_p1 = pneg %p1214_p0 }
  0x68   : > { %p1221_p6 = por %p1220_p13, %p1219_p8 }
  0x6a   : > { %p1222_p3 = pnand %p1221_p6, %p1215_p1 }
  0x6c   : > { %1225 = shalt.err (!%p1222_p3)
}
  0x6d   : > { %s1226_s12 = scalar_lea.vmem %s1547_s26, 1152  ;;  %s1338_s8 = smov [#allocation2]  }
  0x6e   : > { %p1227_p5 = scmp.ne.s32.totalorder %s1547_s26, %s1226_s12  ;;  %s1231_s6 = sshll.u32 %s1338_s8, 4  ;;  %s1232_s6 = int_to_ptr.vmem [resolvable:$false] %s1231_s6 }
  0x6f   : > { %s1233_s5 = scalar_lea.vmem %s1232_s6, 2304  ;;  %p1234_p0 = scmp.lt.s32.totalorder %s1547_s26, %s1232_s6 }
  0x70   : > { %p1229_p7 = pnand %p1227_p5, %p1213_p12  ;;  %p1235_p4 = scmp.lt.s32.totalorder %s1233_s5, %s1226_s12 }
  0x72   : > { %p1230_p9 = pneg %p1229_p7  ;;  %p1236_p2 = por %p1235_p4, %p1234_p0 }
  0x74   : > { %p1237_p8 = pnand %p1236_p2, %p1230_p9 }
  0x76   : > { %1240 = shalt.err (!%p1237_p8)
}
  0x77   : > { %s1788_s13 = smov 64   ;;  %p1789_p12 = scmp.ne.s32.totalorder %s1782_s27, 0 }
  0x78   : > { %1044 = dma.hbm_to_vmem [thread:$0]  (!%p1535_p11), %s1545_s9, 1152, %s1547_s26, %s1549_s10, %s1788_s13, %s1788_s13, %s1337_s7  }
  0x79   : > { %261 = sbr.rel (%p1789_p12) target bundleno = 422 (0x1a6), region = 36  ;;  %s1583_s14 = sand.u32 (!%p1789_p12), 1, %s1315_s16  }
  0x7a   : > { %s1013_s21 = smul.u32 (!%p1789_p12), 72, %s1583_s14  ;;  %s264_s28 = scalar_lea.sflag (!%p1789_p12), [#allocation3], %s1583_s14 }
  0x7b   : > { %p1790_p1 = scmp.ne.s32.totalorder (!%p1789_p12), %s1779_s25, 0 }
  0x7c   : > { %s1589_s22 = scalar_lea.vmem (!%p1789_p12), [#allocation2], %s1013_s21 }
  0x80   : > { %1294 = dma.done.wait (%p1790_p1), %s264_s28, 1152  }
  0x81   : > { %1296 = vsyncadd (%p1790_p1), %s264_s28, 4294966144  ;;  %p1791_p11 = scmp.ne.s32.totalorder %s1777_s23, 0 }
  0x83   : > { %1298 = dma.done.wait (%p1791_p11), [#allocation6], 528  }
  0x84   : > { %1300 = vsyncadd (%p1791_p11), [#allocation6], 4294966768 }
  0x85   : > { %1302 = dma.done.wait (%p1791_p11), [#allocation9], 16  }
  0x86   : > { %1304 = vsyncadd (%p1791_p11), [#allocation9], 4294967280  ;;  %v1339_v0 = vmov 0.0   ;;  %vm1340_vm0 = vmmov 0   ;;  %v1114_v1 = vld [vmem:[#allocation5] sm:$0xff]   ;;  %v1115_v2 = vld [vmem:[#allocation5 + $0x8] sm:$0xff]  }
  0x87   : > { %959 = vmatprep.subr.bf16.mxu0 %v1339_v0  ;;  %1003 = vmatprep.subr.bf16.mxu1 %v1339_v0  ;;  %v1116_v3 = vld [vmem:[#allocation5 + $0x10] sm:$0xff]   ;;  %v1117_v4 = vld [vmem:[#allocation5 + $0x18] sm:$0xff]   ;;  %vm400_vm1 = vcmask 523264   ;;  %v1121_v8 = vld [vmem:[%s1589_s22 + $0x30] sm:$0xff]   ;;  %vm709_vm4 = vcmask 60416   ;;  %s1646_s23 = scalar_lea.vmem [#allocation10], %s1013_s21 }
  0x88   : > { %967 = vmatprep.mubr.msk.bf16.mxu0 %vm1340_vm0, %v1339_v0  ;;  %987 = vmatprep.mubr.msk.bf16.mxu1 %vm1340_vm0, %v1339_v0  ;;  %v1118_v5 = vld [vmem:[%s1589_s22] sm:$0xff]   ;;  %v1119_v6 = vld [vmem:[%s1589_s22 + $0x28] sm:$0xff]   ;;  %v1122_v9 = vld [vmem:[%s1589_s22 + $0x10] sm:$0xff]   ;;  %s1014_s25 = smul.u32 1152, %s1323_s18  ;;  %s745_s27 = sshll.u32 %s1646_s23, 4  ;;  %s1713_s27 = int_to_ptr.vmem [resolvable:$true] %s745_s27 }
  0x89   : > { %960 = vmatpush3.bf16.msra.mxu0 %v1114_v1  ;;  %1007 = vmatpush3.bf16.msra.mxu1 %v1114_v1  ;;  %v1120_v7 = vld [vmem:[%s1589_s22 + $0x8] sm:$0xff]   ;;  %v1123_v10 = vld [vmem:[%s1589_s22 + $0x38] sm:$0xff]   ;;  %v1125_v12 = vld [vmem:[%s1589_s22 + $0x40] sm:$0xff]   ;;  %s729_s18 = scalar_lea.sflag [#allocation4], %s1583_s14  ;;  %s1241_s10 = scalar_lea.vmem %s1713_s27, 1152 }
  0x8a   : > { %961 = vmatprep.subr.bf16.mxu0 %v1339_v0  ;;  %1004 = vmatprep.subr.bf16.mxu1 %v1339_v0  ;;  %v1124_v11 = vld [vmem:[%s1589_s22 + $0x18] sm:$0xff]   ;;  %v1126_v13 = vld [vmem:[%s1589_s22 + $0x20] sm:$0xff]   ;;  %v1630_v14 = vld [vmem:[#allocation7] ss:$0 sm:$0xff]  ;;  %s1711_s26 = scalar_lea.hbm %s1770_s4, %s1014_s25  ;;  %p1242_p13 = scmp.ne.s32.totalorder %s1713_s27, %s1241_s10 }
  0x8b   : > { %v1632_v16 = vld [vmem:[#allocation8] ss:$0 sm:$0xff]  ;;  %s1341_s29 = smov [#allocation10]  }
  0x8c   : > { %p1243_p6 = pnand %p1242_p13, %p1524_p10  ;;  %s1245_s12 = sshll.u32 %s1341_s29, 4  ;;  %s1246_s12 = int_to_ptr.vmem [resolvable:$false] %s1245_s12 }
  0x8d   : > { %962 = vmatpush3.bf16.msra.mxu0 %v1115_v2  ;;  %1008 = vmatpush3.bf16.msra.mxu1 %v1115_v2  ;;  %s1247_s8 = scalar_lea.vmem %s1246_s12, 2304  ;;  %p1248_p5 = scmp.lt.s32.totalorder %s1713_s27, %s1246_s12 }
  0x8e   : > { %963 = vmatprep.subr.bf16.mxu0 %v1339_v0  ;;  %1005 = vmatprep.subr.bf16.mxu1 %v1339_v0  ;;  %p1244_p3 = pneg %p1243_p6  ;;  %p1249_p7 = scmp.lt.s32.totalorder %s1247_s8, %s1241_s10 }
  0x90   : > { %p1250_p9 = por %p1249_p7, %p1248_p5 }
  0x91   : > { %964 = vmatpush3.bf16.msra.mxu0 %v1116_v3  ;;  %1009 = vmatpush3.bf16.msra.mxu1 %v1116_v3 }
  0x92   : > { %965 = vmatprep.subr.bf16.mxu0 %v1339_v0  ;;  %1006 = vmatprep.subr.bf16.mxu1 %v1339_v0  ;;  %p1251_p0 = pnand %p1250_p9, %p1244_p3 }
  0x95   : > { %966 = vmatpush3.bf16.msra.mxu0 %v1117_v4  ;;  %1010 = vmatpush3.bf16.msra.mxu1 %v1117_v4 }
  0x98   : > { %968 = vmatmul.mubr.msk.bf16.vlgmr.msra.gmra.mrb[0].mxu0 %vm400_vm1, %v1118_v5  ;;  %988 = vmatmul.mubr.msk.bf16.vlgmr.msra.gmra.mrb[0].mxu1 %vm400_vm1, %v1119_v6 }
  0x99   : > { %971 = vmatprep.mubr.msk.bf16.mxu0 %vm1340_vm0, %v1339_v0  ;;  %991 = vmatprep.mubr.msk.bf16.mxu1 %vm1340_vm0, %v1339_v0 }
  0xa0   : > { %972 = vmatmul.mubr.msk.bf16.gmra.mrb[4].mxu0 %vm400_vm1, %v1120_v7  ;;  %992 = vmatmul.mubr.msk.bf16.gmra.mrb[4].mxu1 %vm400_vm1, %v1121_v8 }
  0xa1   : > { %975 = vmatprep.mubr.msk.bf16.mxu0 %vm1340_vm0, %v1339_v0  ;;  %995 = vmatprep.mubr.msk.bf16.mxu1 %vm1340_vm0, %v1339_v0 }
  0xa8   : > { %976 = vmatmul.mubr.msk.bf16.gmra.mrb[8].mxu0 %vm400_vm1, %v1122_v9  ;;  %996 = vmatmul.mubr.msk.bf16.gmra.mrb[8].mxu1 %vm400_vm1, %v1123_v10 }
  0xa9   : > { %979 = vmatprep.mubr.msk.bf16.mxu0 %vm1340_vm0, %v1339_v0  ;;  %999 = vmatprep.mubr.msk.bf16.mxu1 %vm1340_vm0, %v1339_v0 }
  0xb0   : > { %980 = vmatmul.mubr.msk.bf16.gmra.mrb[12].mxu0 %vm400_vm1, %v1124_v11  ;;  %1000 = vmatmul.mubr.msk.bf16.gmra.mrb[12].mxu1 %vm400_vm1, %v1125_v12 }
  0xb1   : > { %983 = vmatprep.mubr.msk.bf16.mxu0 %vm1340_vm0, %v1339_v0 }
  0xb8   : > { %984 = vmatmul.mubr.msk.bf16.gmra.mrb[16].mxu0 %vm400_vm1, %v1126_v13 }
 0x16b   : > { %v462_v15 = vpop.f32.mrb[0].mxu0  ;;  %v502_v17 = vpop.f32.mrb[0].mxu1 }
 0x16c   : > { %v540_v18 = vmul.f32 %v1630_v14, %v462_v15  ;;  %v969_v19 = vpop.f32.mrb[1].mxu0  ;;  %v550_v20 = vmul.f32 %v1630_v14, %v502_v17  ;;  %v989_v21 = vpop.f32.mrb[1].mxu1 }
 0x16d   : > { %v465_v22 = vpop.f32.mrb[2].mxu0  ;;  %v505_v23 = vpop.f32.mrb[2].mxu1 }
 0x16e   : > { %v565_v24 = vadd.f32 %v1632_v16, %v540_v18  ;;  %v541_v25 = vmul.f32 %v1630_v14, %v465_v22  ;;  %v970_v26 = vpop.f32.mrb[3].mxu0  ;;  %v575_v27 = vadd.f32 %v1632_v16, %v550_v20  ;;  %v551_v28 = vmul.f32 %v1630_v14, %v505_v23  ;;  %v990_v29 = vpop.f32.mrb[3].mxu1 }
 0x170   : > { %vm583_vm2 = vcmp.ge.f32.partialorder %v565_v24, 0.0  ;;  %v601_v30 = vmul.f32 0.2, %v565_v24  ;;  %v566_v31 = vadd.f32 %v1632_v16, %v541_v25  ;;  %vm593_vm3 = vcmp.ge.f32.partialorder %v575_v27, 0.0 }
 0x171   : > { %v611_v32 = vmul.f32 0.2, %v575_v27  ;;  %v576_v33 = vadd.f32 %v1632_v16, %v551_v28 }
 0x172   : > { %v619_v34 = vsel %vm583_vm2, %v565_v24, %v601_v30  ;;  %vm584_vm5 = vcmp.ge.f32.partialorder %v566_v31, 0.0  ;;  %v602_v35 = vmul.f32 0.2, %v566_v31 }
 0x173   : > { %v928_v36 = vpack.c.bf16 %v619_v34, %v619_v34  ;;  %v629_v37 = vsel %vm593_vm3, %v575_v27, %v611_v32  ;;  %vm594_vm6 = vcmp.ge.f32.partialorder %v576_v33, 0.0  ;;  %v612_v38 = vmul.f32 0.2, %v576_v33  ;;  %v470_v39 = vpop.f32.mrb[4].mxu0  ;;  %v510_v40 = vpop.f32.mrb[4].mxu1 }
 0x174   : > { %v620_v41 = vsel %vm584_vm5, %v566_v31, %v602_v35  ;;  %v938_v42 = vpack.c.bf16 %v629_v37, %v629_v37  ;;  %v542_v43 = vmul.f32 %v1630_v14, %v470_v39  ;;  %v973_v44 = vpop.f32.mrb[5].mxu0  ;;  %v552_v45 = vmul.f32 %v1630_v14, %v510_v40  ;;  %v993_v46 = vpop.f32.mrb[5].mxu1 }
 0x175   : > { %710 = vst.msk [vmem:[%s1646_s23] sm:$0xf] %vm709_vm4, %v928_v36  ;;  %v929_v47 = vpack.c.bf16 %v620_v41, %v620_v41  ;;  %v630_v48 = vsel %vm594_vm6, %v576_v33, %v612_v38  ;;  %v473_v49 = vpop.f32.mrb[6].mxu0  ;;  %v513_v50 = vpop.f32.mrb[6].mxu1 }
 0x176   : > { %720 = vst.msk [vmem:[%s1646_s23 + $0x28] sm:$0xf] %vm709_vm4, %v938_v42  ;;  %v939_v51 = vpack.c.bf16 %v630_v48, %v630_v48  ;;  %v567_v52 = vadd.f32 %v1632_v16, %v542_v43  ;;  %v543_v53 = vmul.f32 %v1630_v14, %v473_v49  ;;  %v974_v54 = vpop.f32.mrb[7].mxu0  ;;  %v577_v55 = vadd.f32 %v1632_v16, %v552_v45  ;;  %v994_v56 = vpop.f32.mrb[7].mxu1 }
 0x177   : > { %711 = vst.msk [vmem:[%s1646_s23 + $0x4] sm:$0xf] %vm709_vm4, %v929_v47  ;;  %v553_v57 = vmul.f32 %v1630_v14, %v513_v50 }
 0x178   : > { %721 = vst.msk [vmem:[%s1646_s23 + $0x2c] sm:$0xf] %vm709_vm4, %v939_v51  ;;  %vm585_vm7 = vcmp.ge.f32.partialorder %v567_v52, 0.0  ;;  %v603_v58 = vmul.f32 0.2, %v567_v52  ;;  %v568_v59 = vadd.f32 %v1632_v16, %v543_v53  ;;  %vm595_vm8 = vcmp.ge.f32.partialorder %v577_v55, 0.0 }
 0x179   : > { %v613_v60 = vmul.f32 0.2, %v577_v55  ;;  %v578_v61 = vadd.f32 %v1632_v16, %v553_v57 }
 0x17a   : > { %v621_v62 = vsel %vm585_vm7, %v567_v52, %v603_v58  ;;  %vm586_vm9 = vcmp.ge.f32.partialorder %v568_v59, 0.0  ;;  %v604_v63 = vmul.f32 0.2, %v568_v59 }
 0x17b   : > { %v930_v0 = vpack.c.bf16 %v621_v62, %v621_v62  ;;  %v631_v1 = vsel %vm595_vm8, %v577_v55, %v613_v60  ;;  %vm596_vm10 = vcmp.ge.f32.partialorder %v578_v61, 0.0  ;;  %v614_v2 = vmul.f32 0.2, %v578_v61  ;;  %v478_v3 = vpop.f32.mrb[8].mxu0  ;;  %v518_v4 = vpop.f32.mrb[8].mxu1 }
 0x17c   : > { %v622_v5 = vsel %vm586_vm9, %v568_v59, %v604_v63  ;;  %v940_v6 = vpack.c.bf16 %v631_v1, %v631_v1  ;;  %v544_v7 = vmul.f32 %v1630_v14, %v478_v3  ;;  %v977_v8 = vpop.f32.mrb[9].mxu0  ;;  %v554_v9 = vmul.f32 %v1630_v14, %v518_v4  ;;  %v997_v10 = vpop.f32.mrb[9].mxu1 }
 0x17d   : > { %712 = vst.msk [vmem:[%s1646_s23 + $0x8] sm:$0xf] %vm709_vm4, %v930_v0  ;;  %v931_v11 = vpack.c.bf16 %v622_v5, %v622_v5  ;;  %v632_v12 = vsel %vm596_vm10, %v578_v61, %v614_v2  ;;  %v481_v13 = vpop.f32.mrb[10].mxu0  ;;  %v521_v15 = vpop.f32.mrb[10].mxu1 }
 0x17e   : > { %722 = vst.msk [vmem:[%s1646_s23 + $0x30] sm:$0xf] %vm709_vm4, %v940_v6  ;;  %v941_v17 = vpack.c.bf16 %v632_v12, %v632_v12  ;;  %v569_v18 = vadd.f32 %v1632_v16, %v544_v7  ;;  %v545_v19 = vmul.f32 %v1630_v14, %v481_v13  ;;  %v978_v20 = vpop.f32.mrb[11].mxu0  ;;  %v579_v21 = vadd.f32 %v1632_v16, %v554_v9  ;;  %v998_v22 = vpop.f32.mrb[11].mxu1 }
 0x17f   : > { %713 = vst.msk [vmem:[%s1646_s23 + $0xc] sm:$0xf] %vm709_vm4, %v931_v11  ;;  %v555_v23 = vmul.f32 %v1630_v14, %v521_v15 }
 0x180   : > { %723 = vst.msk [vmem:[%s1646_s23 + $0x34] sm:$0xf] %vm709_vm4, %v941_v17  ;;  %vm587_vm11 = vcmp.ge.f32.partialorder %v569_v18, 0.0  ;;  %v605_v24 = vmul.f32 0.2, %v569_v18  ;;  %v570_v25 = vadd.f32 %v1632_v16, %v545_v19  ;;  %vm597_vm12 = vcmp.ge.f32.partialorder %v579_v21, 0.0 }
 0x181   : > { %v615_v26 = vmul.f32 0.2, %v579_v21  ;;  %v580_v27 = vadd.f32 %v1632_v16, %v555_v23 }
 0x182   : > { %v623_v28 = vsel %vm587_vm11, %v569_v18, %v605_v24  ;;  %vm588_vm13 = vcmp.ge.f32.partialorder %v570_v25, 0.0  ;;  %v606_v29 = vmul.f32 0.2, %v570_v25 }
 0x183   : > { %v932_v30 = vpack.c.bf16 %v623_v28, %v623_v28  ;;  %v633_v31 = vsel %vm597_vm12, %v579_v21, %v615_v26  ;;  %vm598_vm14 = vcmp.ge.f32.partialorder %v580_v27, 0.0  ;;  %v616_v32 = vmul.f32 0.2, %v580_v27  ;;  %v486_v33 = vpop.f32.mrb[12].mxu0  ;;  %v526_v34 = vpop.f32.mrb[12].mxu1 }
 0x184   : > { %v624_v35 = vsel %vm588_vm13, %v570_v25, %v606_v29  ;;  %v942_v36 = vpack.c.bf16 %v633_v31, %v633_v31  ;;  %v546_v37 = vmul.f32 %v1630_v14, %v486_v33  ;;  %v981_v38 = vpop.f32.mrb[13].mxu0  ;;  %v556_v39 = vmul.f32 %v1630_v14, %v526_v34  ;;  %v1001_v40 = vpop.f32.mrb[13].mxu1 }
 0x185   : > { %714 = vst.msk [vmem:[%s1646_s23 + $0x10] sm:$0xf] %vm709_vm4, %v932_v30  ;;  %v933_v41 = vpack.c.bf16 %v624_v35, %v624_v35  ;;  %v634_v42 = vsel %vm598_vm14, %v580_v27, %v616_v32  ;;  %v489_v43 = vpop.f32.mrb[14].mxu0  ;;  %v529_v44 = vpop.f32.mrb[14].mxu1 }
 0x186   : > { %724 = vst.msk [vmem:[%s1646_s23 + $0x38] sm:$0xf] %vm709_vm4, %v942_v36  ;;  %v943_v45 = vpack.c.bf16 %v634_v42, %v634_v42  ;;  %v571_v46 = vadd.f32 %v1632_v16, %v546_v37  ;;  %v547_v47 = vmul.f32 %v1630_v14, %v489_v43  ;;  %v982_v48 = vpop.f32.mrb[15].mxu0  ;;  %v581_v49 = vadd.f32 %v1632_v16, %v556_v39  ;;  %v1002_v50 = vpop.f32.mrb[15].mxu1 }
 0x187   : > { %715 = vst.msk [vmem:[%s1646_s23 + $0x14] sm:$0xf] %vm709_vm4, %v933_v41  ;;  %v557_v51 = vmul.f32 %v1630_v14, %v529_v44 }
 0x188   : > { %725 = vst.msk [vmem:[%s1646_s23 + $0x3c] sm:$0xf] %vm709_vm4, %v943_v45  ;;  %vm589_vm15 = vcmp.ge.f32.partialorder %v571_v46, 0.0  ;;  %v607_v52 = vmul.f32 0.2, %v571_v46  ;;  %v572_v53 = vadd.f32 %v1632_v16, %v547_v47  ;;  %vm599_vm0 = vcmp.ge.f32.partialorder %v581_v49, 0.0 }
 0x189   : > { %v617_v54 = vmul.f32 0.2, %v581_v49  ;;  %v582_v55 = vadd.f32 %v1632_v16, %v557_v51 }
 0x18a   : > { %v625_v56 = vsel %vm589_vm15, %v571_v46, %v607_v52  ;;  %vm590_vm1 = vcmp.ge.f32.partialorder %v572_v53, 0.0  ;;  %v608_v57 = vmul.f32 0.2, %v572_v53 }
 0x18b   : > { %v934_v58 = vpack.c.bf16 %v625_v56, %v625_v56  ;;  %v635_v59 = vsel %vm599_vm0, %v581_v49, %v617_v54  ;;  %vm600_vm2 = vcmp.ge.f32.partialorder %v582_v55, 0.0  ;;  %v618_v60 = vmul.f32 0.2, %v582_v55  ;;  %v494_v61 = vpop.f32.mrb[16].mxu0 }
 0x18c   : > { %v626_v62 = vsel %vm590_vm1, %v572_v53, %v608_v57  ;;  %v944_v63 = vpack.c.bf16 %v635_v59, %v635_v59  ;;  %v548_v0 = vmul.f32 %v1630_v14, %v494_v61  ;;  %v985_v1 = vpop.f32.mrb[17].mxu0 }
 0x18d   : > { %716 = vst.msk [vmem:[%s1646_s23 + $0x18] sm:$0xf] %vm709_vm4, %v934_v58  ;;  %v935_v2 = vpack.c.bf16 %v626_v62, %v626_v62  ;;  %v636_v3 = vsel %vm600_vm2, %v582_v55, %v618_v60  ;;  %v497_v4 = vpop.f32.mrb[18].mxu0 }
 0x18e   : > { %726 = vst.msk [vmem:[%s1646_s23 + $0x40] sm:$0xf] %vm709_vm4, %v944_v63  ;;  %v945_v5 = vpack.c.bf16 %v636_v3, %v636_v3  ;;  %v573_v6 = vadd.f32 %v1632_v16, %v548_v0  ;;  %v549_v7 = vmul.f32 %v1630_v14, %v497_v4  ;;  %v986_v8 = vpop.f32.mrb[19].mxu0 }
 0x18f   : > { %717 = vst.msk [vmem:[%s1646_s23 + $0x1c] sm:$0xf] %vm709_vm4, %v935_v2 }
 0x190   : > { %727 = vst.msk [vmem:[%s1646_s23 + $0x44] sm:$0xf] %vm709_vm4, %v945_v5  ;;  %vm591_vm3 = vcmp.ge.f32.partialorder %v573_v6, 0.0  ;;  %v609_v9 = vmul.f32 0.2, %v573_v6  ;;  %v574_v10 = vadd.f32 %v1632_v16, %v549_v7 }
 0x192   : > { %v627_v11 = vsel %vm591_vm3, %v573_v6, %v609_v9  ;;  %vm592_vm5 = vcmp.ge.f32.partialorder %v574_v10, 0.0  ;;  %v610_v12 = vmul.f32 0.2, %v574_v10 }
 0x193   : > { %v936_v13 = vpack.c.bf16 %v627_v11, %v627_v11 }
 0x194   : > { %v628_v14 = vsel %vm592_vm5, %v574_v10, %v610_v12 }
 0x195   : > { %718 = vst.msk [vmem:[%s1646_s23 + $0x20] sm:$0xf] %vm709_vm4, %v936_v13  ;;  %v937_v16 = vpack.c.bf16 %v628_v14, %v628_v14 }
 0x197   : > { %719 = vst.msk [vmem:[%s1646_s23 + $0x24] sm:$0xf] %vm709_vm4, %v937_v16 }
 0x198   : > { %1254 = shalt.err (!%p1251_p0)
}
 0x199   : > { %s1255_s6 = scalar_lea.hbm %s1711_s26, 1152  ;;  %s1259_s21 = scalar_lea.hbm %s1770_s4, 2304 }
 0x19a   : > { %p1256_p4 = scmp.ne.s32.totalorder %s1711_s26, %s1255_s6  ;;  %p1260_p12 = scmp.lt.u32.totalorder %s1711_s26, %s1770_s4 }
 0x19b   : > { %p1261_p1 = scmp.lt.u32.totalorder %s1259_s21, %s1255_s6  ;;  %p1263_p13 = scmp.lt.u32.totalorder %s1255_s6, %s1711_s26 }
 0x19c   : > { %p1257_p2 = pnand %p1256_p4, %p1524_p10 }
 0x19d   : > { %p1262_p11 = por %p1261_p1, %p1260_p12 }
 0x19e   : > { %p1258_p8 = pneg %p1257_p2 }
 0x19f   : > { %p1264_p6 = por %p1263_p13, %p1262_p11 }
 0x1a1   : > { %p1265_p3 = pnand %p1264_p6, %p1258_p8 }
 0x1a3   : > { %1268 = shalt.err (!%p1265_p3)
}
 0x1a4   : > { %s1342_s23 = smov 64   ;;  %s1343_s25 = smov 4  }
 0x1a5   : > { %1029 = dma.vmem_to_hbm [thread:$0]  (%p1524_p10), %s1713_s27, 1152, %s1711_s26, %s729_s18, %s1342_s23, %s1342_s23, %s1343_s25  }
 0x1a6 PF: > { %s1792_s7 = sld [smem:[#allocation15_spill]]  ;;  %s760_s9 = sand.u32 1, %s1311_s15  }
 0x1a7   : > { %p1794_p7 = scmp.ge.s32.totalorder %s1331_s20, 2  ;;  %s761_s10 = scalar_lea.sflag [#allocation4], %s760_s9 }
 0x1ac   : > { %p1793_p5 = scmp.ne.s32.totalorder %s1792_s7, 0 }
 0x1ae   : > { %p1046_p9 = pnand %p1794_p7, %p1793_p5 }
 0x1b0   : > { %1306 = dma.done.wait (!%p1046_p9), %s761_s10, 1152  }
 0x1b1   : > { %1308 = vsyncadd (!%p1046_p9), %s761_s10, 4294966144  ;;  %s22_s20 = sadd.s32 1, %s1331_s20   ;;  %s1795_s15 = smov %s1315_s16 }
 0x1b2   : > { %p19_p0 = scmp.ge.s32.totalorder %s22_s20, 4   ;;  %s1796_s16 = smov %s1319_s17 }
 0x1b3   : > { %s1797_s17 = smov %s1540_s24  ;;  %s1798_s18 = smov %s1327_s19 }
 0x1b4   : > { %s1799_s19 = smov %s1801_s11  ;;  %21 = sbr.rel (!%p19_p0) target bundleno = 8 (0x8), region = 96 }
 0x1bb   :  { %766 = vsyncpa [#allocation3], 1 }
 0x1bc   :  { %768 = vsyncpa [#allocation3 + $0x1], 1 }
 0x1bd   :  { %769 = vsyncpa [#allocation6], 1 }
 0x1be   :  { %770 = vsyncpa [#allocation9], 1 }
 0x1bf   :  { %771 = vsyncpa [#allocation4], 1 }
 0x1c0   :  { %773 = vsyncpa [#allocation4 + $0x1], 1 }

// kernel: _lambda_.6
= control target key start
LH: loop header
LB: loop body
LE: loop exit
PB: predicated region body
PF: predicated region fallthrough
CT: control target
= control target key end

     0   :  { %9 = vsyncpa [#allocation3], 0  ;;  %s1406_s0 = inlined_call_operand.hbm [shape: bf16[2,1,40,128], index: 0, kind: input, shape index: {}]   ;;  %s1407_s1 = inlined_call_operand.hbm [shape: bf16[1,128,16], index: 1, kind: input, shape index: {}]   ;;  %s1408_s2 = inlined_call_operand.hbm [shape: f32[1,16], index: 2, kind: input, shape index: {}]   ;;  %s1409_s3 = inlined_call_operand.hbm [shape: f32[1,16], index: 3, kind: input, shape index: {}]   ;;  %s1410_s4 = inlined_call_operand.hbm [shape: bf16[2,1,40,16], index: 4, kind: output, shape index: {}]  }
   0x1   :  { %11 = vsyncpa [#allocation3 + $0x1], 0 }
   0x2   :  { %12 = vsyncpa [#allocation6], 0 }
   0x3   :  { %13 = vsyncpa [#allocation9], 0 }
   0x4   :  { %14 = vsyncpa [#allocation4], 0 }
   0x5   :  { %16 = vsyncpa [#allocation4 + $0x1], 0  ;;  %s1104_s15 = smov 0   ;;  %s1106_s16 = smov 0  }
   0x6   :  { %s1108_s17 = smov 0   ;;  %s1110_s18 = smov 0  }
   0x7   :  { %s1112_s19 = smov 0   ;;  %s1114_s20 = smov 0  }
   0x8 LB: > { %s655_s21 = sadd.s32 4294967295, %s1066_s20   ;;  %s656_s22 = sadd.s32 4294967294, %s1066_s20   ;;  %s1066_s20 = sphi %s1114_s20, %s22_s20   ;;  %s1062_s19 = sphi %s1112_s19, %s1439_s19   ;;  %s1058_s18 = sphi %s1110_s18, %s1438_s18   ;;  %s1054_s17 = sphi %s1108_s17, %s1437_s17   ;;  %s1050_s16 = sphi %s1106_s16, %s1436_s16   ;;  %s1046_s15 = sphi %s1104_s15, %s1435_s15  }
   0x9   : > { %p63_p0 = scmp.ne.s32.totalorder %s1050_s16, %s1046_s15  ;;  %p1138_p1 = scmp.eq.s32.totalorder %s655_s21, 0 }
   0xa   : > { %p1142_p2 = scmp.eq.s32.totalorder %s655_s21, 1  ;;  %p175_p3 = scmp.eq.s32.totalorder %s656_s22, 1 }
   0xb   : > { %s1417_s23 = scalar_select %p1138_p1, 1, 0 }
   0xc   : > { %s1418_s24 = scalar_select %p1142_p2, 1, 0 }
   0xd   : > { %p1148_p4 = por %p1138_p1, %p63_p0  ;;  %p657_p5 = scmp.ge.s32.totalorder %s1066_s20, 1 }
   0xe   : > { %p1153_p6 = por %p175_p3, %p63_p0  ;;  %p182_p7 = scmp.lt.s32.totalorder %s1066_s20, 3 }
   0xf   : > { %s1419_s25 = scalar_select %p1148_p4, 1, 0 }
  0x10   : > { %s1420_s26 = scalar_select %p1153_p6, 1, 0 }
  0x11   : > { %p1158_p8 = pnand %p657_p5, %p182_p7  ;;  %s1068_s28 = smov [#allocation5]  }
  0x12   : > { %1421 = sst [smem:[#allocation15_spill]] %s1420_s26  ;;  %s196_s29 = sshll.u32 %s1068_s28, 4  ;;  %s1162_s29 = int_to_ptr.vmem [resolvable:$true] %s196_s29 }
  0x13   : > { %s1422_s27 = scalar_select %p1158_p8, 1, 0 }
  0x14   : > { %p768_p9 = pneg %p1158_p8  ;;  %s1069_s5 = smov [#allocation7]  }
  0x15   : > { %s212_s6 = sshll.u32 %s1069_s5, 4  ;;  %s1070_s7 = smov [#allocation8]   ;;  %s1173_s6 = int_to_ptr.vmem [resolvable:$true] %s212_s6 }
  0x16   : > { %p1169_p11 = pnand %p768_p9, %p1138_p1  ;;  %s1175_s8 = sshll.u32 %s1070_s7, 4  ;;  %s226_s8 = int_to_ptr.vmem [resolvable:$true] %s1175_s8 }
  0x17   : > { %s862_s11 = scalar_lea.hbm %s1407_s1, 1024 }
  0x18   : > { %p863_p12 = scmp.ne.s32.totalorder %s1407_s1, %s862_s11  ;;  %p1185_p13 = pneg %p1169_p11 }
  0x19   : > { %p869_p5 = scmp.lt.u32.totalorder %s862_s11, %s1407_s1 }
  0x1a   : > { %p865_p0 = pnand %p1185_p13, %p863_p12 }
  0x1c   : > { %p866_p3 = pneg %p865_p0 }
  0x1e   : > { %p871_p7 = pnand %p869_p5, %p866_p3 }
  0x20   : > { %874 = shalt.err (!%p871_p7)
}
  0x21   : > { %s875_s28 = scalar_lea.vmem %s1162_s29, 1024  ;;  %p883_p1 = scmp.lt.s32.totalorder %s1162_s29, %s1162_s29 }
  0x22   : > { %p876_p9 = scmp.ne.s32.totalorder %s1162_s29, %s875_s28  ;;  %p884_p4 = scmp.lt.s32.totalorder %s875_s28, %s875_s28 }
  0x24   : > { %p878_p10 = pnand %p876_p9, %p1185_p13  ;;  %p885_p12 = por %p884_p4, %p883_p1 }
  0x26   : > { %p879_p6 = pneg %p878_p10 }
  0x28   : > { %p886_p0 = pnand %p885_p12, %p879_p6 }
  0x2a   : > { %889 = shalt.err (!%p886_p0)
}
  0x2b   : > { %s1416_s5 = smov 64   ;;  %s1072_s7 = smov 4  }
  0x2c   : > { %771 = dma.hbm_to_vmem [thread:$0]  (!%p1169_p11), %s1407_s1, 1024, %s1162_s29, [#allocation6], %s1416_s5, %s1416_s5, %s1072_s7  }
  0x2d   : > { %s890_s13 = scalar_lea.hbm %s1408_s2, 16 }
  0x2e   : > { %p891_p1 = scmp.ne.s32.totalorder %s1408_s2, %s890_s13  ;;  %p897_p10 = scmp.lt.u32.totalorder %s890_s13, %s1408_s2 }
  0x30   : > { %p893_p4 = pnand %p891_p1, %p1185_p13 }
  0x32   : > { %p894_p6 = pneg %p893_p4 }
  0x34   : > { %p899_p3 = pnand %p897_p10, %p894_p6 }
  0x36   : > { %902 = shalt.err (!%p899_p3)
}
  0x37   : > { %s903_s29 = scalar_lea.vmem %s1173_s6, 16  ;;  %s910_s9 = scalar_lea.vmem %s1173_s6, 32 }
  0x38   : > { %p904_p5 = scmp.ne.s32.totalorder %s1173_s6, %s903_s29  ;;  %p911_p12 = scmp.lt.s32.totalorder %s1173_s6, %s1173_s6 }
  0x39   : > { %p912_p0 = scmp.lt.s32.totalorder %s910_s9, %s903_s29 }
  0x3a   : > { %p906_p7 = pnand %p904_p5, %p1185_p13 }
  0x3b   : > { %p913_p1 = por %p912_p0, %p911_p12 }
  0x3c   : > { %p907_p9 = pneg %p906_p7 }
  0x3e   : > { %p914_p4 = pnand %p913_p1, %p907_p9 }
  0x40   : > { %917 = shalt.err (!%p914_p4)
}
  0x41   : > { %774 = dma.hbm_to_vmem [thread:$0]  (!%p1169_p11), %s1408_s2, 16, %s1173_s6, [#allocation6]  }
  0x42   : > { %s918_s13 = scalar_lea.hbm %s1409_s3, 16 }
  0x43   : > { %p919_p6 = scmp.ne.s32.totalorder %s1409_s3, %s918_s13  ;;  %p925_p5 = scmp.lt.u32.totalorder %s918_s13, %s1409_s3 }
  0x45   : > { %p921_p10 = pnand %p919_p6, %p1185_p13 }
  0x47   : > { %p922_p3 = pneg %p921_p10 }
  0x49   : > { %p927_p7 = pnand %p925_p5, %p922_p3 }
  0x4b   : > { %930 = shalt.err (!%p927_p7)
}
  0x4c   : > { %s931_s9 = scalar_lea.vmem %s226_s8, 16  ;;  %s938_s6 = scalar_lea.vmem %s226_s8, 32 }
  0x4d   : > { %p932_p9 = scmp.ne.s32.totalorder %s226_s8, %s931_s9  ;;  %p939_p1 = scmp.lt.s32.totalorder %s226_s8, %s226_s8 }
  0x4e   : > { %p940_p4 = scmp.lt.s32.totalorder %s938_s6, %s931_s9 }
  0x4f   : > { %p934_p12 = pnand %p932_p9, %p1185_p13 }
  0x50   : > { %p941_p8 = por %p940_p4, %p939_p1 }
  0x51   : > { %p935_p0 = pneg %p934_p12 }
  0x53   : > { %p942_p2 = pnand %p941_p8, %p935_p0 }
  0x55   : > { %945 = shalt.err (!%p942_p2)
}
  0x56   : > { %777 = dma.hbm_to_vmem [thread:$0]  (!%p1169_p11), %s1409_s3, 16, %s226_s8, [#allocation9]  }
  0x57   : > { %s50_s14 = sadd.s32 1, %s1054_s17  ;;  %s41_s11 = sadd.s32 1, %s1062_s19 }
  0x58   : > { %p57_p2 = scmp.ne.s32.totalorder %s1054_s17, %s1050_s16  ;;  %p43_p8 = scmp.ge.s32.totalorder %s41_s11, 2 }
  0x59   : > { %p58_p13 = scmp.eq.s32.totalorder %s1066_s20, 0  ;;  %p1425_p6 = scmp.ne.s32.totalorder %s1418_s24, 0 }
  0x5a   : > { %p789_p3 = scmp.lt.s32.totalorder %s1066_s20, 2  ;;  %s1441_s11 = smov (%p43_p8, %s41_s11), 0 }
  0x5b   : > { %p1259_p10 = por %p1425_p6, %p57_p2  ;;  %p59_p5 = por %p58_p13, %p57_p2 }
  0x5c   : > { %s236_s12 = sand.u32 1, %s1054_s17   ;;  %s45_s13 = ssub.s32 %s1062_s19, %s1441_s11 }
  0x5d   : > { %p48_p7 = scmp.eq.s32.totalorder %s45_s13, 0  ;;  %s748_s8 = smul.u32 20, %s236_s12 }
  0x5e   : > { %s749_s21 = smul.u32 320, %s1062_s19  ;;  %p1270_p11 = pnand %p789_p3, %p59_p5 }
  0x5f   : > { %s1275_s24 = scalar_select %p48_p7, %s1054_s17, %s50_s14  }
  0x60   : > { %s1280_s9 = scalar_lea.hbm %s1406_s0, %s749_s21  ;;  %s240_s6 = scalar_lea.vmem [#allocation2], %s748_s8 }
  0x61   : > { %s249_s26 = sshll.u32 %s240_s6, 4  ;;  %s1284_s10 = scalar_lea.sflag [#allocation3], %s236_s12  ;;  %s1282_s26 = int_to_ptr.vmem [resolvable:$true] %s249_s26 }
  0x62   : > { %s946_s13 = scalar_lea.hbm %s1280_s9, 320  ;;  %p948_p12 = pneg %p1270_p11 }
  0x63   : > { %p947_p9 = scmp.ne.s32.totalorder %s1280_s9, %s946_s13  ;;  %s951_s28 = scalar_lea.hbm %s1406_s0, 640 }
  0x64   : > { %p952_p4 = scmp.lt.u32.totalorder %s1280_s9, %s1406_s0  ;;  %p953_p2 = scmp.lt.u32.totalorder %s951_s28, %s946_s13 }
  0x65   : > { %p949_p0 = pnand %p948_p12, %p947_p9  ;;  %p955_p13 = scmp.lt.u32.totalorder %s946_s13, %s1280_s9 }
  0x66   : > { %p954_p8 = por %p953_p2, %p952_p4 }
  0x67   : > { %p950_p1 = pneg %p949_p0 }
  0x68   : > { %p956_p6 = por %p955_p13, %p954_p8 }
  0x6a   : > { %p957_p3 = pnand %p956_p6, %p950_p1 }
  0x6c   : > { %960 = shalt.err (!%p957_p3)
}
  0x6d   : > { %s961_s12 = scalar_lea.vmem %s1282_s26, 320  ;;  %s1073_s8 = smov [#allocation2]  }
  0x6e   : > { %p962_p5 = scmp.ne.s32.totalorder %s1282_s26, %s961_s12  ;;  %s966_s6 = sshll.u32 %s1073_s8, 4  ;;  %s967_s6 = int_to_ptr.vmem [resolvable:$false] %s966_s6 }
  0x6f   : > { %s968_s5 = scalar_lea.vmem %s967_s6, 640  ;;  %p969_p0 = scmp.lt.s32.totalorder %s1282_s26, %s967_s6 }
  0x70   : > { %p964_p7 = pnand %p962_p5, %p948_p12  ;;  %p970_p4 = scmp.lt.s32.totalorder %s968_s5, %s961_s12 }
  0x72   : > { %p965_p9 = pneg %p964_p7  ;;  %p971_p2 = por %p970_p4, %p969_p0 }
  0x74   : > { %p972_p8 = pnand %p971_p2, %p965_p9 }
  0x76   : > { %975 = shalt.err (!%p972_p8)
}
  0x77   : > { %s1428_s13 = smov 64   ;;  %p1429_p12 = scmp.ne.s32.totalorder %s1422_s27, 0 }
  0x78   : > { %781 = dma.hbm_to_vmem [thread:$0]  (!%p1270_p11), %s1280_s9, 320, %s1282_s26, %s1284_s10, %s1428_s13, %s1428_s13, %s1072_s7  }
  0x79   : > { %261 = sbr.rel (%p1429_p12) target bundleno = 412 (0x19c), region = 36  ;;  %s1318_s14 = sand.u32 (!%p1429_p12), 1, %s1050_s16  }
  0x7a   : > { %s750_s21 = smul.u32 (!%p1429_p12), 20, %s1318_s14  ;;  %s264_s28 = scalar_lea.sflag (!%p1429_p12), [#allocation3], %s1318_s14 }
  0x7b   : > { %p1430_p1 = scmp.ne.s32.totalorder (!%p1429_p12), %s1419_s25, 0 }
  0x7c   : > { %s1324_s22 = scalar_lea.vmem (!%p1429_p12), [#allocation2], %s750_s21 }
  0x80   : > { %1029 = dma.done.wait (%p1430_p1), %s264_s28, 320  }
  0x81   : > { %1031 = vsyncadd (%p1430_p1), %s264_s28, 4294966976  ;;  %p1431_p11 = scmp.ne.s32.totalorder %s1417_s23, 0 }
  0x83   : > { %1033 = dma.done.wait (%p1431_p11), [#allocation6], 1040  }
  0x84   : > { %1035 = vsyncadd (%p1431_p11), [#allocation6], 4294966256 }
  0x85   : > { %1037 = dma.done.wait (%p1431_p11), [#allocation9], 16  }
  0x86   : > { %1039 = vsyncadd (%p1431_p11), [#allocation9], 4294967280  ;;  %v1074_v0 = vmov 0.0   ;;  %vm1075_vm0 = vmmov 0   ;;  %v851_v1 = vld [vmem:[#allocation5] sm:$0xff]   ;;  %v852_v2 = vld [vmem:[#allocation5 + $0x8] sm:$0xff]  }
  0x87   : > { %732 = vmatprep.subr.bf16.mxu1 %v1074_v0  ;;  %704 = vmatprep.subr.bf16.mxu0 %v1074_v0  ;;  %v853_v3 = vld [vmem:[#allocation5 + $0x10] sm:$0xff]   ;;  %v854_v4 = vld [vmem:[#allocation5 + $0x18] sm:$0xff]   ;;  %v855_v5 = vld [vmem:[#allocation5 + $0x20] sm:$0xff]   ;;  %vm506_vm3 = vcmask 125952   ;;  %s303_s23 = scalar_lea.vmem [#allocation10], %s750_s21  ;;  %s751_s25 = smul.u32 320, %s1058_s18 }
  0x88   : > { %724 = vmatprep.mubr.msk.bf16.mxu1 %vm1075_vm0, %v1074_v0  ;;  %720 = vmatprep.mubr.msk.bf16.mxu0 %vm1075_vm0, %v1074_v0  ;;  %v856_v6 = vld [vmem:[#allocation5 + $0x28] sm:$0xff]   ;;  %v857_v7 = vld [vmem:[#allocation5 + $0x30] sm:$0xff]   ;;  %v858_v8 = vld [vmem:[#allocation5 + $0x38] sm:$0xff]   ;;  %s529_s27 = sshll.u32 %s303_s23, 4  ;;  %s513_s18 = scalar_lea.sflag [#allocation4], %s1318_s14  ;;  %s1356_s27 = int_to_ptr.vmem [resolvable:$true] %s529_s27 }
  0x89   : > { %740 = vmatpush3.bf16.msra.mxu1 %v851_v1  ;;  %705 = vmatpush3.bf16.msra.mxu0 %v851_v1  ;;  %v859_v9 = vld [vmem:[%s1324_s22 + $0x8] sm:$0xff]   ;;  %v860_v10 = vld [vmem:[%s1324_s22] sm:$0xff]   ;;  %v861_v11 = vld [vmem:[%s1324_s22 + $0x10] ss:$0 sps:$4 sm:$0xff]   ;;  %s1354_s26 = scalar_lea.hbm %s1410_s4, %s751_s25  ;;  %s976_s10 = scalar_lea.vmem %s1356_s27, 320 }
  0x8a   : > { %733 = vmatprep.subr.bf16.mxu1 %v1074_v0  ;;  %706 = vmatprep.subr.bf16.mxu0 %v1074_v0  ;;  %v678_v12 = vld [vmem:[#allocation7] ss:$0 sm:$0xff]  ;;  %v679_v14 = vld [vmem:[#allocation8] ss:$0 sm:$0xff]  ;;  %p977_p13 = scmp.ne.s32.totalorder %s1356_s27, %s976_s10  ;;  %s1076_s29 = smov [#allocation10]  }
  0x8b   : > { %s980_s12 = sshll.u32 %s1076_s29, 4  ;;  %s981_s12 = int_to_ptr.vmem [resolvable:$false] %s980_s12 }
  0x8c   : > { %p978_p6 = pnand %p977_p13, %p1259_p10  ;;  %s982_s8 = scalar_lea.vmem %s981_s12, 640 }
  0x8d   : > { %741 = vmatpush3.bf16.msra.mxu1 %v852_v2  ;;  %707 = vmatpush3.bf16.msra.mxu0 %v852_v2  ;;  %p983_p5 = scmp.lt.s32.totalorder %s1356_s27, %s981_s12  ;;  %p984_p7 = scmp.lt.s32.totalorder %s982_s8, %s976_s10 }
  0x8e   : > { %734 = vmatprep.subr.bf16.mxu1 %v1074_v0  ;;  %708 = vmatprep.subr.bf16.mxu0 %v1074_v0  ;;  %p979_p3 = pneg %p978_p6 }
  0x8f   : > { %p985_p9 = por %p984_p7, %p983_p5 }
  0x91   : > { %742 = vmatpush3.bf16.msra.mxu1 %v853_v3  ;;  %709 = vmatpush3.bf16.msra.mxu0 %v853_v3  ;;  %p986_p0 = pnand %p985_p9, %p979_p3 }
  0x92   : > { %735 = vmatprep.subr.bf16.mxu1 %v1074_v0  ;;  %710 = vmatprep.subr.bf16.mxu0 %v1074_v0 }
  0x95   : > { %743 = vmatpush3.bf16.msra.mxu1 %v854_v4  ;;  %711 = vmatpush3.bf16.msra.mxu0 %v854_v4 }
  0x96   : > { %736 = vmatprep.subr.bf16.mxu1 %v1074_v0  ;;  %712 = vmatprep.subr.bf16.mxu0 %v1074_v0 }
  0x99   : > { %744 = vmatpush3.bf16.msra.mxu1 %v855_v5  ;;  %713 = vmatpush3.bf16.msra.mxu0 %v855_v5 }
  0x9a   : > { %737 = vmatprep.subr.bf16.mxu1 %v1074_v0  ;;  %714 = vmatprep.subr.bf16.mxu0 %v1074_v0 }
  0x9d   : > { %745 = vmatpush3.bf16.msra.mxu1 %v856_v6  ;;  %715 = vmatpush3.bf16.msra.mxu0 %v856_v6 }
  0x9e   : > { %738 = vmatprep.subr.bf16.mxu1 %v1074_v0  ;;  %716 = vmatprep.subr.bf16.mxu0 %v1074_v0 }
  0xa1   : > { %746 = vmatpush3.bf16.msra.mxu1 %v857_v7  ;;  %717 = vmatpush3.bf16.msra.mxu0 %v857_v7 }
  0xa2   : > { %739 = vmatprep.subr.bf16.mxu1 %v1074_v0  ;;  %718 = vmatprep.subr.bf16.mxu0 %v1074_v0 }
  0xa5   : > { %747 = vmatpush3.bf16.msra.mxu1 %v858_v8  ;;  %719 = vmatpush3.bf16.msra.mxu0 %v858_v8 }
  0xa8   : > { %725 = vmatmul.mubr.bf16.vlgmr.msra.gmra.mrb[0].mxu1 %v859_v9  ;;  %721 = vmatmul.mubr.bf16.vlgmr.msra.gmra.mrb[0].mxu0 %v860_v10 }
  0xa9   : > { %728 = vmatprep.mubr.msk.bf16.mxu1 %vm1075_vm0, %v1074_v0 }
  0xb0   : > { %729 = vmatmul.mubr.bf16.gmra.mrb[4].mxu1 %v861_v11 }
 0x17b   : > { %v432_v13 = vpop.f32.mrb[0].mxu1  ;;  %v424_v15 = vpop.f32.mrb[0].mxu0 }
 0x17c   : > { %v455_v16 = vmul.f32 %v678_v12, %v432_v13  ;;  %v726_v17 = vpop.f32.mrb[1].mxu1  ;;  %v453_v18 = vmul.f32 %v678_v12, %v424_v15  ;;  %v722_v19 = vpop.f32.mrb[1].mxu0 }
 0x17d   : > { %v435_v20 = vpop.f32.mrb[2].mxu1  ;;  %v427_v21 = vpop.f32.mrb[2].mxu0 }
 0x17e   : > { %v467_v22 = vadd.f32 %v679_v14, %v455_v16  ;;  %v465_v23 = vadd.f32 %v679_v14, %v453_v18  ;;  %v456_v24 = vmul.f32 %v678_v12, %v435_v20  ;;  %v727_v25 = vpop.f32.mrb[3].mxu1  ;;  %v454_v26 = vmul.f32 %v678_v12, %v427_v21  ;;  %v723_v27 = vpop.f32.mrb[3].mxu0 }
 0x180   : > { %vm472_vm1 = vcmp.ge.f32.partialorder %v467_v22, 0.0  ;;  %v477_v28 = vmul.f32 0.2, %v467_v22  ;;  %vm470_vm2 = vcmp.ge.f32.partialorder %v465_v23, 0.0  ;;  %v475_v29 = vmul.f32 0.2, %v465_v23 }
 0x181   : > { %v468_v30 = vadd.f32 %v679_v14, %v456_v24  ;;  %v466_v31 = vadd.f32 %v679_v14, %v454_v26 }
 0x182   : > { %v482_v32 = vsel %vm472_vm1, %v467_v22, %v477_v28  ;;  %v480_v33 = vsel %vm470_vm2, %v465_v23, %v475_v29 }
 0x183   : > { %v690_v34 = vpack.c.bf16 %v482_v32, %v482_v32  ;;  %v688_v35 = vpack.c.bf16 %v480_v33, %v480_v33  ;;  %vm473_vm4 = vcmp.ge.f32.partialorder %v468_v30, 0.0  ;;  %v478_v36 = vmul.f32 0.2, %v468_v30  ;;  %v440_v37 = vpop.f32.mrb[4].mxu1 }
 0x184   : > { %vm471_vm5 = vcmp.ge.f32.partialorder %v466_v31, 0.0  ;;  %v476_v38 = vmul.f32 0.2, %v466_v31  ;;  %v457_v39 = vmul.f32 %v678_v12, %v440_v37  ;;  %v730_v40 = vpop.f32.mrb[5].mxu1 }
 0x185   : > { %509 = vst.msk [vmem:[%s303_s23 + $0x8] sm:$0xf] %vm506_vm3, %v690_v34  ;;  %507 = vst.msk [vmem:[%s303_s23] sm:$0xf] %vm506_vm3, %v688_v35  ;;  %v483_v41 = vsel %vm473_vm4, %v468_v30, %v478_v36  ;;  %v443_v42 = vpop.f32.mrb[6].mxu1 }
 0x186   : > { %v691_v43 = vpack.c.bf16 %v483_v41, %v483_v41  ;;  %v481_v44 = vsel %vm471_vm5, %v466_v31, %v476_v38  ;;  %v469_v45 = vadd.f32 %v679_v14, %v457_v39  ;;  %v731_v46 = vpop.f32.mrb[7].mxu1 }
 0x187   : > { %v689_v47 = vpack.c.bf16 %v481_v44, %v481_v44 }
 0x188   : > { %510 = vst.msk [vmem:[%s303_s23 + $0xc] sm:$0xf] %vm506_vm3, %v691_v43  ;;  %vm474_vm6 = vcmp.ge.f32.partialorder %v469_v45, 0.0  ;;  %v479_v48 = vmul.f32 0.2, %v469_v45 }
 0x189   : > { %508 = vst.msk [vmem:[%s303_s23 + $0x4] sm:$0xf] %vm506_vm3, %v689_v47 }
 0x18a   : > { %v484_v49 = vsel %vm474_vm6, %v469_v45, %v479_v48 }
 0x18b   : > { %v692_v50 = vpack.c.bf16 %v484_v49, %v484_v49 }
 0x18d   : > { %511 = vst.msk [vmem:[%s303_s23 + $0x10] sm:$0xf] %vm506_vm3, %v692_v50 }
 0x18e   : > { %989 = shalt.err (!%p986_p0)
}
 0x18f   : > { %s990_s6 = scalar_lea.hbm %s1354_s26, 320  ;;  %s994_s21 = scalar_lea.hbm %s1410_s4, 640 }
 0x190   : > { %p991_p4 = scmp.ne.s32.totalorder %s1354_s26, %s990_s6  ;;  %p995_p12 = scmp.lt.u32.totalorder %s1354_s26, %s1410_s4 }
 0x191   : > { %p996_p1 = scmp.lt.u32.totalorder %s994_s21, %s990_s6  ;;  %p998_p13 = scmp.lt.u32.totalorder %s990_s6, %s1354_s26 }
 0x192   : > { %p992_p2 = pnand %p991_p4, %p1259_p10 }
 0x193   : > { %p997_p11 = por %p996_p1, %p995_p12 }
 0x194   : > { %p993_p8 = pneg %p992_p2 }
 0x195   : > { %p999_p6 = por %p998_p13, %p997_p11 }
 0x197   : > { %p1000_p3 = pnand %p999_p6, %p993_p8 }
 0x199   : > { %1003 = shalt.err (!%p1000_p3)
}
 0x19a   : > { %s1077_s23 = smov 64   ;;  %s1078_s25 = smov 4  }
 0x19b   : > { %766 = dma.vmem_to_hbm [thread:$0]  (%p1259_p10), %s1356_s27, 320, %s1354_s26, %s513_s18, %s1077_s23, %s1077_s23, %s1078_s25  }
 0x19c PF: > { %s1432_s7 = sld [smem:[#allocation15_spill]]  ;;  %s544_s9 = sand.u32 1, %s1046_s15  }
 0x19d   : > { %p1434_p7 = scmp.ge.s32.totalorder %s1066_s20, 2  ;;  %s545_s10 = scalar_lea.sflag [#allocation4], %s544_s9 }
 0x1a2   : > { %p1433_p5 = scmp.ne.s32.totalorder %s1432_s7, 0 }
 0x1a4   : > { %p783_p9 = pnand %p1434_p7, %p1433_p5 }
 0x1a6   : > { %1041 = dma.done.wait (!%p783_p9), %s545_s10, 320  }
 0x1a7   : > { %1043 = vsyncadd (!%p783_p9), %s545_s10, 4294966976  ;;  %s22_s20 = sadd.s32 1, %s1066_s20   ;;  %s1435_s15 = smov %s1050_s16 }
 0x1a8   : > { %p19_p0 = scmp.ge.s32.totalorder %s22_s20, 4   ;;  %s1436_s16 = smov %s1054_s17 }
 0x1a9   : > { %s1437_s17 = smov %s1275_s24  ;;  %s1438_s18 = smov %s1062_s19 }
 0x1aa   : > { %s1439_s19 = smov %s1441_s11  ;;  %21 = sbr.rel (!%p19_p0) target bundleno = 8 (0x8), region = 96 }
 0x1b1   :  { %550 = vsyncpa [#allocation3], 1 }
 0x1b2   :  { %552 = vsyncpa [#allocation3 + $0x1], 1 }
 0x1b3   :  { %553 = vsyncpa [#allocation6], 1 }
 0x1b4   :  { %554 = vsyncpa [#allocation9], 1 }
 0x1b5   :  { %555 = vsyncpa [#allocation4], 1 }
 0x1b6   :  { %557 = vsyncpa [#allocation4 + $0x1], 1 }

// kernel: _lambda_.7
= control target key start
LH: loop header
LB: loop body
LE: loop exit
PB: predicated region body
PF: predicated region fallthrough
CT: control target
= control target key end

     0   :  { %9 = vsyncpa [#allocation3], 0  ;;  %s1730_s0 = inlined_call_operand.hbm [shape: bf16[2,1,40,64], index: 0, kind: input, shape index: {}]   ;;  %s1731_s1 = inlined_call_operand.hbm [shape: bf16[4,64,32], index: 1, kind: input, shape index: {}]   ;;  %s1732_s2 = inlined_call_operand.hbm [shape: f32[1,32], index: 2, kind: input, shape index: {}]   ;;  %s1733_s3 = inlined_call_operand.hbm [shape: f32[1,32], index: 3, kind: input, shape index: {}]   ;;  %s1734_s4 = inlined_call_operand.hbm [shape: bf16[2,1,24,32], index: 4, kind: output, shape index: {}]  }
   0x1   :  { %11 = vsyncpa [#allocation3 + $0x1], 0 }
   0x2   :  { %12 = vsyncpa [#allocation6], 0 }
   0x3   :  { %13 = vsyncpa [#allocation9], 0 }
   0x4   :  { %14 = vsyncpa [#allocation4], 0 }
   0x5   :  { %16 = vsyncpa [#allocation4 + $0x1], 0  ;;  %s1418_s15 = smov 0   ;;  %s1420_s16 = smov 0  }
   0x6   :  { %s1422_s17 = smov 0   ;;  %s1424_s18 = smov 0  }
   0x7   :  { %s1426_s19 = smov 0   ;;  %s1428_s20 = smov 0  }
   0x8 LB: > { %s914_s21 = sadd.s32 4294967295, %s1382_s20   ;;  %s915_s22 = sadd.s32 4294967294, %s1382_s20   ;;  %s1382_s20 = sphi %s1428_s20, %s22_s20   ;;  %s1378_s19 = sphi %s1426_s19, %s1763_s19   ;;  %s1374_s18 = sphi %s1424_s18, %s1762_s18   ;;  %s1370_s17 = sphi %s1422_s17, %s1761_s17   ;;  %s1366_s16 = sphi %s1420_s16, %s1760_s16   ;;  %s1362_s15 = sphi %s1418_s15, %s1759_s15  }
   0x9   : > { %p63_p0 = scmp.ne.s32.totalorder %s1366_s16, %s1362_s15  ;;  %p1452_p1 = scmp.eq.s32.totalorder %s914_s21, 0 }
   0xa   : > { %p1456_p2 = scmp.eq.s32.totalorder %s914_s21, 1  ;;  %p175_p3 = scmp.eq.s32.totalorder %s915_s22, 1 }
   0xb   : > { %s1741_s23 = scalar_select %p1452_p1, 1, 0 }
   0xc   : > { %s1742_s24 = scalar_select %p1456_p2, 1, 0 }
   0xd   : > { %p1462_p4 = por %p1452_p1, %p63_p0  ;;  %p916_p5 = scmp.ge.s32.totalorder %s1382_s20, 1 }
   0xe   : > { %p1467_p6 = por %p175_p3, %p63_p0  ;;  %p182_p7 = scmp.lt.s32.totalorder %s1382_s20, 3 }
   0xf   : > { %s1743_s25 = scalar_select %p1462_p4, 1, 0 }
  0x10   : > { %s1744_s26 = scalar_select %p1467_p6, 1, 0 }
  0x11   : > { %p1472_p8 = pnand %p916_p5, %p182_p7  ;;  %s1384_s28 = smov [#allocation5]  }
  0x12   : > { %1745 = sst [smem:[#allocation15_spill]] %s1744_s26  ;;  %s196_s29 = sshll.u32 %s1384_s28, 4  ;;  %s1476_s29 = int_to_ptr.vmem [resolvable:$true] %s196_s29 }
  0x13   : > { %s1746_s27 = scalar_select %p1472_p8, 1, 0 }
  0x14   : > { %p1073_p9 = pneg %p1472_p8  ;;  %s1385_s5 = smov [#allocation7]  }
  0x15   : > { %s212_s6 = sshll.u32 %s1385_s5, 4  ;;  %s1386_s7 = smov [#allocation8]   ;;  %s1487_s6 = int_to_ptr.vmem [resolvable:$true] %s212_s6 }
  0x16   : > { %p1483_p11 = pnand %p1073_p9, %p1452_p1  ;;  %s1489_s8 = sshll.u32 %s1386_s7, 4  ;;  %s226_s8 = int_to_ptr.vmem [resolvable:$true] %s1489_s8 }
  0x17   : > { %s1178_s11 = scalar_lea.hbm %s1731_s1, 2048 }
  0x18   : > { %p1179_p12 = scmp.ne.s32.totalorder %s1731_s1, %s1178_s11  ;;  %p1499_p13 = pneg %p1483_p11 }
  0x19   : > { %p1185_p5 = scmp.lt.u32.totalorder %s1178_s11, %s1731_s1 }
  0x1a   : > { %p1181_p0 = pnand %p1499_p13, %p1179_p12 }
  0x1c   : > { %p1182_p3 = pneg %p1181_p0 }
  0x1e   : > { %p1187_p7 = pnand %p1185_p5, %p1182_p3 }
  0x20   : > { %1190 = shalt.err (!%p1187_p7)
}
  0x21   : > { %s1191_s28 = scalar_lea.vmem %s1476_s29, 2048  ;;  %p1199_p1 = scmp.lt.s32.totalorder %s1476_s29, %s1476_s29 }
  0x22   : > { %p1192_p9 = scmp.ne.s32.totalorder %s1476_s29, %s1191_s28  ;;  %p1200_p4 = scmp.lt.s32.totalorder %s1191_s28, %s1191_s28 }
  0x24   : > { %p1194_p10 = pnand %p1192_p9, %p1499_p13  ;;  %p1201_p12 = por %p1200_p4, %p1199_p1 }
  0x26   : > { %p1195_p6 = pneg %p1194_p10 }
  0x28   : > { %p1202_p0 = pnand %p1201_p12, %p1195_p6 }
  0x2a   : > { %1205 = shalt.err (!%p1202_p0)
}
  0x2b   : > { %s1740_s5 = smov 64   ;;  %s1388_s7 = smov 4  }
  0x2c   : > { %1076 = dma.hbm_to_vmem [thread:$0]  (!%p1483_p11), %s1731_s1, 2048, %s1476_s29, [#allocation6], %s1740_s5, %s1740_s5, %s1388_s7  }
  0x2d   : > { %s1206_s13 = scalar_lea.hbm %s1732_s2, 16 }
  0x2e   : > { %p1207_p1 = scmp.ne.s32.totalorder %s1732_s2, %s1206_s13  ;;  %p1213_p10 = scmp.lt.u32.totalorder %s1206_s13, %s1732_s2 }
  0x30   : > { %p1209_p4 = pnand %p1207_p1, %p1499_p13 }
  0x32   : > { %p1210_p6 = pneg %p1209_p4 }
  0x34   : > { %p1215_p3 = pnand %p1213_p10, %p1210_p6 }
  0x36   : > { %1218 = shalt.err (!%p1215_p3)
}
  0x37   : > { %s1219_s29 = scalar_lea.vmem %s1487_s6, 16  ;;  %s1226_s9 = scalar_lea.vmem %s1487_s6, 32 }
  0x38   : > { %p1220_p5 = scmp.ne.s32.totalorder %s1487_s6, %s1219_s29  ;;  %p1227_p12 = scmp.lt.s32.totalorder %s1487_s6, %s1487_s6 }
  0x39   : > { %p1228_p0 = scmp.lt.s32.totalorder %s1226_s9, %s1219_s29 }
  0x3a   : > { %p1222_p7 = pnand %p1220_p5, %p1499_p13 }
  0x3b   : > { %p1229_p1 = por %p1228_p0, %p1227_p12 }
  0x3c   : > { %p1223_p9 = pneg %p1222_p7 }
  0x3e   : > { %p1230_p4 = pnand %p1229_p1, %p1223_p9 }
  0x40   : > { %1233 = shalt.err (!%p1230_p4)
}
  0x41   : > { %1079 = dma.hbm_to_vmem [thread:$0]  (!%p1483_p11), %s1732_s2, 16, %s1487_s6, [#allocation6]  }
  0x42   : > { %s1234_s13 = scalar_lea.hbm %s1733_s3, 16 }
  0x43   : > { %p1235_p6 = scmp.ne.s32.totalorder %s1733_s3, %s1234_s13  ;;  %p1241_p5 = scmp.lt.u32.totalorder %s1234_s13, %s1733_s3 }
  0x45   : > { %p1237_p10 = pnand %p1235_p6, %p1499_p13 }
  0x47   : > { %p1238_p3 = pneg %p1237_p10 }
  0x49   : > { %p1243_p7 = pnand %p1241_p5, %p1238_p3 }
  0x4b   : > { %1246 = shalt.err (!%p1243_p7)
}
  0x4c   : > { %s1247_s9 = scalar_lea.vmem %s226_s8, 16  ;;  %s1254_s6 = scalar_lea.vmem %s226_s8, 32 }
  0x4d   : > { %p1248_p9 = scmp.ne.s32.totalorder %s226_s8, %s1247_s9  ;;  %p1255_p1 = scmp.lt.s32.totalorder %s226_s8, %s226_s8 }
  0x4e   : > { %p1256_p4 = scmp.lt.s32.totalorder %s1254_s6, %s1247_s9 }
  0x4f   : > { %p1250_p12 = pnand %p1248_p9, %p1499_p13 }
  0x50   : > { %p1257_p8 = por %p1256_p4, %p1255_p1 }
  0x51   : > { %p1251_p0 = pneg %p1250_p12 }
  0x53   : > { %p1258_p2 = pnand %p1257_p8, %p1251_p0 }
  0x55   : > { %1261 = shalt.err (!%p1258_p2)
}
  0x56   : > { %1082 = dma.hbm_to_vmem [thread:$0]  (!%p1483_p11), %s1733_s3, 16, %s226_s8, [#allocation9]  }
  0x57   : > { %s50_s14 = sadd.s32 1, %s1370_s17  ;;  %s41_s11 = sadd.s32 1, %s1378_s19 }
  0x58   : > { %p57_p2 = scmp.ne.s32.totalorder %s1370_s17, %s1366_s16  ;;  %p43_p8 = scmp.ge.s32.totalorder %s41_s11, 2 }
  0x59   : > { %p58_p13 = scmp.eq.s32.totalorder %s1382_s20, 0  ;;  %p1749_p6 = scmp.ne.s32.totalorder %s1742_s24, 0 }
  0x5a   : > { %p1094_p3 = scmp.lt.s32.totalorder %s1382_s20, 2  ;;  %s1765_s11 = smov (%p43_p8, %s41_s11), 0 }
  0x5b   : > { %p1573_p10 = por %p1749_p6, %p57_p2  ;;  %p59_p5 = por %p58_p13, %p57_p2 }
  0x5c   : > { %s236_s12 = sand.u32 1, %s1370_s17   ;;  %s45_s13 = ssub.s32 %s1378_s19, %s1765_s11 }
  0x5d   : > { %p48_p7 = scmp.eq.s32.totalorder %s45_s13, 0  ;;  %s1052_s8 = smul.u32 20, %s236_s12 }
  0x5e   : > { %s1053_s21 = smul.u32 320, %s1378_s19  ;;  %p1584_p11 = pnand %p1094_p3, %p59_p5 }
  0x5f   : > { %s1589_s24 = scalar_select %p48_p7, %s1370_s17, %s50_s14  }
  0x60   : > { %s1594_s9 = scalar_lea.hbm %s1730_s0, %s1053_s21  ;;  %s240_s6 = scalar_lea.vmem [#allocation2], %s1052_s8 }
  0x61   : > { %s249_s26 = sshll.u32 %s240_s6, 4  ;;  %s1598_s10 = scalar_lea.sflag [#allocation3], %s236_s12  ;;  %s1596_s26 = int_to_ptr.vmem [resolvable:$true] %s249_s26 }
  0x62   : > { %s1262_s13 = scalar_lea.hbm %s1594_s9, 320  ;;  %p1264_p12 = pneg %p1584_p11 }
  0x63   : > { %p1263_p9 = scmp.ne.s32.totalorder %s1594_s9, %s1262_s13  ;;  %s1267_s28 = scalar_lea.hbm %s1730_s0, 640 }
  0x64   : > { %p1268_p4 = scmp.lt.u32.totalorder %s1594_s9, %s1730_s0  ;;  %p1269_p2 = scmp.lt.u32.totalorder %s1267_s28, %s1262_s13 }
  0x65   : > { %p1265_p0 = pnand %p1264_p12, %p1263_p9  ;;  %p1271_p13 = scmp.lt.u32.totalorder %s1262_s13, %s1594_s9 }
  0x66   : > { %p1270_p8 = por %p1269_p2, %p1268_p4 }
  0x67   : > { %p1266_p1 = pneg %p1265_p0 }
  0x68   : > { %p1272_p6 = por %p1271_p13, %p1270_p8 }
  0x6a   : > { %p1273_p3 = pnand %p1272_p6, %p1266_p1 }
  0x6c   : > { %1276 = shalt.err (!%p1273_p3)
}
  0x6d   : > { %s1277_s12 = scalar_lea.vmem %s1596_s26, 320  ;;  %s1389_s8 = smov [#allocation2]  }
  0x6e   : > { %p1278_p5 = scmp.ne.s32.totalorder %s1596_s26, %s1277_s12  ;;  %s1282_s6 = sshll.u32 %s1389_s8, 4  ;;  %s1283_s6 = int_to_ptr.vmem [resolvable:$false] %s1282_s6 }
  0x6f   : > { %s1284_s5 = scalar_lea.vmem %s1283_s6, 640  ;;  %p1285_p0 = scmp.lt.s32.totalorder %s1596_s26, %s1283_s6 }
  0x70   : > { %p1280_p7 = pnand %p1278_p5, %p1264_p12  ;;  %p1286_p4 = scmp.lt.s32.totalorder %s1284_s5, %s1277_s12 }
  0x72   : > { %p1281_p9 = pneg %p1280_p7  ;;  %p1287_p2 = por %p1286_p4, %p1285_p0 }
  0x74   : > { %p1288_p8 = pnand %p1287_p2, %p1281_p9 }
  0x76   : > { %1291 = shalt.err (!%p1288_p8)
}
  0x77   : > { %s1752_s13 = smov 64   ;;  %p1753_p12 = scmp.ne.s32.totalorder %s1746_s27, 0 }
  0x78   : > { %1086 = dma.hbm_to_vmem [thread:$0]  (!%p1584_p11), %s1594_s9, 320, %s1596_s26, %s1598_s10, %s1752_s13, %s1752_s13, %s1388_s7  }
  0x79   : > { %261 = sbr.rel (%p1753_p12) target bundleno = 410 (0x19a), region = 36  ;;  %s1632_s14 = sand.u32 (!%p1753_p12), 1, %s1366_s16  }
  0x7a   : > { %s1054_s21 = smul.u32 (!%p1753_p12), 20, %s1632_s14  ;;  %s264_s28 = scalar_lea.sflag (!%p1753_p12), [#allocation3], %s1632_s14 }
  0x7b   : > { %p1754_p1 = scmp.ne.s32.totalorder (!%p1753_p12), %s1743_s25, 0 }
  0x7c   : > { %s1636_s29 = scalar_lea.vmem (!%p1753_p12), [#allocation2], %s1054_s21 }
  0x80   : > { %1345 = dma.done.wait (%p1754_p1), %s264_s28, 320  }
  0x81   : > { %1347 = vsyncadd (%p1754_p1), %s264_s28, 4294966976  ;;  %p1755_p11 = scmp.ne.s32.totalorder %s1741_s23, 0 }
  0x83   : > { %1349 = dma.done.wait (%p1755_p11), [#allocation6], 2064  }
  0x84   : > { %1351 = vsyncadd (%p1755_p11), [#allocation6], 4294965232 }
  0x85   : > { %1353 = dma.done.wait (%p1755_p11), [#allocation9], 16  }
  0x86   : > { %1355 = vsyncadd (%p1755_p11), [#allocation9], 4294967280  ;;  %v1154_v0 = vld [vmem:[#allocation5 + $0x40] sm:$0xff]   ;;  %v1156_v2 = vld [vmem:[#allocation5 + $0x48] sm:$0xff]   ;;  %vm358_vm0 = vcmask 523264   ;;  %s1055_s23 = smul.u32 12, %s1632_s14 }
  0x87   : > { %v1155_v1 = vld [vmem:[#allocation5 + $0x20] sm:$0xff]   ;;  %993 = vmatprep.subr.bf16.mxu1 %v1154_v0  ;;  %v1157_v3 = vld [vmem:[#allocation5 + $0x28] sm:$0xff]   ;;  %v1158_v4 = vld [vmem:[#allocation5 + $0x50] sm:$0xff]   ;;  %vm519_vm1 = vsmask.f32 7424  ;;  %s1056_s25 = smul.u32 192, %s1374_s18 }
  0x88   : > { %1017 = vmatprep.subr.bf16.mxu0 %v1155_v1  ;;  %994 = vmatpush3.bf16.msra.mxu1 %v1154_v0  ;;  %v1159_v5 = vld [vmem:[#allocation5 + $0x30] sm:$0xff]   ;;  %v1160_v6 = vld [vmem:[#allocation5 + $0x58] sm:$0xff]   ;;  %v1165_v15 = vld [vmem:[#allocation5] sm:$0xff]   ;;  %vm767_vm4 = vcmask 257024   ;;  %s303_s27 = scalar_lea.vmem [#allocation10], %s1055_s23  ;;  %s772_s18 = scalar_lea.sflag [#allocation4], %s1632_s14 }
  0x89   : > { %1018 = vmatpush3.bf16.msra.mxu0 %v1155_v1  ;;  %995 = vmatprep.subr.bf16.mxu1 %v1156_v2  ;;  %v306_v7 = vld [vmem:[%s1636_s29 + $0x4] sm:$0xf]  ;;  %v1652_v8 = vld [vmem:[%s1636_s29 + $0x8] sm:$0xf]  ;;  %v305_v11 = vld [vmem:[%s1636_s29] sm:$0xf]  ;;  %s1679_s26 = scalar_lea.hbm %s1734_s4, %s1056_s25 }
  0x8a   : > { %1019 = vmatprep.subr.bf16.mxu0 %v1157_v3  ;;  %v1161_v9 = vld [vmem:[#allocation5 + $0x38] sm:$0xff]   ;;  %v926_v10 = vcombine.low %v306_v7, %v1652_v8  ;;  %v497_v14 = vld [vmem:[%s1636_s29 + $0x8] sm:$0xf]  ;;  %v934_v27 = vcombine.low %v305_v11, %v306_v7  ;;  %v1172_v31 = vld [vmem:[#allocation5 + $0x8] sm:$0xff]   ;;  %v935_v48 = vcombine.low %v1652_v8, %v1652_v8  ;;  %s788_s7 = sshll.u32 %s303_s27, 4  ;;  %s1390_s12 = smov [#allocation10]   ;;  %s1681_s7 = int_to_ptr.vmem [resolvable:$true] %s788_s7 }
  0x8b   : > { %v495_v12 = vld [vmem:[%s1636_s29] sm:$0xf]  ;;  %v496_v13 = vld [vmem:[%s1636_s29 + $0x4] sm:$0xf]  ;;  %v498_v16 = vld [vmem:[%s1636_s29 + $0xc] sm:$0xf] }
  0x8c   : > { %996 = vmatpush3.bf16.msra.mxu1 %v1156_v2  ;;  %1001 = vmatprep.mubr.msk.bf16.mxu1 %vm358_vm0, %v926_v10  ;;  %v942_v17 = vcombine.low %v495_v12, %v496_v13  ;;  %v499_v18 = vld [vmem:[%s1636_s29 + $0x10] sm:$0x1]  ;;  %v943_v19 = vcombine.low %v497_v14, %v498_v16  ;;  %v1170_v22 = vld [vmem:[#allocation5 + $0x60] sm:$0xff]   ;;  %v950_v25 = vcombine.low %v496_v13, %v497_v14  ;;  %v1174_v39 = vld [vmem:[#allocation5 + $0x10] sm:$0xff]   ;;  %s1292_s10 = scalar_lea.vmem %s1681_s7, 192  ;;  %s1296_s8 = sshll.u32 %s1390_s12, 4  ;;  %s1297_s8 = int_to_ptr.vmem [resolvable:$false] %s1296_s8 }
  0x8d   : > { %1020 = vmatpush3.bf16.msra.mxu0 %v1157_v3  ;;  %997 = vmatprep.subr.bf16.mxu1 %v1158_v4  ;;  %v1171_v26 = vld [vmem:[%s1636_s29 + $0xc] ss:$0 sps:$4 sm:$0xff]   ;;  %v951_v29 = vcombine.low %v498_v16, %v499_v18  ;;  %v1173_v37 = vld [vmem:[#allocation5 + $0x68] sm:$0xff]   ;;  %v1175_v43 = vld [vmem:[#allocation5 + $0x70] sm:$0xff]   ;;  %p1293_p13 = scmp.ne.s32.totalorder %s1681_s7, %s1292_s10  ;;  %s1298_s6 = scalar_lea.vmem %s1297_s8, 384 }
  0x8e   : > { %1021 = vmatprep.subr.bf16.mxu0 %v1159_v5  ;;  %v521_v20 = vshrl.u32 %v942_v17, 16  ;;  %v523_v21 = vshll.u32 %v942_v17, 16  ;;  %v528_v23 = vshll.u32 %v943_v19, 16  ;;  %v532_v24 = vshrl.u32 %v943_v19, 16  ;;  %v1176_v44 = vld [vmem:[#allocation5 + $0x18] sm:$0xff]   ;;  %p1299_p5 = scmp.lt.s32.totalorder %s1681_s7, %s1297_s8  ;;  %p1300_p7 = scmp.lt.s32.totalorder %s1298_s6, %s1292_s10 }
  0x8f   : > { %v630_v34 = vshrl.u32 %v950_v25, 16  ;;  %v632_v35 = vshll.u32 %v950_v25, 16  ;;  %v637_v38 = vshll.u32 %v951_v29, 16  ;;  %v1177_v46 = vld [vmem:[#allocation5 + $0x78] sm:$0xff]   ;;  %v641_v47 = vshrl.u32 %v951_v29, 16  ;;  %p1294_p6 = pnand %p1293_p13, %p1573_p10 }
  0x90   : > { %998 = vmatpush3.bf16.msra.mxu1 %v1158_v4  ;;  %v525_v28 = vrot.slane %v523_v21, 1  ;;  %v530_v30 = vrot.slane %v528_v23, 1  ;;  %v958_v54 = vld [vmem:[#allocation7] ss:$0 sm:$0xff]  ;;  %v959_v58 = vld [vmem:[#allocation8] ss:$0 sm:$0xff]  ;;  %p1301_p9 = por %p1300_p7, %p1299_p5 }
  0x91   : > { %1022 = vmatpush3.bf16.msra.mxu0 %v1159_v5  ;;  %999 = vmatprep.subr.bf16.mxu1 %v1160_v6  ;;  %v634_v40 = vrot.slane %v632_v35, 1  ;;  %v639_v41 = vrot.slane %v637_v38, 1  ;;  %p1295_p3 = pneg %p1294_p6 }
  0x92   : > { %1023 = vmatprep.subr.bf16.mxu0 %v1161_v9  ;;  %v526_v32 = vor.u32 %v525_v28, %v521_v20  ;;  %v534_v33 = vor.u32 %v532_v24, %v530_v30 }
  0x93   : > { %v635_v42 = vor.u32 %v634_v40, %v630_v34  ;;  %v643_v49 = vor.u32 %v641_v47, %v639_v41  ;;  %p1302_p0 = pnand %p1301_p9, %p1295_p3 }
  0x94   : > { %1000 = vmatpush3.bf16.msra.mxu1 %v1160_v6  ;;  %v531_v36 = vsel %vm519_vm1, %v526_v32, %v530_v30 }
  0x95   : > { %1024 = vmatpush3.bf16.msra.mxu0 %v1161_v9  ;;  %1005 = vmatprep.subr.bf16.mxu1 %v1165_v15  ;;  %v640_v45 = vsel %vm519_vm1, %v635_v42, %v639_v41 }
  0x96   : > { %1029 = vmatprep.subr.bf16.mxu0 %v1170_v22  ;;  %1025 = vmatprep.mubr.msk.bf16.mxu0 %vm358_vm0, %v531_v36 }
  0x97   : > { %1002 = vmatmul.mubr.msk.bf16.vlgmr.msra.gmra.mrb[0].mxu1 %vm358_vm0, %v1171_v26 }
  0x98   : > { %1006 = vmatpush3.bf16.msra.mxu1 %v1165_v15  ;;  %1013 = vmatprep.mubr.msk.bf16.mxu1 %vm358_vm0, %v934_v27 }
  0x99   : > { %1007 = vmatprep.subr.bf16.mxu1 %v1172_v31  ;;  %1026 = vmatmul.mubr.msk.bf16.vlgmr.msra.gmra.mrb[0].mxu0 %vm358_vm0, %v534_v33 }
  0x9a   : > { %1030 = vmatpush3.bf16.msra.mxu0 %v1170_v22  ;;  %1037 = vmatprep.mubr.msk.bf16.mxu0 %vm358_vm0, %v640_v45 }
  0x9b   : > { %1031 = vmatprep.subr.bf16.mxu0 %v1173_v37 }
  0x9c   : > { %1008 = vmatpush3.bf16.msra.mxu1 %v1172_v31 }
  0x9d   : > { %1009 = vmatprep.subr.bf16.mxu1 %v1174_v39 }
  0x9e   : > { %1032 = vmatpush3.bf16.msra.mxu0 %v1173_v37 }
  0x9f   : > { %1033 = vmatprep.subr.bf16.mxu0 %v1175_v43 }
  0xa0   : > { %1010 = vmatpush3.bf16.msra.mxu1 %v1174_v39 }
  0xa1   : > { %1011 = vmatprep.subr.bf16.mxu1 %v1176_v44 }
  0xa2   : > { %1034 = vmatpush3.bf16.msra.mxu0 %v1175_v43 }
  0xa3   : > { %1035 = vmatprep.subr.bf16.mxu0 %v1177_v46 }
  0xa4   : > { %1012 = vmatpush3.bf16.msra.mxu1 %v1176_v44 }
  0xa6   : > { %1036 = vmatpush3.bf16.msra.mxu0 %v1177_v46 }
  0xa7   : > { %1014 = vmatmul.mubr.msk.bf16.vlgmr.msra.gmra.mrb[0].mxu1 %vm358_vm0, %v935_v48 }
  0xa9   : > { %1038 = vmatmul.mubr.msk.bf16.vlgmr.msra.gmra.mrb[0].mxu0 %vm358_vm0, %v643_v49 }
 0x17a   : > { %v1015_v50 = vpop.f32.mrb[0].mxu1 }
 0x17b   : > { %v481_v51 = vpop.f32.mrb[1].mxu1 }
 0x17c   : > { %v1016_v52 = vpop.f32.mrb[2].mxu1  ;;  %v1039_v53 = vpop.f32.mrb[0].mxu0 }
 0x17d   : > { %v484_v55 = vpop.f32.mrb[3].mxu1  ;;  %v1041_v56 = vadd.f32 %v1039_v53, %v1015_v50  ;;  %v708_v57 = vpop.f32.mrb[1].mxu0 }
 0x17e   : > { %v1042_v59 = vadd.f32 %v708_v57, %v481_v51  ;;  %v1040_v60 = vpop.f32.mrb[2].mxu0 }
 0x17f   : > { %v734_v61 = vmul.f32 %v1041_v56, %v958_v54  ;;  %v711_v62 = vpop.f32.mrb[3].mxu0 }
 0x180   : > { %v732_v63 = vmul.f32 %v1042_v59, %v958_v54  ;;  %v1043_v0 = vadd.f32 %v711_v62, %v484_v55 }
 0x181   : > { %v744_v1 = vadd.f32 %v959_v58, %v734_v61 }
 0x182   : > { %v742_v2 = vadd.f32 %v959_v58, %v732_v63  ;;  %v733_v3 = vmul.f32 %v1043_v0, %v958_v54 }
 0x183   : > { %vm747_vm2 = vcmp.ge.f32.partialorder %v744_v1, 0.0  ;;  %v750_v4 = vmul.f32 0.2, %v744_v1 }
 0x184   : > { %vm745_vm3 = vcmp.ge.f32.partialorder %v742_v2, 0.0  ;;  %v748_v5 = vmul.f32 0.2, %v742_v2  ;;  %v743_v6 = vadd.f32 %v959_v58, %v733_v3 }
 0x185   : > { %v753_v7 = vsel %vm747_vm2, %v744_v1, %v750_v4 }
 0x186   : > { %v968_v8 = vpack.c.bf16 %v753_v7, %v753_v7  ;;  %v751_v9 = vsel %vm745_vm3, %v742_v2, %v748_v5  ;;  %vm746_vm5 = vcmp.ge.f32.partialorder %v743_v6, 0.0  ;;  %v749_v10 = vmul.f32 0.2, %v743_v6 }
 0x187   : > { %v966_v11 = vpack.c.bf16 %v751_v9, %v751_v9 }
 0x188   : > { %770 = vst.msk [vmem:[%s303_s27 + $0x8] sm:$0xf] %vm767_vm4, %v968_v8  ;;  %v752_v12 = vsel %vm746_vm5, %v743_v6, %v749_v10 }
 0x189   : > { %768 = vst.msk [vmem:[%s303_s27] sm:$0xf] %vm767_vm4, %v966_v11  ;;  %v967_v13 = vpack.c.bf16 %v752_v12, %v752_v12 }
 0x18b   : > { %769 = vst.msk [vmem:[%s303_s27 + $0x4] sm:$0xf] %vm767_vm4, %v967_v13 }
 0x18c   : > { %1305 = shalt.err (!%p1302_p0)
}
 0x18d   : > { %s1306_s5 = scalar_lea.hbm %s1679_s26, 192  ;;  %s1310_s28 = scalar_lea.hbm %s1734_s4, 384 }
 0x18e   : > { %p1307_p4 = scmp.ne.s32.totalorder %s1679_s26, %s1306_s5  ;;  %p1311_p12 = scmp.lt.u32.totalorder %s1679_s26, %s1734_s4 }
 0x18f   : > { %p1312_p1 = scmp.lt.u32.totalorder %s1310_s28, %s1306_s5  ;;  %p1314_p13 = scmp.lt.u32.totalorder %s1306_s5, %s1679_s26 }
 0x190   : > { %p1308_p2 = pnand %p1307_p4, %p1573_p10 }
 0x191   : > { %p1313_p11 = por %p1312_p1, %p1311_p12 }
 0x192   : > { %p1309_p8 = pneg %p1308_p2 }
 0x193   : > { %p1315_p6 = por %p1314_p13, %p1313_p11 }
 0x195   : > { %p1316_p3 = pnand %p1315_p6, %p1309_p8 }
 0x197   : > { %1319 = shalt.err (!%p1316_p3)
}
 0x198   : > { %s1391_s25 = smov 64   ;;  %s1392_s27 = smov 4  }
 0x199   : > { %1071 = dma.vmem_to_hbm [thread:$0]  (%p1573_p10), %s1681_s7, 192, %s1679_s26, %s772_s18, %s1391_s25, %s1391_s25, %s1392_s27  }
 0x19a PF: > { %s1756_s22 = sld [smem:[#allocation15_spill]]  ;;  %s803_s9 = sand.u32 1, %s1362_s15  }
 0x19b   : > { %p1758_p7 = scmp.ge.s32.totalorder %s1382_s20, 2  ;;  %s804_s10 = scalar_lea.sflag [#allocation4], %s803_s9 }
 0x1a0   : > { %p1757_p5 = scmp.ne.s32.totalorder %s1756_s22, 0 }
 0x1a2   : > { %p1088_p9 = pnand %p1758_p7, %p1757_p5 }
 0x1a4   : > { %1357 = dma.done.wait (!%p1088_p9), %s804_s10, 192  }
 0x1a5   : > { %1359 = vsyncadd (!%p1088_p9), %s804_s10, 4294967104  ;;  %s22_s20 = sadd.s32 1, %s1382_s20   ;;  %s1759_s15 = smov %s1366_s16 }
 0x1a6   : > { %p19_p0 = scmp.ge.s32.totalorder %s22_s20, 4   ;;  %s1760_s16 = smov %s1370_s17 }
 0x1a7   : > { %s1761_s17 = smov %s1589_s24  ;;  %s1762_s18 = smov %s1378_s19 }
 0x1a8   : > { %s1763_s19 = smov %s1765_s11  ;;  %21 = sbr.rel (!%p19_p0) target bundleno = 8 (0x8), region = 99 }
 0x1af   :  { %809 = vsyncpa [#allocation3], 1 }
 0x1b0   :  { %811 = vsyncpa [#allocation3 + $0x1], 1 }
 0x1b1   :  { %812 = vsyncpa [#allocation6], 1 }
 0x1b2   :  { %813 = vsyncpa [#allocation9], 1 }
 0x1b3   :  { %814 = vsyncpa [#allocation4], 1 }
 0x1b4   :  { %816 = vsyncpa [#allocation4 + $0x1], 1 }

// kernel: _lambda_.8
= control target key start
LH: loop header
LB: loop body
LE: loop exit
PB: predicated region body
PF: predicated region fallthrough
CT: control target
= control target key end

     0   :  { %9 = vsyncpa [#allocation3], 0  ;;  %s3137_s0 = inlined_call_operand.hbm [shape: bf16[2,1,64,32], index: 0, kind: input, shape index: {}]   ;;  %s3138_s1 = inlined_call_operand.hbm [shape: bf16[16,32,64], index: 1, kind: input, shape index: {}]   ;;  %s3139_s2 = inlined_call_operand.hbm [shape: f32[1,64], index: 2, kind: input, shape index: {}]   ;;  %s3140_s3 = inlined_call_operand.hbm [shape: f32[1,64], index: 3, kind: input, shape index: {}]   ;;  %s3141_s4 = inlined_call_operand.hbm [shape: bf16[2,1,32,64], index: 4, kind: output, shape index: {}]  }
   0x1   :  { %11 = vsyncpa [#allocation3 + $0x1], 0 }
   0x2   :  { %12 = vsyncpa [#allocation6], 0 }
   0x3   :  { %13 = vsyncpa [#allocation9], 0 }
   0x4   :  { %14 = vsyncpa [#allocation4], 0 }
   0x5   :  { %16 = vsyncpa [#allocation4 + $0x1], 0  ;;  %s2699_s15 = smov 0   ;;  %s2701_s16 = smov 0  }
   0x6   :  { %s2703_s17 = smov 0   ;;  %s2705_s18 = smov 0  }
   0x7   :  { %s2707_s19 = smov 0   ;;  %s2709_s20 = smov 0  }
   0x8 LB: > { %s1941_s21 = sadd.s32 4294967295, %s2663_s20   ;;  %s1942_s22 = sadd.s32 4294967294, %s2663_s20   ;;  %s2663_s20 = sphi %s2709_s20, %s22_s20   ;;  %s2659_s19 = sphi %s2707_s19, %s3168_s19   ;;  %s2655_s18 = sphi %s2705_s18, %s3167_s18   ;;  %s2651_s17 = sphi %s2703_s17, %s3166_s17   ;;  %s2647_s16 = sphi %s2701_s16, %s3165_s16   ;;  %s2643_s15 = sphi %s2699_s15, %s3164_s15  }
   0x9   : > { %p63_p0 = scmp.ne.s32.totalorder %s2647_s16, %s2643_s15  ;;  %p2733_p1 = scmp.eq.s32.totalorder %s1941_s21, 0 }
   0xa   : > { %p2737_p2 = scmp.eq.s32.totalorder %s1941_s21, 1  ;;  %p175_p3 = scmp.eq.s32.totalorder %s1942_s22, 1 }
   0xb   : > { %s3147_s23 = scalar_select %p2733_p1, 1, 0 }
   0xc   : > { %s3148_s24 = scalar_select %p2737_p2, 1, 0 }
   0xd   : > { %p2743_p4 = por %p2733_p1, %p63_p0  ;;  %p1943_p5 = scmp.ge.s32.totalorder %s2663_s20, 1 }
   0xe   : > { %p2748_p6 = por %p175_p3, %p63_p0  ;;  %p182_p7 = scmp.lt.s32.totalorder %s2663_s20, 3 }
   0xf   : > { %s3149_s25 = scalar_select %p2743_p4, 1, 0 }
  0x10   : > { %s3150_s26 = scalar_select %p2748_p6, 1, 0 }
  0x11   : > { %p2753_p8 = pnand %p1943_p5, %p182_p7  ;;  %s2665_s28 = smov [#allocation5]  }
  0x12   : > { %3151 = sst [smem:[#allocation15_spill]] %s3150_s26  ;;  %s196_s29 = sshll.u32 %s2665_s28, 4  ;;  %s2757_s29 = int_to_ptr.vmem [resolvable:$true] %s196_s29 }
  0x13   : > { %s3152_s27 = scalar_select %p2753_p8, 1, 0 }
  0x14   : > { %p2326_p9 = pneg %p2753_p8  ;;  %s2666_s5 = smov [#allocation7]  }
  0x15   : > { %s212_s6 = sshll.u32 %s2666_s5, 4  ;;  %s2667_s7 = smov [#allocation8]   ;;  %s2768_s6 = int_to_ptr.vmem [resolvable:$true] %s212_s6 }
  0x16   : > { %p2764_p11 = pnand %p2326_p9, %p2733_p1  ;;  %s2770_s8 = sshll.u32 %s2667_s7, 4  ;;  %s226_s8 = int_to_ptr.vmem [resolvable:$true] %s2770_s8 }
  0x17   : > { %s2459_s11 = scalar_lea.hbm %s3138_s1, 4096 }
  0x18   : > { %p2460_p12 = scmp.ne.s32.totalorder %s3138_s1, %s2459_s11  ;;  %p2780_p13 = pneg %p2764_p11 }
  0x19   : > { %p2466_p5 = scmp.lt.u32.totalorder %s2459_s11, %s3138_s1 }
  0x1a   : > { %p2462_p0 = pnand %p2780_p13, %p2460_p12 }
  0x1c   : > { %p2463_p3 = pneg %p2462_p0 }
  0x1e   : > { %p2468_p7 = pnand %p2466_p5, %p2463_p3 }
  0x20   : > { %2471 = shalt.err (!%p2468_p7)
}
  0x21   : > { %s2472_s28 = scalar_lea.vmem %s2757_s29, 4096  ;;  %p2480_p1 = scmp.lt.s32.totalorder %s2757_s29, %s2757_s29 }
  0x22   : > { %p2473_p9 = scmp.ne.s32.totalorder %s2757_s29, %s2472_s28  ;;  %p2481_p4 = scmp.lt.s32.totalorder %s2472_s28, %s2472_s28 }
  0x24   : > { %p2475_p10 = pnand %p2473_p9, %p2780_p13  ;;  %p2482_p12 = por %p2481_p4, %p2480_p1 }
  0x26   : > { %p2476_p6 = pneg %p2475_p10 }
  0x28   : > { %p2483_p0 = pnand %p2482_p12, %p2476_p6 }
  0x2a   : > { %2486 = shalt.err (!%p2483_p0)
}
  0x2b   : > { %s2668_s5 = smov 64   ;;  %s2669_s7 = smov 4  }
  0x2c   : > { %2329 = dma.hbm_to_vmem [thread:$0]  (!%p2764_p11), %s3138_s1, 4096, %s2757_s29, [#allocation6], %s2668_s5, %s2668_s5, %s2669_s7  }
  0x2d   : > { %s2487_s13 = scalar_lea.hbm %s3139_s2, 16 }
  0x2e   : > { %p2488_p1 = scmp.ne.s32.totalorder %s3139_s2, %s2487_s13  ;;  %p2494_p10 = scmp.lt.u32.totalorder %s2487_s13, %s3139_s2 }
  0x30   : > { %p2490_p4 = pnand %p2488_p1, %p2780_p13 }
  0x32   : > { %p2491_p6 = pneg %p2490_p4 }
  0x34   : > { %p2496_p3 = pnand %p2494_p10, %p2491_p6 }
  0x36   : > { %2499 = shalt.err (!%p2496_p3)
}
  0x37   : > { %s2500_s29 = scalar_lea.vmem %s2768_s6, 16  ;;  %s2507_s9 = scalar_lea.vmem %s2768_s6, 32 }
  0x38   : > { %p2501_p5 = scmp.ne.s32.totalorder %s2768_s6, %s2500_s29  ;;  %p2508_p12 = scmp.lt.s32.totalorder %s2768_s6, %s2768_s6 }
  0x39   : > { %p2509_p0 = scmp.lt.s32.totalorder %s2507_s9, %s2500_s29 }
  0x3a   : > { %p2503_p7 = pnand %p2501_p5, %p2780_p13 }
  0x3b   : > { %p2510_p1 = por %p2509_p0, %p2508_p12 }
  0x3c   : > { %p2504_p9 = pneg %p2503_p7 }
  0x3e   : > { %p2511_p4 = pnand %p2510_p1, %p2504_p9 }
  0x40   : > { %2514 = shalt.err (!%p2511_p4)
}
  0x41   : > { %2332 = dma.hbm_to_vmem [thread:$0]  (!%p2764_p11), %s3139_s2, 16, %s2768_s6, [#allocation6]  }
  0x42   : > { %s2515_s13 = scalar_lea.hbm %s3140_s3, 16 }
  0x43   : > { %p2516_p6 = scmp.ne.s32.totalorder %s3140_s3, %s2515_s13  ;;  %p2522_p5 = scmp.lt.u32.totalorder %s2515_s13, %s3140_s3 }
  0x45   : > { %p2518_p10 = pnand %p2516_p6, %p2780_p13 }
  0x47   : > { %p2519_p3 = pneg %p2518_p10 }
  0x49   : > { %p2524_p7 = pnand %p2522_p5, %p2519_p3 }
  0x4b   : > { %2527 = shalt.err (!%p2524_p7)
}
  0x4c   : > { %s2528_s9 = scalar_lea.vmem %s226_s8, 16  ;;  %s2535_s6 = scalar_lea.vmem %s226_s8, 32 }
  0x4d   : > { %p2529_p9 = scmp.ne.s32.totalorder %s226_s8, %s2528_s9  ;;  %p2536_p1 = scmp.lt.s32.totalorder %s226_s8, %s226_s8 }
  0x4e   : > { %p2537_p4 = scmp.lt.s32.totalorder %s2535_s6, %s2528_s9 }
  0x4f   : > { %p2531_p12 = pnand %p2529_p9, %p2780_p13 }
  0x50   : > { %p2538_p8 = por %p2537_p4, %p2536_p1 }
  0x51   : > { %p2532_p0 = pneg %p2531_p12 }
  0x53   : > { %p2539_p2 = pnand %p2538_p8, %p2532_p0 }
  0x55   : > { %2542 = shalt.err (!%p2539_p2)
}
  0x56   : > { %2335 = dma.hbm_to_vmem [thread:$0]  (!%p2764_p11), %s3140_s3, 16, %s226_s8, [#allocation9]  }
  0x57   : > { %s50_s14 = sadd.s32 1, %s2651_s17  ;;  %s41_s11 = sadd.s32 1, %s2659_s19 }
  0x58   : > { %p57_p2 = scmp.ne.s32.totalorder %s2651_s17, %s2647_s16  ;;  %p43_p8 = scmp.ge.s32.totalorder %s41_s11, 2 }
  0x59   : > { %p58_p13 = scmp.eq.s32.totalorder %s2663_s20, 0  ;;  %p3155_p6 = scmp.ne.s32.totalorder %s3148_s24, 0 }
  0x5a   : > { %p2347_p3 = scmp.lt.s32.totalorder %s2663_s20, 2  ;;  %s3170_s11 = smov (%p43_p8, %s41_s11), 0 }
  0x5b   : > { %p2854_p10 = por %p3155_p6, %p57_p2  ;;  %p59_p5 = por %p58_p13, %p57_p2 }
  0x5c   : > { %s236_s12 = sand.u32 1, %s2651_s17   ;;  %s45_s13 = ssub.s32 %s2659_s19, %s3170_s11 }
  0x5d   : > { %p48_p7 = scmp.eq.s32.totalorder %s45_s13, 0  ;;  %s1948_s8 = sshll.u32 %s236_s12, 5 }
  0x5e   : > { %s2052_s21 = sshll.u32 %s2659_s19, 9  ;;  %s240_s9 = scalar_lea.vmem [#allocation2], %s1948_s8 }
  0x5f   : > { %s2866_s22 = scalar_select %p48_p7, %s2651_s17, %s50_s14  }
  0x60   : > { %s2871_s24 = scalar_lea.hbm %s3137_s0, %s2052_s21  ;;  %s249_s6 = sshll.u32 %s240_s9, 4  ;;  %s2873_s6 = int_to_ptr.vmem [resolvable:$true] %s249_s6 }
  0x61   : > { %p2877_p11 = pnand %p2347_p3, %p59_p5  ;;  %s2881_s10 = scalar_lea.sflag [#allocation3], %s236_s12 }
  0x62   : > { %s2543_s14 = scalar_lea.hbm %s2871_s24, 512  ;;  %s2548_s21 = scalar_lea.hbm %s3137_s0, 1024 }
  0x63   : > { %p2544_p9 = scmp.ne.s32.totalorder %s2871_s24, %s2543_s14  ;;  %p2545_p12 = pneg %p2877_p11 }
  0x64   : > { %p2549_p4 = scmp.lt.u32.totalorder %s2871_s24, %s3137_s0  ;;  %p2550_p2 = scmp.lt.u32.totalorder %s2548_s21, %s2543_s14 }
  0x65   : > { %p2546_p0 = pnand %p2545_p12, %p2544_p9  ;;  %p2552_p13 = scmp.lt.u32.totalorder %s2543_s14, %s2871_s24 }
  0x66   : > { %p2551_p8 = por %p2550_p2, %p2549_p4 }
  0x67   : > { %p2547_p1 = pneg %p2546_p0 }
  0x68   : > { %p2553_p6 = por %p2552_p13, %p2551_p8 }
  0x6a   : > { %p2554_p3 = pnand %p2553_p6, %p2547_p1 }
  0x6c   : > { %2557 = shalt.err (!%p2554_p3)
}
  0x6d   : > { %s2558_s12 = scalar_lea.vmem %s2873_s6, 512  ;;  %s2670_s9 = smov [#allocation2]  }
  0x6e   : > { %p2559_p5 = scmp.ne.s32.totalorder %s2873_s6, %s2558_s12  ;;  %s2563_s13 = sshll.u32 %s2670_s9, 4  ;;  %s2564_s13 = int_to_ptr.vmem [resolvable:$false] %s2563_s13 }
  0x6f   : > { %s2565_s8 = scalar_lea.vmem %s2564_s13, 1024  ;;  %p2566_p0 = scmp.lt.s32.totalorder %s2873_s6, %s2564_s13 }
  0x70   : > { %p2561_p7 = pnand %p2559_p5, %p2545_p12  ;;  %p2567_p4 = scmp.lt.s32.totalorder %s2565_s8, %s2558_s12 }
  0x72   : > { %p2562_p9 = pneg %p2561_p7  ;;  %p2568_p2 = por %p2567_p4, %p2566_p0 }
  0x74   : > { %p2569_p8 = pnand %p2568_p2, %p2562_p9 }
  0x76   : > { %2572 = shalt.err (!%p2569_p8)
}
  0x77   : > { %2339 = dma.hbm_to_vmem [thread:$0]  (!%p2877_p11), %s2871_s24, 512, %s2873_s6, %s2881_s10, %s2668_s5, %s2668_s5, %s2669_s7  }
  0x78   : > { %p3158_p12 = scmp.ne.s32.totalorder %s3152_s27, 0 }
  0x79   : > { %s2915_s14 = sand.u32 (!%p3158_p12), 1, %s2647_s16   ;;  %p3159_p1 = scmp.ne.s32.totalorder (!%p3158_p12), %s3149_s25, 0 }
  0x7a   : > { %261 = sbr.rel (%p3158_p12) target bundleno = 472 (0x1d8), region = 36  ;;  %s1952_s21 = sshll.u32 (!%p3158_p12), %s2915_s14, 5 }
  0x7b   : > { %s264_s28 = scalar_lea.sflag (!%p3158_p12), [#allocation3], %s2915_s14  ;;  %s2919_s29 = scalar_lea.vmem (!%p3158_p12), [#allocation2], %s1952_s21 }
  0x81   : > { %2626 = dma.done.wait (%p3159_p1), %s264_s28, 512  }
  0x82   : > { %2628 = vsyncadd (%p3159_p1), %s264_s28, 4294966784  ;;  %p3160_p11 = scmp.ne.s32.totalorder %s3147_s23, 0 }
  0x84   : > { %2630 = dma.done.wait (%p3160_p11), [#allocation6], 4112  }
  0x85   : > { %2632 = vsyncadd (%p3160_p11), [#allocation6], 4294963184 }
  0x86   : > { %2634 = dma.done.wait (%p3160_p11), [#allocation9], 16  }
  0x87   : > { %2636 = vsyncadd (%p3160_p11), [#allocation9], 4294967280  ;;  %v2407_v0 = vld [vmem:[#allocation5 + $0x40] sm:$0xff]   ;;  %v2409_v2 = vld [vmem:[#allocation5 + $0x48] sm:$0xff]   ;;  %vm341_vm0 = vcmask 261120   ;;  %vm1062_vm1 = vcmask 1046528  }
  0x88   : > { %v2408_v1 = vld [vmem:[#allocation5 + $0x20] sm:$0xff]   ;;  %2122 = vmatprep.subr.bf16.mxu1 %v2407_v0  ;;  %v2410_v3 = vld [vmem:[#allocation5 + $0x28] sm:$0xff]   ;;  %v313_v8 = vld [vmem:[%s2919_s29 + $0x10] sm:$0xf]  ;;  %vm674_vm2 = vsmask.f32 7424 }
  0x89   : > { %2186 = vmatprep.subr.bf16.mxu0 %v2408_v1  ;;  %2123 = vmatpush3.bf16.msra.mxu1 %v2407_v0  ;;  %v305_v4 = vld [vmem:[%s2919_s29] sm:$0xf]  ;;  %v306_v5 = vld [vmem:[%s2919_s29 + $0x4] sm:$0xf]  ;;  %v307_v6 = vld [vmem:[%s2919_s29 + $0x8] sm:$0xf] }
  0x8a   : > { %2187 = vmatpush3.bf16.msra.mxu0 %v2408_v1  ;;  %2124 = vmatprep.subr.bf16.mxu1 %v2409_v2  ;;  %v308_v7 = vld [vmem:[%s2919_s29 + $0xc] sm:$0xf]  ;;  %v1957_v9 = vcombine.low %v306_v5, %v307_v6  ;;  %v2939_v10 = vld [vmem:[%s2919_s29 + $0x4] sm:$0xf]  ;;  %v650_v12 = vld [vmem:[%s2919_s29 + $0x8] sm:$0xf]  ;;  %v1963_v19 = vcombine.low %v305_v4, %v306_v5 }
  0x8b   : > { %2188 = vmatprep.subr.bf16.mxu0 %v2410_v3  ;;  %v1958_v11 = vcombine.low %v308_v7, %v313_v8  ;;  %v651_v13 = vld [vmem:[%s2919_s29 + $0xc] sm:$0xf]  ;;  %v652_v14 = vld [vmem:[%s2919_s29 + $0x10] sm:$0xf]  ;;  %v2948_v16 = vcombine.low %v2939_v10, %v650_v12  ;;  %v1053_v18 = vld [vmem:[%s2919_s29] sm:$0xe]  ;;  %v1964_v39 = vcombine.low %v307_v6, %v308_v7 }
  0x8c   : > { %2126 = vmatprep.mubr.msk.bf16.mxu1 %vm341_vm0, %v1957_v9  ;;  %v2945_v15 = vcombine.low %v650_v12, %v651_v13  ;;  %v2950_v17 = vcombine.low %v651_v13, %v652_v14  ;;  %v2954_v20 = vcombine.low %v1053_v18, %v2939_v10  ;;  %v2419_v21 = vld [vmem:[#allocation5] sm:$0xff]   ;;  %v2956_v22 = vcombine.low %v652_v14, %v652_v14  ;;  %v2422_v27 = vld [vmem:[#allocation5 + $0x8] sm:$0xff]   ;;  %v653_v33 = vld [vmem:[%s2919_s29 + $0x14] sm:$0xf]  ;;  %s1956_s23 = sshll.u32 %s2915_s14, 4  ;;  %s2057_s25 = sshll.u32 %s2655_s18, 8 }
  0x8d   : > { %2125 = vmatpush3.bf16.msra.mxu1 %v2409_v2  ;;  %v2421_v24 = vld [vmem:[#allocation5 + $0x60] sm:$0xff]   ;;  %v1144_v28 = vrot.slane %v2948_v16, 1  ;;  %v2423_v32 = vld [vmem:[#allocation5 + $0x68] sm:$0xff]   ;;  %v2974_v36 = vcombine.low %v653_v33, %v653_v33  ;;  %v2977_v38 = vcombine.low %v652_v14, %v653_v33  ;;  %v654_v46 = vld [vmem:[%s2919_s29 + $0x18] sm:$0xf]  ;;  %vm1793_vm6 = vcmask 519168   ;;  %s3083_s6 = scalar_lea.hbm %s3141_s4, %s2057_s25 }
  0x8e   : > { %2189 = vmatpush3.bf16.msra.mxu0 %v2410_v3  ;;  %v1064_v23 = vrot.slane %v2945_v15, 1  ;;  %v1063_v25 = vrot.slane %v2954_v20, 1  ;;  %2130 = vmatprep.subr.bf16.mxu1 %v2419_v21  ;;  %v1066_v26 = vrot.slane %v2956_v22, 1  ;;  %v2964_v29 = vrot.slane %v2950_v17, 1  ;;  %v2424_v35 = vld [vmem:[#allocation5 + $0x80] sm:$0xff]   ;;  %v2429_v41 = vld [vmem:[%s2919_s29 + $0x8] sm:$0xff]  }
  0x8f   : > { %2194 = vmatprep.subr.bf16.mxu0 %v2421_v24  ;;  %v2426_v37 = vld [vmem:[#allocation5 + $0xa0] sm:$0xff]   ;;  %v1147_v40 = vrot.slane %v2974_v36, 1  ;;  %v2427_v42 = vld [vmem:[#allocation5 + $0x88] sm:$0xff]   ;;  %v1225_v43 = vrot.slane %v2977_v38, 1  ;;  %v2989_v49 = vcombine.low %v654_v46, %v654_v46  ;;  %v2992_v51 = vcombine.low %v653_v33, %v654_v46  ;;  %v2431_v53 = vld [vmem:[%s2919_s29 + $0x10] sm:$0xff]   ;;  %s303_s27 = scalar_lea.vmem [#allocation10], %s1956_s23 }
  0x90   : > { %2127 = vmatmul.mubr.msk.bf16.vlgmr.msra.gmra.mrb[0].mxu1 %vm341_vm0, %v1958_v11  ;;  %v1065_v30 = vsel %vm1062_vm1, %v1063_v25, %v1064_v23  ;;  %v1067_v31 = vsel %vm1062_vm1, %v1064_v23, %v1066_v26  ;;  %v1146_v34 = vsel %vm1062_vm1, %v1144_v28, %v2964_v29  ;;  %v2428_v45 = vld [vmem:[#allocation5 + $0xa8] sm:$0xff]   ;;  %v2432_v48 = vld [vmem:[#allocation5 + $0xc0] sm:$0xff]   ;;  %v683_v60 = vshll.u32 %v2945_v15, 16  ;;  %v2440_v5 = vld [vmem:[#allocation5 + $0x10] sm:$0xff]   ;;  %s1815_s5 = sshll.u32 %s303_s27, 4  ;;  %s1799_s18 = scalar_lea.sflag [#allocation4], %s2915_s14  ;;  %s3085_s5 = int_to_ptr.vmem [resolvable:$true] %s1815_s5 }
  0x91   : > { %2131 = vmatpush3.bf16.msra.mxu1 %v2419_v21  ;;  %2134 = vmatprep.mubr.msk.bf16.mxu1 %vm341_vm0, %v1963_v19  ;;  %v1148_v44 = vsel %vm1062_vm1, %v2964_v29, %v1147_v40  ;;  %v1226_v47 = vsel %vm1062_vm1, %v1064_v23, %v1225_v43  ;;  %v2434_v50 = vld [vmem:[#allocation5 + $0xe0] sm:$0xff]   ;;  %v1227_v55 = vrot.slane %v2989_v49, 1  ;;  %v2437_v56 = vld [vmem:[%s2919_s29 + $0xc] sm:$0xff]   ;;  %v1305_v59 = vrot.slane %v2992_v51, 1  ;;  %v2439_v14 = vld [vmem:[%s2919_s29 + $0x14] sm:$0xff]   ;;  %s2573_s26 = scalar_lea.vmem %s3085_s5, 256 }
  0x92   : > { %2132 = vmatprep.subr.bf16.mxu1 %v2422_v27  ;;  %2190 = vmatprep.mubr.msk.bf16.mxu0 %vm341_vm0, %v1065_v30  ;;  %v648_v52 = vld [vmem:[%s2919_s29] sm:$0xf]  ;;  %v2435_v57 = vld [vmem:[#allocation5 + $0xc8] sm:$0xff]   ;;  %v687_v63 = vshrl.u32 %v2945_v15, 16  ;;  %v1388_v0 = vshrl.u32 %v2954_v20, 16  ;;  %v1391_v1 = vshll.u32 %v2954_v20, 16  ;;  %p2574_p13 = scmp.ne.s32.totalorder %s3085_s5, %s2573_s26 }
  0x93   : > { %2191 = vmatmul.mubr.msk.bf16.vlgmr.msra.gmra.mrb[0].mxu0 %vm341_vm0, %v1067_v31  ;;  %v1981_v54 = vcombine.low %v648_v52, %v2939_v10  ;;  %v1228_v61 = vsel %vm1062_vm1, %v1225_v43, %v1227_v55  ;;  %v2436_v62 = vld [vmem:[#allocation5 + $0xe8] sm:$0xff]   ;;  %v1306_v4 = vsel %vm1062_vm1, %v2964_v29, %v1305_v59  ;;  %v3010_v6 = vld [vmem:[%s2919_s29 + $0x1c] ss:$0 sps:$4 sm:$0x11]   ;;  %v2442_v7 = vld [vmem:[#allocation5 + $0x30] sm:$0xff]   ;;  %v685_v9 = vrot.slane %v683_v60, 1 }
  0x94   : > { %2195 = vmatpush3.bf16.msra.mxu0 %v2421_v24  ;;  %2198 = vmatprep.mubr.msk.bf16.mxu0 %vm341_vm0, %v1146_v34  ;;  %v1390_v10 = vrot.slane %v1388_v0, 1  ;;  %v1393_v11 = vrot.slane %v1391_v1, 2  ;;  %v1395_v12 = vrot.slane %v687_v63, 1  ;;  %v1396_v13 = vrot.slane %v683_v60, 2  ;;  %v2443_v18 = vld [vmem:[#allocation5 + $0x18] sm:$0xff]   ;;  %v2446_v31 = vld [vmem:[#allocation5 + $0x50] sm:$0xff]   ;;  %p2575_p6 = pnand %p2574_p13, %p2854_p10 }
  0x95   : > { %2133 = vmatpush3.bf16.msra.mxu1 %v2422_v27  ;;  %2196 = vmatprep.subr.bf16.mxu0 %v2423_v32  ;;  %v678_v58 = vshll.u32 %v1981_v54, 16  ;;  %v676_v2 = vshrl.u32 %v1981_v54, 16  ;;  %v1307_v15 = vrot.slane %v3010_v6, 1  ;;  %v779_v20 = vshll.u32 %v2948_v16, 16  ;;  %v2444_v27 = vld [vmem:[#allocation5 + $0x38] sm:$0xff]   ;;  %s2671_s10 = smov [#allocation10]  }
  0x96   : > { %2138 = vmatprep.subr.bf16.mxu1 %v2424_v35  ;;  %v1394_v21 = vor.u32 %v1393_v11, %v1390_v10  ;;  %v3018_v23 = vor.u32 %v1396_v13, %v1395_v12  ;;  %vm1386_vm3 = vsmask.f32 6400  ;;  %v691_v25 = vshll.u32 %v2956_v22, 16  ;;  %v2448_v46 = vld [vmem:[#allocation5 + $0x58] sm:$0xff]   ;;  %p2576_p3 = pneg %p2575_p6  ;;  %s2577_s12 = sshll.u32 %s2671_s10, 4  ;;  %s2578_s12 = int_to_ptr.vmem [resolvable:$false] %s2577_s12 }
  0x97   : > { %v680_v3 = vrot.slane %v678_v58, 1  ;;  %v1308_v24 = vsel %vm1062_vm1, %v1305_v59, %v1307_v15  ;;  %v1399_v26 = vshrl.u32 %v2956_v22, 16  ;;  %v781_v28 = vrot.slane %v779_v20, 1  ;;  %v2449_v55 = vld [vmem:[#allocation5 + $0x78] sm:$0xff]   ;;  %v2450_v58 = vld [vmem:[#allocation5 + $0x90] sm:$0xff]   ;;  %s2579_s9 = scalar_lea.vmem %s2578_s12, 512  ;;  %p2580_p5 = scmp.lt.s32.totalorder %s3085_s5, %s2578_s12 }
  0x98   : > { %2197 = vmatpush3.bf16.msra.mxu0 %v2423_v32  ;;  %v784_v29 = vshll.u32 %v2950_v17, 16  ;;  %v1398_v30 = vsel %vm1386_vm3, %v1394_v21, %v3018_v23  ;;  %v777_v32 = vshrl.u32 %v2948_v16, 16  ;;  %v788_v33 = vshrl.u32 %v2950_v17, 16  ;;  %v2453_v11 = vld [vmem:[#allocation5 + $0xb8] sm:$0xff]   ;;  %p2581_p7 = scmp.lt.s32.totalorder %s2579_s9, %s2573_s26 }
  0x99   : > { %2202 = vmatprep.subr.bf16.mxu0 %v2426_v37  ;;  %v681_v8 = vor.u32 %v680_v3, %v676_v2  ;;  %v689_v34 = vor.u32 %v687_v63, %v685_v9  ;;  %v1401_v22 = vrot.slane %v1399_v26, 1  ;;  %v1482_v43 = vrot.slane %v779_v20, 2 }
  0x9a   : > { %v782_v40 = vor.u32 %v781_v28, %v777_v32  ;;  %v1484_v16 = vrot.slane %v788_v33, 1  ;;  %v1488_v54 = vshrl.u32 %v2974_v36, 16  ;;  %v881_v59 = vshrl.u32 %v2977_v38, 16  ;;  %v2456_v28 = vld [vmem:[#allocation5 + $0xd8] sm:$0xff]   ;;  %p2582_p9 = por %p2581_p7, %p2580_p5 }
  0x9b   : > { %v686_v19 = vsel %vm674_vm2, %v681_v8, %v685_v9  ;;  %v885_v9 = vshll.u32 %v2989_v49, 16  ;;  %v1574_v10 = vshrl.u32 %v2989_v49, 16  ;;  %v970_v12 = vshll.u32 %v2992_v51, 16  ;;  %v2455_v49 = vld [vmem:[#allocation5 + $0xf0] sm:$0xff]  }
  0x9c   : > { %2135 = vmatmul.mubr.msk.bf16.vlgmr.msra.gmra.mrb[0].mxu1 %vm341_vm0, %v1964_v39  ;;  %v2447_v39 = vld [vmem:[#allocation5 + $0x70] sm:$0xff]   ;;  %v1570_v1 = vrot.slane %v881_v59, 1  ;;  %v974_v15 = vshrl.u32 %v2992_v51, 16  ;;  %p2583_p0 = pnand %p2582_p9, %p2576_p3 }
  0x9d   : > { %2139 = vmatpush3.bf16.msra.mxu1 %v2424_v35  ;;  %2142 = vmatprep.mubr.msk.bf16.mxu1 %vm341_vm0, %v2429_v41  ;;  %v693_v35 = vrot.slane %v691_v25, 1  ;;  %v786_v41 = vrot.slane %v784_v29, 1  ;;  %v1576_v20 = vrot.slane %v1574_v10, 1  ;;  %v1577_v21 = vrot.slane %v885_v9, 2 }
  0x9e   : > { %2140 = vmatprep.subr.bf16.mxu1 %v2427_v42 }
  0x9f   : > { %2199 = vmatmul.mubr.msk.bf16.vlgmr.msra.gmra.mrb[0].mxu0 %vm341_vm0, %v1148_v44  ;;  %v1485_v44 = vrot.slane %v784_v29, 2  ;;  %v694_v17 = vsel %vm674_vm2, %v689_v34, %v693_v35  ;;  %v790_v60 = vor.u32 %v788_v33, %v786_v41  ;;  %v1578_v26 = vor.u32 %v1577_v21, %v1576_v20  ;;  %v2457_v35 = vld [vmem:[#allocation5 + $0xf8] sm:$0xff]  }
  0xa0   : > { %2203 = vmatpush3.bf16.msra.mxu0 %v2426_v37  ;;  %2206 = vmatprep.mubr.msk.bf16.mxu0 %vm341_vm0, %v1226_v47  ;;  %v1402_v37 = vrot.slane %v691_v25, 2  ;;  %v787_v47 = vsel %vm674_vm2, %v782_v40, %v786_v41  ;;  %v1659_v25 = vrot.slane %v974_v15, 1 }
  0xa1   : > { %2141 = vmatpush3.bf16.msra.mxu1 %v2427_v42  ;;  %2204 = vmatprep.subr.bf16.mxu0 %v2428_v45  ;;  %v1481_v42 = vrot.slane %v777_v32, 1  ;;  %v978_v32 = vshll.u32 %v3010_v6, 16 }
  0xa2   : > { %2146 = vmatprep.subr.bf16.mxu1 %v2432_v48 }
  0xa4   : > { %2205 = vmatpush3.bf16.msra.mxu0 %v2428_v45  ;;  %v1403_v45 = vor.u32 %v1402_v37, %v1401_v22 }
  0xa5   : > { %2210 = vmatprep.subr.bf16.mxu0 %v2434_v50 }
  0xa6   : > { %v1404_v52 = vsel %vm1386_vm3, %v3018_v23, %v1403_v45 }
  0xa8   : > { %2143 = vmatmul.mubr.msk.bf16.vlgmr.msra.gmra.mrb[0].mxu1 %vm341_vm0, %v2431_v53  ;;  %v792_v53 = vshll.u32 %v2974_v36, 16  ;;  %v2451_v36 = vld [vmem:[#allocation5 + $0xb0] sm:$0xff]  }
  0xa9   : > { %2147 = vmatpush3.bf16.msra.mxu1 %v2432_v48  ;;  %2150 = vmatprep.mubr.msk.bf16.mxu1 %vm341_vm0, %v2437_v56  ;;  %v1483_v48 = vor.u32 %v1482_v43, %v1481_v42  ;;  %v877_v56 = vshll.u32 %v2977_v38, 16 }
  0xaa   : > { %2148 = vmatprep.subr.bf16.mxu1 %v2435_v57  ;;  %v1491_v63 = vrot.slane %v792_v53, 2 }
  0xab   : > { %2207 = vmatmul.mubr.msk.bf16.vlgmr.msra.gmra.mrb[0].mxu0 %vm341_vm0, %v1228_v61  ;;  %v794_v61 = vrot.slane %v792_v53, 1  ;;  %v879_v0 = vrot.slane %v877_v56, 1  ;;  %v1571_v2 = vrot.slane %v877_v56, 2 }
  0xac   : > { %2211 = vmatpush3.bf16.msra.mxu0 %v2434_v50  ;;  %2214 = vmatprep.mubr.msk.bf16.mxu0 %vm341_vm0, %v1306_v4  ;;  %v3034_v50 = vor.u32 %v1485_v44, %v1484_v16  ;;  %v2452_v4 = vld [vmem:[#allocation5 + $0x98] sm:$0xff]  }
  0xad   : > { %2149 = vmatpush3.bf16.msra.mxu1 %v2435_v57  ;;  %2212 = vmatprep.subr.bf16.mxu0 %v2436_v62  ;;  %v795_v3 = vsel %vm674_vm2, %v790_v60, %v794_v61 }
  0xae   : > { %2154 = vmatprep.subr.bf16.mxu1 %v2440_v5  ;;  %v1487_v57 = vsel %vm1386_vm3, %v1483_v48, %v3034_v50 }
  0xb0   : > { %2213 = vmatpush3.bf16.msra.mxu0 %v2436_v62  ;;  %v1490_v62 = vrot.slane %v1488_v54, 1 }
  0xb1   : > { %2218 = vmatprep.subr.bf16.mxu0 %v2442_v7 }
  0xb2   : > { %v1492_v38 = vor.u32 %v1491_v63, %v1490_v62 }
  0xb4   : > { %2151 = vmatmul.mubr.msk.bf16.vlgmr.msra.gmra.mrb[0].mxu1 %vm341_vm0, %v2439_v14  ;;  %v1493_v8 = vsel %vm1386_vm3, %v3034_v50, %v1492_v38  ;;  %v2454_v14 = vld [vmem:[#allocation5 + $0xd0] sm:$0xff]  }
  0xb5   : > { %2155 = vmatpush3.bf16.msra.mxu1 %v2440_v5  ;;  %2158 = vmatprep.mubr.msk.bf16.mxu1 %vm341_vm0, %v686_v19  ;;  %v880_v5 = vsel %vm674_vm2, %v689_v34, %v879_v0  ;;  %v887_v19 = vrot.slane %v885_v9, 1 }
  0xb6   : > { %2156 = vmatprep.subr.bf16.mxu1 %v2443_v18 }
  0xb7   : > { %2215 = vmatmul.mubr.msk.bf16.vlgmr.msra.gmra.mrb[0].mxu0 %vm341_vm0, %v1308_v24  ;;  %v972_v24 = vrot.slane %v970_v12, 1 }
  0xb8   : > { %2219 = vmatpush3.bf16.msra.mxu0 %v2442_v7  ;;  %2222 = vmatprep.mubr.msk.bf16.mxu0 %vm341_vm0, %v1398_v30  ;;  %v1572_v7 = vor.u32 %v1571_v2, %v1570_v1 }
  0xb9   : > { %2157 = vmatpush3.bf16.msra.mxu1 %v2443_v18  ;;  %2220 = vmatprep.subr.bf16.mxu0 %v2444_v27  ;;  %v883_v18 = vor.u32 %v881_v59, %v879_v0  ;;  %v973_v29 = vsel %vm674_vm2, %v790_v60, %v972_v24  ;;  %v976_v37 = vor.u32 %v974_v15, %v972_v24 }
  0xba   : > { %2162 = vmatprep.subr.bf16.mxu1 %v2446_v31  ;;  %v1573_v13 = vsel %vm1386_vm3, %v3018_v23, %v1572_v7  ;;  %v1660_v23 = vrot.slane %v970_v12, 2 }
  0xbb   : > { %v888_v51 = vsel %vm674_vm2, %v883_v18, %v887_v19 }
  0xbc   : > { %2221 = vmatpush3.bf16.msra.mxu0 %v2444_v27  ;;  %v2458_v27 = vld [vmem:[%s2919_s29 + $0x1c] ss:$0 sps:$4 sm:$0x33]   ;;  %v1661_v30 = vor.u32 %v1660_v23, %v1659_v25 }
  0xbd   : > { %2226 = vmatprep.subr.bf16.mxu0 %v2447_v39  ;;  %v1664_v33 = vshrl.u32 %v2458_v27, 16  ;;  %v1667_v34 = vshll.u32 %v2458_v27, 16 }
  0xbe   : > { %v1662_v22 = vsel %vm1386_vm3, %v3034_v50, %v1661_v30 }
  0xbf   : > { %v1666_v40 = vrot.slane %v1664_v33, 1  ;;  %v1669_v41 = vrot.slane %v1667_v34, 2 }
  0xc0   : > { %2159 = vmatmul.mubr.msk.bf16.vlgmr.msra.gmra.mrb[0].mxu1 %vm341_vm0, %v694_v17 }
  0xc1   : > { %2163 = vmatpush3.bf16.msra.mxu1 %v2446_v31  ;;  %2166 = vmatprep.mubr.msk.bf16.mxu1 %vm341_vm0, %v787_v47  ;;  %v1579_v31 = vsel %vm1386_vm3, %v1572_v7, %v1578_v26  ;;  %v1670_v42 = vor.u32 %v1669_v41, %v1666_v40  ;;  %v2041_v47 = vld [vmem:[#allocation7] ss:$0 sm:$0xff] }
  0xc2   : > { %2164 = vmatprep.subr.bf16.mxu1 %v2448_v46 }
  0xc3   : > { %2223 = vmatmul.mubr.msk.bf16.vlgmr.msra.gmra.mrb[0].mxu0 %vm341_vm0, %v1404_v52  ;;  %v1671_v43 = vsel %vm1386_vm3, %v1661_v30, %v1670_v42  ;;  %v2042_v52 = vld [vmem:[#allocation8] ss:$0 sm:$0xff] }
  0xc4   : > { %2227 = vmatpush3.bf16.msra.mxu0 %v2447_v39  ;;  %2230 = vmatprep.mubr.msk.bf16.mxu0 %vm341_vm0, %v1487_v57  ;;  %v980_v39 = vrot.slane %v978_v32, 1 }
  0xc5   : > { %2165 = vmatpush3.bf16.msra.mxu1 %v2448_v46  ;;  %2228 = vmatprep.subr.bf16.mxu0 %v2449_v55 }
  0xc6   : > { %2170 = vmatprep.subr.bf16.mxu1 %v2450_v58  ;;  %v981_v6 = vsel %vm674_vm2, %v976_v37, %v980_v39 }
  0xc8   : > { %2229 = vmatpush3.bf16.msra.mxu0 %v2449_v55 }
  0xc9   : > { %2234 = vmatprep.subr.bf16.mxu0 %v2451_v36 }
  0xcc   : > { %2167 = vmatmul.mubr.msk.bf16.vlgmr.msra.gmra.mrb[0].mxu1 %vm341_vm0, %v795_v3 }
  0xcd   : > { %2171 = vmatpush3.bf16.msra.mxu1 %v2450_v58  ;;  %2174 = vmatprep.mubr.msk.bf16.mxu1 %vm341_vm0, %v880_v5 }
  0xce   : > { %2172 = vmatprep.subr.bf16.mxu1 %v2452_v4 }
  0xcf   : > { %2231 = vmatmul.mubr.msk.bf16.vlgmr.msra.gmra.mrb[0].mxu0 %vm341_vm0, %v1493_v8 }
  0xd0   : > { %2235 = vmatpush3.bf16.msra.mxu0 %v2451_v36  ;;  %2238 = vmatprep.mubr.msk.bf16.mxu0 %vm341_vm0, %v1573_v13 }
  0xd1   : > { %2173 = vmatpush3.bf16.msra.mxu1 %v2452_v4  ;;  %2236 = vmatprep.subr.bf16.mxu0 %v2453_v11 }
  0xd2   : > { %2178 = vmatprep.subr.bf16.mxu1 %v2454_v14 }
  0xd4   : > { %2237 = vmatpush3.bf16.msra.mxu0 %v2453_v11 }
  0xd5   : > { %2242 = vmatprep.subr.bf16.mxu0 %v2455_v49 }
  0xd8   : > { %2175 = vmatmul.mubr.msk.bf16.vlgmr.msra.gmra.mrb[0].mxu1 %vm341_vm0, %v888_v51 }
  0xd9   : > { %2179 = vmatpush3.bf16.msra.mxu1 %v2454_v14  ;;  %2182 = vmatprep.mubr.msk.bf16.mxu1 %vm341_vm0, %v973_v29 }
  0xda   : > { %2180 = vmatprep.subr.bf16.mxu1 %v2456_v28 }
  0xdb   : > { %2239 = vmatmul.mubr.msk.bf16.vlgmr.msra.gmra.mrb[0].mxu0 %vm341_vm0, %v1579_v31 }
  0xdc   : > { %2243 = vmatpush3.bf16.msra.mxu0 %v2455_v49  ;;  %2246 = vmatprep.mubr.msk.bf16.mxu0 %vm341_vm0, %v1662_v22 }
  0xdd   : > { %2181 = vmatpush3.bf16.msra.mxu1 %v2456_v28  ;;  %2244 = vmatprep.subr.bf16.mxu0 %v2457_v35 }
  0xe0   : > { %2245 = vmatpush3.bf16.msra.mxu0 %v2457_v35 }
  0xe4   : > { %2183 = vmatmul.mubr.msk.bf16.vlgmr.msra.gmra.mrb[0].mxu1 %vm341_vm0, %v981_v6 }
  0xe7   : > { %2247 = vmatmul.mubr.msk.bf16.vlgmr.msra.gmra.mrb[0].mxu0 %vm341_vm0, %v1671_v43 }
 0x1b7   : > { %v2184_v16 = vpop.f32.mrb[0].mxu1 }
 0x1b8   : > { %v1034_v44 = vpop.f32.mrb[1].mxu1 }
 0x1b9   : > { %v2185_v17 = vpop.f32.mrb[2].mxu1 }
 0x1ba   : > { %v1037_v45 = vpop.f32.mrb[3].mxu1  ;;  %v2248_v46 = vpop.f32.mrb[0].mxu0 }
 0x1bb   : > { %v2250_v48 = vadd.f32 %v2248_v46, %v2184_v16  ;;  %v1724_v50 = vpop.f32.mrb[1].mxu0 }
 0x1bc   : > { %v2251_v53 = vadd.f32 %v1724_v50, %v1034_v44  ;;  %v2249_v54 = vpop.f32.mrb[2].mxu0 }
 0x1bd   : > { %v1752_v55 = vmul.f32 %v2250_v48, %v2041_v47  ;;  %v2252_v56 = vadd.f32 %v2249_v54, %v2185_v17  ;;  %v1727_v57 = vpop.f32.mrb[3].mxu0 }
 0x1be   : > { %v1750_v58 = vmul.f32 %v2251_v53, %v2041_v47  ;;  %v2253_v59 = vadd.f32 %v1727_v57, %v1037_v45 }
 0x1bf   : > { %v1763_v60 = vadd.f32 %v2042_v52, %v1752_v55  ;;  %v1753_v61 = vmul.f32 %v2252_v56, %v2041_v47 }
 0x1c0   : > { %v1761_v62 = vadd.f32 %v2042_v52, %v1750_v58  ;;  %v1751_v63 = vmul.f32 %v2253_v59, %v2041_v47 }
 0x1c1   : > { %vm1767_vm4 = vcmp.ge.f32.partialorder %v1763_v60, 0.0  ;;  %v1771_v36 = vmul.f32 0.2, %v1763_v60  ;;  %v1764_v0 = vadd.f32 %v2042_v52, %v1753_v61 }
 0x1c2   : > { %vm1765_vm5 = vcmp.ge.f32.partialorder %v1761_v62, 0.0  ;;  %v1769_v1 = vmul.f32 0.2, %v1761_v62  ;;  %v1762_v2 = vadd.f32 %v2042_v52, %v1751_v63 }
 0x1c3   : > { %v1775_v3 = vsel %vm1767_vm4, %v1763_v60, %v1771_v36  ;;  %vm1768_vm7 = vcmp.ge.f32.partialorder %v1764_v0, 0.0  ;;  %v1772_v38 = vmul.f32 0.2, %v1764_v0 }
 0x1c4   : > { %v2055_v4 = vpack.c.bf16 %v1775_v3, %v1775_v3  ;;  %v1773_v5 = vsel %vm1765_vm5, %v1761_v62, %v1769_v1  ;;  %vm1766_vm8 = vcmp.ge.f32.partialorder %v1762_v2, 0.0  ;;  %v1770_v7 = vmul.f32 0.2, %v1762_v2 }
 0x1c5   : > { %v2053_v8 = vpack.c.bf16 %v1773_v5, %v1773_v5  ;;  %v1776_v9 = vsel %vm1768_vm7, %v1764_v0, %v1772_v38 }
 0x1c6   : > { %1796 = vst.msk [vmem:[%s303_s27 + $0x8] sm:$0xf] %vm1793_vm6, %v2055_v4  ;;  %v2056_v10 = vpack.c.bf16 %v1776_v9, %v1776_v9  ;;  %v1774_v11 = vsel %vm1766_vm8, %v1762_v2, %v1770_v7 }
 0x1c7   : > { %1794 = vst.msk [vmem:[%s303_s27] sm:$0xf] %vm1793_vm6, %v2053_v8  ;;  %v2054_v12 = vpack.c.bf16 %v1774_v11, %v1774_v11 }
 0x1c8   : > { %1797 = vst.msk [vmem:[%s303_s27 + $0xc] sm:$0xf] %vm1793_vm6, %v2056_v10 }
 0x1c9   : > { %1795 = vst.msk [vmem:[%s303_s27 + $0x4] sm:$0xf] %vm1793_vm6, %v2054_v12 }
 0x1ca   : > { %2586 = shalt.err (!%p2583_p0)
}
 0x1cb   : > { %s2587_s13 = scalar_lea.hbm %s3083_s6, 256  ;;  %s2591_s28 = scalar_lea.hbm %s3141_s4, 512 }
 0x1cc   : > { %p2588_p4 = scmp.ne.s32.totalorder %s3083_s6, %s2587_s13  ;;  %p2592_p12 = scmp.lt.u32.totalorder %s3083_s6, %s3141_s4 }
 0x1cd   : > { %p2593_p1 = scmp.lt.u32.totalorder %s2591_s28, %s2587_s13  ;;  %p2595_p13 = scmp.lt.u32.totalorder %s2587_s13, %s3083_s6 }
 0x1ce   : > { %p2589_p2 = pnand %p2588_p4, %p2854_p10 }
 0x1cf   : > { %p2594_p11 = por %p2593_p1, %p2592_p12 }
 0x1d0   : > { %p2590_p8 = pneg %p2589_p2 }
 0x1d1   : > { %p2596_p6 = por %p2595_p13, %p2594_p11 }
 0x1d3   : > { %p2597_p3 = pnand %p2596_p6, %p2590_p8 }
 0x1d5   : > { %2600 = shalt.err (!%p2597_p3)
}
 0x1d6   : > { %s2672_s25 = smov 64   ;;  %s2673_s27 = smov 4  }
 0x1d7   : > { %2324 = dma.vmem_to_hbm [thread:$0]  (%p2854_p10), %s3085_s5, 256, %s3083_s6, %s1799_s18, %s2672_s25, %s2672_s25, %s2673_s27  }
 0x1d8 PF: > { %s3161_s7 = sld [smem:[#allocation15_spill]]  ;;  %s1830_s24 = sand.u32 1, %s2643_s15  }
 0x1d9   : > { %p3163_p7 = scmp.ge.s32.totalorder %s2663_s20, 2  ;;  %s1831_s26 = scalar_lea.sflag [#allocation4], %s1830_s24 }
 0x1de   : > { %p3162_p5 = scmp.ne.s32.totalorder %s3161_s7, 0 }
 0x1e0   : > { %p2341_p9 = pnand %p3163_p7, %p3162_p5 }
 0x1e2   : > { %2638 = dma.done.wait (!%p2341_p9), %s1831_s26, 256  }
 0x1e3   : > { %2640 = vsyncadd (!%p2341_p9), %s1831_s26, 4294967040  ;;  %s22_s20 = sadd.s32 1, %s2663_s20   ;;  %s3164_s15 = smov %s2647_s16 }
 0x1e4   : > { %p19_p0 = scmp.ge.s32.totalorder %s22_s20, 4   ;;  %s3165_s16 = smov %s2651_s17 }
 0x1e5   : > { %s3166_s17 = smov %s2866_s22  ;;  %s3167_s18 = smov %s2659_s19 }
 0x1e6   : > { %s3168_s19 = smov %s3170_s11  ;;  %21 = sbr.rel (!%p19_p0) target bundleno = 8 (0x8), region = 111 }
 0x1ed   :  { %1836 = vsyncpa [#allocation3], 1 }
 0x1ee   :  { %1838 = vsyncpa [#allocation3 + $0x1], 1 }
 0x1ef   :  { %1839 = vsyncpa [#allocation6], 1 }
 0x1f0   :  { %1840 = vsyncpa [#allocation9], 1 }
 0x1f1   :  { %1841 = vsyncpa [#allocation4], 1 }
 0x1f2   :  { %1843 = vsyncpa [#allocation4 + $0x1], 1 }

// kernel: _lambda_.9
= control target key start
LH: loop header
LB: loop body
LE: loop exit
PB: predicated region body
PF: predicated region fallthrough
CT: control target
= control target key end

     0   :  { %s4080_s0 = inlined_call_operand.hbm [shape: bf16[2,1,72,64], index: 0, kind: input, shape index: {}]   ;;  %s4081_s1 = inlined_call_operand.hbm [shape: bf16[16,64,1], index: 1, kind: input, shape index: {}]   ;;  %s4082_s2 = inlined_call_operand.<no memory space> [shape: f32[1,1], index: 2, kind: input, shape index: {}]   ;;  %s4083_s4 = inlined_call_operand.hbm [shape: f32[2,1,40,1], index: 4, kind: output, shape index: {}]   ;;  %s4084_s3 = inlined_call_operand.<no memory space> [shape: f32[1,1], index: 3, kind: input, shape index: {}]  }
   0x1   :  { %v9_v0 = vstv %s4082_s2  ;;  %v11_v1 = vstv %s4084_s3 }
   0x2   :  { %10 = vst [vmem:[#allocation2] sm:$0x1] %v9_v0  ;;  %12 = vst [vmem:[#allocation3] sm:$0x1] %v11_v1 }
   0x3   :  { %13 = vsyncpa [#allocation5], 0 }
   0x4   :  { %15 = vsyncpa [#allocation5 + $0x1], 0 }
   0x5   :  { %16 = vsyncpa [#allocation8], 0 }
   0x6   :  { %17 = vsyncpa [#allocation6], 0 }
   0x7   :  { %19 = vsyncpa [#allocation6 + $0x1], 0  ;;  %s3424_s19 = smov 0   ;;  %s3426_s20 = smov 0  }
   0x8   :  { %s3428_s21 = smov 0   ;;  %s3430_s22 = smov 0  }
   0x9   :  { %s3432_s2 = smov 0   ;;  %s3434_s23 = smov 0  }
   0xa LB: > { %s2314_s3 = sadd.s32 4294967295, %s3382_s23   ;;  %s2315_s24 = sadd.s32 4294967294, %s3382_s23   ;;  %s3382_s23 = sphi %s3434_s23, %s25_s23   ;;  %s3378_s2 = sphi %s3432_s2, %s4107_s2   ;;  %s3374_s22 = sphi %s3430_s22, %s4106_s22   ;;  %s3370_s21 = sphi %s3428_s21, %s4105_s21   ;;  %s3366_s20 = sphi %s3426_s20, %s4104_s20   ;;  %s3362_s19 = sphi %s3424_s19, %s4103_s19  }
   0xb   : > { %p66_p0 = scmp.ne.s32.totalorder %s3366_s20, %s3362_s19  ;;  %p3458_p1 = scmp.eq.s32.totalorder %s2314_s3, 0 }
   0xc   : > { %p3462_p2 = scmp.eq.s32.totalorder %s2314_s3, 1  ;;  %p178_p3 = scmp.eq.s32.totalorder %s2315_s24, 1 }
   0xd   : > { %s4089_s25 = scalar_select %p3458_p1, 1, 0 }
   0xe   : > { %s4090_s26 = scalar_select %p3462_p2, 1, 0 }
   0xf   : > { %p3468_p4 = por %p3458_p1, %p66_p0  ;;  %p2316_p5 = scmp.ge.s32.totalorder %s3382_s23, 1 }
  0x10   : > { %p3473_p6 = por %p178_p3, %p66_p0  ;;  %p185_p7 = scmp.lt.s32.totalorder %s3382_s23, 3 }
  0x11   : > { %s4091_s27 = scalar_select %p3468_p4, 1, 0 }
  0x12   : > { %s4092_s28 = scalar_select %p3473_p6, 1, 0 }
  0x13   : > { %p3478_p8 = pnand %p2316_p5, %p185_p7  ;;  %s3384_s30 = smov [#allocation7]  }
  0x14   : > { %s199_s5 = sshll.u32 %s3384_s30, 4  ;;  %s44_s7 = sadd.s32 1, %s3378_s2  ;;  %s200_s5 = int_to_ptr.vmem [resolvable:$true] %s199_s5 }
  0x15   : > { %s4093_s29 = scalar_select %p3478_p8, 1, 0 }
  0x16   : > { %p3081_p9 = pneg %p3478_p8  ;;  %s3238_s10 = scalar_lea.hbm %s4081_s1, 8192 }
  0x17   : > { %p3239_p12 = scmp.ne.s32.totalorder %s4081_s1, %s3238_s10  ;;  %p3245_p5 = scmp.lt.u32.totalorder %s3238_s10, %s4081_s1 }
  0x18   : > { %p3487_p11 = pnand %p3081_p9, %p3458_p1 }
  0x1a   : > { %p3240_p13 = pneg %p3487_p11 }
  0x1c   : > { %p3241_p0 = pnand %p3240_p13, %p3239_p12 }
  0x1e   : > { %p3242_p3 = pneg %p3241_p0 }
  0x20   : > { %p3247_p7 = pnand %p3245_p5, %p3242_p3 }
  0x22   : > { %3250 = shalt.err (!%p3247_p7)
}
  0x23   : > { %s3251_s15 = scalar_lea.vmem %s200_s5, 8192  ;;  %p3259_p1 = scmp.lt.s32.totalorder %s200_s5, %s200_s5 }
  0x24   : > { %p3252_p9 = scmp.ne.s32.totalorder %s200_s5, %s3251_s15  ;;  %p3260_p4 = scmp.lt.s32.totalorder %s3251_s15, %s3251_s15 }
  0x26   : > { %p3254_p10 = pnand %p3252_p9, %p3240_p13  ;;  %p3261_p8 = por %p3260_p4, %p3259_p1 }
  0x28   : > { %p3255_p6 = pneg %p3254_p10 }
  0x2a   : > { %p3262_p2 = pnand %p3261_p8, %p3255_p6 }
  0x2c   : > { %3265 = shalt.err (!%p3262_p2)
}
  0x2d   : > { %s3385_s16 = smov 64   ;;  %s3386_s17 = smov 4  }
  0x2e   : > { %3084 = dma.hbm_to_vmem [thread:$0]  (!%p3487_p11), %s4081_s1, 8192, %s200_s5, [#allocation8], %s3385_s16, %s3385_s16, %s3386_s17  }
  0x2f   : > { %p46_p1 = scmp.ge.s32.totalorder %s44_s7, 2  ;;  %s53_s24 = sadd.s32 1, %s3370_s21 }
  0x30   : > { %p60_p2 = scmp.ne.s32.totalorder %s3370_s21, %s3366_s20  ;;  %p61_p4 = scmp.eq.s32.totalorder %s3382_s23, 0 }
  0x31   : > { %s4109_s7 = smov (%p46_p1, %s44_s7), 0  ;;  %p4095_p8 = scmp.ne.s32.totalorder %s4090_s26, 0 }
  0x32   : > { %p62_p6 = por %p61_p4, %p60_p2  ;;  %s48_s6 = ssub.s32 %s3378_s2, %s4109_s7 }
  0x33   : > { %p3519_p10 = por %p4095_p8, %p60_p2  ;;  %p3094_p12 = scmp.lt.s32.totalorder %s3382_s23, 2 }
  0x34   : > { %p51_p13 = scmp.eq.s32.totalorder %s48_s6, 0  ;;  %s225_s8 = sand.u32 1, %s3370_s21  }
  0x35   : > { %s3068_s9 = smul.u32 36, %s225_s8  ;;  %p3531_p11 = pnand %p3094_p12, %p62_p6 }
  0x36   : > { %s3528_s10 = scalar_select %p51_p13, %s3370_s21, %s53_s24  }
  0x37   : > { %s3069_s5 = smul.u32 576, %s3378_s2  ;;  %s229_s11 = scalar_lea.vmem [#allocation4], %s3068_s9 }
  0x38   : > { %s238_s12 = sshll.u32 %s229_s11, 4  ;;  %s3542_s18 = scalar_lea.sflag [#allocation5], %s225_s8  ;;  %s3540_s12 = int_to_ptr.vmem [resolvable:$true] %s238_s12 }
  0x39   : > { %s3538_s15 = scalar_lea.hbm %s4080_s0, %s3069_s5  ;;  %p3268_p3 = pneg %p3531_p11 }
  0x3a   : > { %s3266_s3 = scalar_lea.hbm %s3538_s15, 576  ;;  %s3271_s9 = scalar_lea.hbm %s4080_s0, 1152 }
  0x3b   : > { %p3267_p0 = scmp.ne.s32.totalorder %s3538_s15, %s3266_s3  ;;  %p3272_p9 = scmp.lt.u32.totalorder %s3538_s15, %s4080_s0 }
  0x3c   : > { %p3273_p1 = scmp.lt.u32.totalorder %s3271_s9, %s3266_s3  ;;  %p3275_p4 = scmp.lt.u32.totalorder %s3266_s3, %s3538_s15 }
  0x3d   : > { %p3269_p5 = pnand %p3268_p3, %p3267_p0 }
  0x3e   : > { %p3274_p2 = por %p3273_p1, %p3272_p9 }
  0x3f   : > { %p3270_p7 = pneg %p3269_p5 }
  0x40   : > { %p3276_p6 = por %p3275_p4, %p3274_p2 }
  0x42   : > { %p3277_p8 = pnand %p3276_p6, %p3270_p7 }
  0x44   : > { %3280 = shalt.err (!%p3277_p8)
}
  0x45   : > { %s3281_s8 = scalar_lea.vmem %s3540_s12, 576  ;;  %s3387_s14 = smov [#allocation4]  }
  0x46   : > { %p3282_p12 = scmp.ne.s32.totalorder %s3540_s12, %s3281_s8  ;;  %s3286_s26 = sshll.u32 %s3387_s14, 4  ;;  %s3287_s26 = int_to_ptr.vmem [resolvable:$false] %s3286_s26 }
  0x47   : > { %s3288_s24 = scalar_lea.vmem %s3287_s26, 1152  ;;  %p3289_p5 = scmp.lt.s32.totalorder %s3540_s12, %s3287_s26 }
  0x48   : > { %p3284_p13 = pnand %p3282_p12, %p3268_p3  ;;  %p3290_p9 = scmp.lt.s32.totalorder %s3288_s24, %s3281_s8 }
  0x4a   : > { %p3285_p0 = pneg %p3284_p13  ;;  %p3291_p1 = por %p3290_p9, %p3289_p5 }
  0x4c   : > { %p3292_p2 = pnand %p3291_p1, %p3285_p0 }
  0x4e   : > { %3295 = shalt.err (!%p3292_p2)
}
  0x4f   : > { %3088 = dma.hbm_to_vmem [thread:$0]  (!%p3531_p11), %s3538_s15, 576, %s3540_s12, %s3542_s18, %s3385_s16, %s3385_s16, %s3386_s17  }
  0x50   : > { %p4098_p3 = scmp.ne.s32.totalorder %s4093_s29, 0 }
  0x51   : > { %s3576_s3 = sand.u32 (!%p4098_p3), 1, %s3366_s20   ;;  %p4099_p7 = scmp.ne.s32.totalorder (!%p4098_p3), %s4091_s27, 0 }
  0x52   : > { %250 = sbr.rel (%p4098_p3) target bundleno = 528 (0x210), region = 36  ;;  %s253_s9 = scalar_lea.sflag (!%p4098_p3), [#allocation5], %s3576_s3 }
  0x53   : > { %s3070_s6 = smul.u32 (!%p4098_p3), 36, %s3576_s3 }
  0x55   : > { %s3580_s5 = scalar_lea.vmem (!%p4098_p3), [#allocation4], %s3070_s6 }
  0x59   : > { %3349 = dma.done.wait (%p4099_p7), %s253_s9, 576  }
  0x5a   : > { %3351 = vsyncadd (%p4099_p7), %s253_s9, 4294966720  ;;  %p4100_p11 = scmp.ne.s32.totalorder %s4089_s25, 0 }
  0x5c   : > { %3353 = dma.done.wait (%p4100_p11), [#allocation8], 8192  }
  0x5d   : > { %3355 = vsyncadd (%p4100_p11), [#allocation8], 4294959104  ;;  %v3388_v2 = vmov 0.0   ;;  %vm3389_vm0 = vmmov 0   ;;  %v3152_v3 = vld [vmem:[#allocation7 + $0x80] sm:$0xff]   ;;  %v3154_v5 = vld [vmem:[#allocation7 + $0x88] sm:$0xff]  }
  0x5e   : > { %2575 = vmatprep.subr.bf16.mxu1 %v3388_v2  ;;  %2735 = vmatprep.subr.bf16.mxu0 %v3388_v2  ;;  %v3153_v4 = vld [vmem:[#allocation7 + $0x40] sm:$0xff]   ;;  %v3155_v6 = vld [vmem:[#allocation7 + $0x48] sm:$0xff]   ;;  %v3156_v7 = vld [vmem:[#allocation7 + $0x90] sm:$0xff]   ;;  %vm1277_vm1 = vcmask 1046528   ;;  %vm358_vm2 = vcmask 523264   ;;  %s3071_s25 = smul.u32 40, %s3576_s3 }
  0x5f   : > { %2583 = vmatprep.mubr.msk.bf16.mxu1 %vm3389_vm0, %v3388_v2  ;;  %2743 = vmatprep.mubr.msk.bf16.mxu0 %vm3389_vm0, %v3388_v2  ;;  %v3157_v8 = vld [vmem:[#allocation7 + $0x50] sm:$0xff]   ;;  %v3158_v9 = vld [vmem:[#allocation7 + $0x98] sm:$0xff]   ;;  %v3604_v11 = vld [vmem:[%s3580_s5 + $0x8] sm:$0xf]  ;;  %vm793_vm3 = vsmask.f32 7424 }
  0x60   : > { %2576 = vmatpush3.bf16.msra.mxu1 %v3152_v3  ;;  %2736 = vmatpush3.bf16.msra.mxu0 %v3153_v4  ;;  %v3601_v10 = vld [vmem:[%s3580_s5 + $0x4] sm:$0xf]  ;;  %v3610_v13 = vld [vmem:[%s3580_s5 + $0x8] sm:$0xf]  ;;  %v3613_v14 = vld [vmem:[%s3580_s5 + $0xc] sm:$0xf] }
  0x61   : > { %2577 = vmatprep.subr.bf16.mxu1 %v3388_v2  ;;  %2737 = vmatprep.subr.bf16.mxu0 %v3388_v2  ;;  %v3607_v12 = vld [vmem:[%s3580_s5 + $0x4] sm:$0xf]  ;;  %v3617_v15 = vcombine.low %v3610_v13, %v3613_v14  ;;  %v1264_v16 = vld [vmem:[%s3580_s5] sm:$0xe]  ;;  %v2324_v20 = vcombine.low %v3601_v10, %v3604_v11  ;;  %v764_v25 = vld [vmem:[%s3580_s5 + $0x10] sm:$0xf] }
  0x62   : > { %v3159_v17 = vld [vmem:[#allocation7 + $0x58] sm:$0xff]   ;;  %v2400_v18 = vcombine.low %v1264_v16, %v3607_v12  ;;  %v3165_v22 = vld [vmem:[#allocation7] sm:$0xff]   ;;  %v3630_v26 = vld [vmem:[%s3580_s5 + $0x14] sm:$0xf]  ;;  %vm1699_vm4 = vsmask.f32 6400  ;;  %v2374_v52 = vcombine.low %v3607_v12, %v3610_v13  ;;  %v2375_v55 = vcombine.low %v3613_v14, %v764_v25 }
  0x63   : > { %v1279_v19 = vrot.slane %v3617_v15, 1  ;;  %v3166_v23 = vld [vmem:[#allocation7 + $0xc0] sm:$0xff]   ;;  %v3167_v27 = vld [vmem:[#allocation7 + $0x8] sm:$0xff]   ;;  %v3634_v28 = vcombine.low %v764_v25, %v3630_v26  ;;  %v3172_v34 = vld [vmem:[#allocation7 + $0x10] sm:$0xff]   ;;  %v806_v35 = vshrl.u32 %v3617_v15, 16  ;;  %v802_v40 = vshll.u32 %v3617_v15, 16 }
  0x64   : > { %2578 = vmatpush3.bf16.msra.mxu1 %v3154_v5  ;;  %2738 = vmatpush3.bf16.msra.mxu0 %v3155_v6  ;;  %v1278_v21 = vrot.slane %v2400_v18, 1  ;;  %v3638_v29 = vld [vmem:[%s3580_s5 + $0xc] sm:$0xf]  ;;  %v3642_v31 = vld [vmem:[%s3580_s5 + $0x10] sm:$0xf]  ;;  %v1701_v36 = vshrl.u32 %v2400_v18, 16 }
  0x65   : > { %2579 = vmatprep.subr.bf16.mxu1 %v3388_v2  ;;  %2739 = vmatprep.subr.bf16.mxu0 %v3388_v2  ;;  %v3168_v30 = vld [vmem:[#allocation7 + $0xc8] sm:$0xff]   ;;  %v3645_v32 = vrot.slane %v3634_v28, 1  ;;  %v2325_v33 = vcombine.low %v3638_v29, %v3642_v31  ;;  %v3173_v38 = vld [vmem:[#allocation7 + $0xd0] sm:$0xff]   ;;  %v1704_v39 = vshll.u32 %v2400_v18, 16  ;;  %v3175_v43 = vld [vmem:[#allocation7 + $0x18] sm:$0xff]   ;;  %v1708_v44 = vrot.slane %v806_v35, 1 }
  0x66   : > { %v1280_v24 = vsel %vm1277_vm1, %v1278_v21, %v1279_v19  ;;  %v1703_v41 = vrot.slane %v1701_v36, 1  ;;  %v3174_v45 = vld [vmem:[%s3580_s5 + $0x14] ss:$0 sps:$4 sm:$0xff]   ;;  %v3176_v46 = vld [vmem:[#allocation7 + $0xd8] sm:$0xff]   ;;  %v3669_v47 = vrot.slane %v802_v40, 1  ;;  %v1709_v49 = vrot.slane %v802_v40, 2 }
  0x67   : > { %v3658_v37 = vsel %vm1277_vm1, %v1279_v19, %v3645_v32  ;;  %v1706_v42 = vrot.slane %v1704_v39, 2  ;;  %v810_v51 = vshll.u32 %v3634_v28, 16  ;;  %v814_v54 = vshrl.u32 %v3634_v28, 16  ;;  %v298_v61 = vld [vmem:[%s3580_s5] sm:$0xf]  ;;  %v3177_v5 = vld [vmem:[#allocation7 + $0x100] sm:$0xff]  }
  0x68   : > { %2580 = vmatpush3.bf16.msra.mxu1 %v3156_v7  ;;  %2740 = vmatpush3.bf16.msra.mxu0 %v3157_v8  ;;  %v808_v50 = vor.u32 %v806_v35, %v3669_v47  ;;  %v1710_v53 = vor.u32 %v1709_v49, %v1708_v44  ;;  %v1386_v62 = vrot.slane %v2374_v52, 1  ;;  %v1387_v63 = vrot.slane %v2375_v55, 1  ;;  %v766_v3 = vld [vmem:[%s3580_s5 + $0x18] sm:$0xf]  ;;  %v3178_v13 = vld [vmem:[#allocation7 + $0x140] sm:$0xff]   ;;  %v3180_v19 = vld [vmem:[#allocation7 + $0x148] sm:$0xff]  }
  0x69   : > { %2581 = vmatprep.subr.bf16.mxu1 %v3388_v2  ;;  %2741 = vmatprep.subr.bf16.mxu0 %v3388_v2  ;;  %v1707_v48 = vor.u32 %v1706_v42, %v1703_v41  ;;  %v3682_v56 = vrot.slane %v810_v51, 1  ;;  %v1712_v58 = vrot.slane %v814_v54, 1  ;;  %v1713_v60 = vrot.slane %v810_v51, 2  ;;  %v3186_v40 = vld [vmem:[#allocation7 + $0x118] sm:$0xff]   ;;  %s4012_s27 = scalar_lea.vmem [#allocation9], %s3071_s25  ;;  %s3072_s29 = smul.u32 640, %s3374_s22 }
  0x6a   : > { %v928_v1 = vshll.u32 %v2374_v52, 16  ;;  %v2334_v4 = vcombine.low %v298_v61, %v3601_v10  ;;  %v926_v7 = vshrl.u32 %v2374_v52, 16  ;;  %v933_v8 = vshll.u32 %v2375_v55, 16  ;;  %v760_v41 = vld [vmem:[%s3580_s5] sm:$0xf]  ;;  %s2187_s16 = sshll.u32 %s4012_s27, 4  ;;  %s4029_s16 = int_to_ptr.vmem [resolvable:$true] %s2187_s16 }
  0x6b   : > { %v3686_v57 = vsel %vm1699_vm4, %v1707_v48, %v1710_v53  ;;  %v3693_v59 = vsel %vm793_vm3, %v808_v50, %v3682_v56  ;;  %v3702_v0 = vor.u32 %v1713_v60, %v1712_v58  ;;  %v3712_v14 = vcombine.low %v3630_v26, %v766_v3  ;;  %v768_v51 = vld [vmem:[%s3580_s5 + $0x20] sm:$0x1]  ;;  %s4027_s13 = scalar_lea.hbm %s4083_s4, %s3072_s29  ;;  %s2171_s22 = scalar_lea.sflag [#allocation6], %s3576_s3 }
  0x6c   : > { %2582 = vmatpush3.bf16.msra.mxu1 %v3158_v9  ;;  %2742 = vmatpush3.bf16.msra.mxu0 %v3159_v17  ;;  %v1388_v9 = vsel %vm1277_vm1, %v1386_v62, %v1387_v63  ;;  %v930_v15 = vrot.slane %v928_v1, 1  ;;  %v935_v16 = vrot.slane %v933_v8, 1  ;;  %v3179_v17 = vld [vmem:[#allocation7 + $0x108] sm:$0xff]   ;;  %v937_v10 = vshrl.u32 %v2375_v55, 16  ;;  %s3296_s15 = scalar_lea.vmem %s4029_s16, 640  ;;  %s3390_s18 = smov [#allocation9]  }
  0x6d   : > { %2595 = vmatprep.subr.bf16.mxu1 %v3388_v2  ;;  %2755 = vmatprep.subr.bf16.mxu0 %v3388_v2  ;;  %v3708_v6 = vsel %vm1699_vm4, %v1710_v53, %v3702_v0  ;;  %v3718_v21 = vrot.slane %v3712_v14, 1  ;;  %v2335_v25 = vcombine.low %v3604_v11, %v3638_v29  ;;  %v945_v36 = vshrl.u32 %v3712_v14, 16  ;;  %p3297_p4 = scmp.ne.s32.totalorder %s4029_s16, %s3296_s15  ;;  %s3300_s11 = sshll.u32 %s3390_s18, 4  ;;  %s3301_s11 = int_to_ptr.vmem [resolvable:$false] %s3300_s11 }
  0x6e   : > { %v931_v18 = vor.u32 %v930_v15, %v926_v7  ;;  %v939_v11 = vor.u32 %v937_v10, %v935_v16  ;;  %v941_v29 = vshll.u32 %v3712_v14, 16  ;;  %v2364_v44 = vcombine.low %v760_v41, %v3607_v12  ;;  %v3190_v14 = vld [vmem:[#allocation7 + $0x1c0] sm:$0xff]   ;;  %v3203_v41 = vld [vmem:[#allocation7 + $0x28] sm:$0xff]   ;;  %s3302_s8 = scalar_lea.vmem %s3301_s11, 1280  ;;  %p3303_p12 = scmp.lt.s32.totalorder %s4029_s16, %s3301_s11 }
  0x6f   : > { %2584 = vmatmul.mubr.msk.bf16.vlgmr.msra.gmra.mrb[0].mxu1 %vm358_vm2, %v2324_v20  ;;  %2744 = vmatmul.mubr.msk.bf16.vlgmr.msra.gmra.mrb[0].mxu0 %vm358_vm2, %v1280_v24  ;;  %v1819_v20 = vrot.slane %v926_v7, 1  ;;  %v1822_v24 = vrot.slane %v937_v10, 1  ;;  %v2336_v50 = vcombine.low %v3642_v31, %v3642_v31  ;;  %v3772_v31 = vor.u32 %v814_v54, %v3682_v56  ;;  %v3193_v10 = vld [vmem:[%s3580_s5 + $0x10] sm:$0xff]   ;;  %p3298_p6 = pnand %p3297_p4, %p3519_p10  ;;  %p3304_p13 = scmp.lt.s32.totalorder %s3302_s8, %s3296_s15 }
  0x70   : > { %2596 = vmatpush3.bf16.msra.mxu1 %v3165_v22  ;;  %2756 = vmatpush3.bf16.msra.mxu0 %v3166_v23  ;;  %v3721_v22 = vsel %vm793_vm3, %v931_v18, %v935_v16  ;;  %v1820_v23 = vrot.slane %v928_v1, 2  ;;  %v943_v42 = vrot.slane %v941_v29, 1  ;;  %v1827_v49 = vrot.slane %v941_v29, 2  ;;  %v3191_v16 = vld [vmem:[#allocation7 + $0x188] sm:$0xff]   ;;  %v3201_v29 = vld [vmem:[#allocation7 + $0x20] sm:$0xff]  }
  0x71   : > { %2597 = vmatprep.subr.bf16.mxu1 %v3388_v2  ;;  %2757 = vmatprep.subr.bf16.mxu0 %v3388_v2  ;;  %v795_v12 = vshrl.u32 %v2364_v44, 16  ;;  %v797_v52 = vshll.u32 %v2364_v44, 16  ;;  %v3205_v44 = vld [vmem:[%s3580_s5 + $0x14] sm:$0xff]   ;;  %vm2164_vm5 = vcmask 7168   ;;  %p3299_p8 = pneg %p3298_p6  ;;  %p3305_p0 = por %p3304_p13, %p3303_p12 }
  0x72   : > { %2587 = vmatprep.mubr.msk.bf16.mxu1 %vm3389_vm0, %v3388_v2  ;;  %2747 = vmatprep.mubr.msk.bf16.mxu0 %vm3389_vm0, %v3388_v2  ;;  %v1821_v26 = vor.u32 %v1820_v23, %v1819_v20  ;;  %v3758_v48 = vsel %vm793_vm3, %v939_v11, %v943_v42  ;;  %v3196_v20 = vld [vmem:[#allocation7 + $0x1d0] sm:$0xff]   ;;  %v3198_v23 = vld [vmem:[#allocation7 + $0x198] sm:$0xff]   ;;  %v3200_v11 = vld [vmem:[%s3580_s5 + $0xc] sm:$0xff]  }
  0x73   : > { %v799_v58 = vrot.slane %v797_v52, 1  ;;  %v3214_v52 = vld [vmem:[#allocation7 + $0xe0] sm:$0xff]   ;;  %p3306_p5 = pnand %p3305_p0, %p3299_p8 }
  0x74   : > { %2598 = vmatpush3.bf16.msra.mxu1 %v3167_v27  ;;  %2758 = vmatpush3.bf16.msra.mxu0 %v3168_v30  ;;  %v1823_v27 = vrot.slane %v933_v8, 2  ;;  %v3183_v30 = vld [vmem:[#allocation7 + $0x110] sm:$0xff]   ;;  %v3189_v8 = vld [vmem:[#allocation7 + $0x180] sm:$0xff]  }
  0x75   : > { %2599 = vmatprep.subr.bf16.mxu1 %v3388_v2  ;;  %2759 = vmatprep.subr.bf16.mxu0 %v3388_v2  ;;  %v800_v62 = vor.u32 %v799_v58, %v795_v12  ;;  %v3213_v12 = vld [vmem:[#allocation7 + $0xa0] sm:$0xff]   ;;  %v3216_v58 = vld [vmem:[#allocation7 + $0xe8] sm:$0xff]  }
  0x76   : > { %v1824_v35 = vor.u32 %v1823_v27, %v1822_v24  ;;  %v3199_v24 = vld [vmem:[#allocation7 + $0x1d8] sm:$0xff]  }
  0x77   : > { %2588 = vmatmul.mubr.msk.bf16.gmra.mrb[4].mxu1 %vm358_vm2, %v2325_v33  ;;  %2748 = vmatmul.mubr.msk.bf16.gmra.mrb[4].mxu0 %vm358_vm2, %v3658_v37  ;;  %v3732_v33 = vsel %vm1277_vm1, %v1387_v63, %v3718_v21  ;;  %v3798_v1 = vsel %vm793_vm3, %v800_v62, %v3669_v47  ;;  %v3217_v62 = vld [vmem:[#allocation7 + $0xb0] sm:$0xff]  }
  0x78   : > { %2600 = vmatpush3.bf16.msra.mxu1 %v3172_v34  ;;  %2760 = vmatpush3.bf16.msra.mxu0 %v3173_v38  ;;  %v3184_v34 = vld [vmem:[#allocation7 + $0x150] sm:$0xff]   ;;  %v3743_v39 = vsel %vm1699_vm4, %v1821_v26, %v1824_v35 }
  0x79   : > { %2591 = vmatprep.mubr.msk.bf16.mxu1 %vm3389_vm0, %v3388_v2  ;;  %2751 = vmatprep.mubr.msk.bf16.mxu0 %vm3389_vm0, %v3388_v2  ;;  %v3738_v38 = vld [vmem:[%s3580_s5 + $0x1c] sm:$0xf]  ;;  %v3197_v26 = vld [vmem:[%s3580_s5 + $0x18] ss:$0 sps:$4 sm:$0xff]  }
  0x7a   : > { %2601 = vmatprep.subr.bf16.mxu1 %v3388_v2  ;;  %2761 = vmatprep.subr.bf16.mxu0 %v3388_v2  ;;  %v3787_v28 = vcombine.low %v3738_v38, %v768_v51  ;;  %v3211_v51 = vld [vmem:[#allocation7 + $0x78] sm:$0xff]  }
  0x7c   : > { %2602 = vmatpush3.bf16.msra.mxu1 %v3175_v43  ;;  %2762 = vmatpush3.bf16.msra.mxu0 %v3176_v46  ;;  %v3187_v43 = vld [vmem:[#allocation7 + $0x158] sm:$0xff]   ;;  %v3755_v46 = vcombine.low %v766_v3, %v3738_v38 }
  0x7d   : > { %2615 = vmatprep.subr.bf16.mxu1 %v3388_v2  ;;  %2775 = vmatprep.subr.bf16.mxu0 %v3388_v2 }
  0x7e   : > { %v1055_v55 = vshll.u32 %v3755_v46, 16  ;;  %v1059_v63 = vshrl.u32 %v3755_v46, 16  ;;  %v1494_v18 = vrot.slane %v3755_v46, 1  ;;  %v1170_v46 = vshrl.u32 %v3787_v28, 16 }
  0x7f   : > { %2592 = vmatmul.mubr.msk.bf16.gmra.mrb[8].mxu1 %vm358_vm2, %v3174_v45  ;;  %2752 = vmatmul.mubr.msk.bf16.gmra.mrb[8].mxu0 %vm358_vm2, %v3645_v32  ;;  %v1826_v45 = vrot.slane %v945_v36, 1 }
  0x80   : > { %2603 = vmatprep.mubr.msk.bf16.mxu1 %vm3389_vm0, %v3388_v2  ;;  %2763 = vmatprep.mubr.msk.bf16.mxu0 %vm3389_vm0, %v3388_v2  ;;  %v3778_v61 = vrot.slane %v1055_v55, 1  ;;  %v1934_v56 = vrot.slane %v1055_v55, 2  ;;  %v1933_v3 = vrot.slane %v1059_v63, 1  ;;  %v3215_v55 = vld [vmem:[#allocation7 + $0xa8] sm:$0xff]  }
  0x81   : > { %v3764_v53 = vor.u32 %v1827_v49, %v1826_v45  ;;  %v3208_v49 = vld [vmem:[#allocation7 + $0x70] sm:$0xff]  }
  0x82   : > { %v3792_v54 = vsel %vm793_vm3, %v3772_v31, %v3778_v61  ;;  %v3804_v7 = vor.u32 %v1934_v56, %v1933_v3  ;;  %v3219_v56 = vld [vmem:[#allocation7 + $0xb8] sm:$0xff]   ;;  %v3221_v3 = vld [vmem:[#allocation7 + $0x120] sm:$0xff]  }
  0x83   : > { %v3776_v60 = vsel %vm1699_vm4, %v1824_v35, %v3764_v53 }
  0x84   : > { %v3813_v47 = vsel %vm1699_vm4, %v3702_v0, %v3804_v7 }
  0x87   : > { %2604 = vmatmul.mubr.msk.bf16.vlgmr.msra.gmra.mrb[0].mxu1 %vm358_vm2, %v2334_v4  ;;  %2764 = vmatmul.mubr.msk.bf16.vlgmr.msra.gmra.mrb[0].mxu0 %vm358_vm2, %v1388_v9  ;;  %v1166_v4 = vshll.u32 %v3787_v28, 16  ;;  %v3806_v9 = vor.u32 %v945_v36, %v943_v42  ;;  %v3204_v42 = vld [vmem:[#allocation7 + $0x68] sm:$0xff]  }
  0x88   : > { %2616 = vmatpush3.bf16.msra.mxu1 %v3177_v5  ;;  %2776 = vmatpush3.bf16.msra.mxu0 %v3178_v13  ;;  %v3188_v5 = vld [vmem:[%s3580_s5 + $0x8] sm:$0xff]  }
  0x89   : > { %2617 = vmatprep.subr.bf16.mxu1 %v3388_v2  ;;  %2777 = vmatprep.subr.bf16.mxu0 %v3388_v2  ;;  %v3808_v13 = vrot.slane %v1166_v4, 1  ;;  %v3222_v4 = vld [vmem:[#allocation7 + $0x160] sm:$0xff]  }
  0x8a   : > { %2607 = vmatprep.mubr.msk.bf16.mxu1 %vm3389_vm0, %v3388_v2  ;;  %2767 = vmatprep.mubr.msk.bf16.mxu0 %vm3389_vm0, %v3388_v2 }
  0x8b   : > { %v3818_v15 = vsel %vm793_vm3, %v3806_v9, %v3808_v13 }
  0x8c   : > { %2618 = vmatpush3.bf16.msra.mxu1 %v3179_v17  ;;  %2778 = vmatpush3.bf16.msra.mxu0 %v3180_v19  ;;  %v3192_v17 = vld [vmem:[#allocation7 + $0x1c8] sm:$0xff]   ;;  %v1495_v19 = vsel %vm1277_vm1, %v3645_v32, %v1494_v18 }
  0x8d   : > { %2619 = vmatprep.subr.bf16.mxu1 %v3388_v2  ;;  %2779 = vmatprep.subr.bf16.mxu0 %v3388_v2 }
  0x8f   : > { %2608 = vmatmul.mubr.msk.bf16.gmra.mrb[4].mxu1 %vm358_vm2, %v2335_v25  ;;  %2768 = vmatmul.mubr.msk.bf16.gmra.mrb[4].mxu0 %vm358_vm2, %v3732_v33  ;;  %v1689_v25 = vld [vmem:[%s3580_s5 + $0x20] sm:$0x3] }
  0x90   : > { %2620 = vmatpush3.bf16.msra.mxu1 %v3183_v30  ;;  %2780 = vmatpush3.bf16.msra.mxu0 %v3184_v34  ;;  %v2450_v32 = vcombine.low %v3738_v38, %v1689_v25 }
  0x91   : > { %2611 = vmatprep.mubr.msk.bf16.mxu1 %vm3389_vm0, %v3388_v2  ;;  %2771 = vmatprep.mubr.msk.bf16.mxu0 %vm3389_vm0, %v3388_v2 }
  0x92   : > { %2621 = vmatprep.subr.bf16.mxu1 %v3388_v2  ;;  %2781 = vmatprep.subr.bf16.mxu0 %v3388_v2  ;;  %v2041_v27 = vshrl.u32 %v2450_v32, 16  ;;  %v2044_v30 = vshll.u32 %v2450_v32, 16 }
  0x94   : > { %2622 = vmatpush3.bf16.msra.mxu1 %v3186_v40  ;;  %2782 = vmatpush3.bf16.msra.mxu0 %v3187_v43  ;;  %v2043_v34 = vrot.slane %v2041_v27, 1  ;;  %v2046_v35 = vrot.slane %v2044_v30, 2  ;;  %v3202_v40 = vld [vmem:[#allocation7 + $0x60] sm:$0xff]   ;;  %v1596_v43 = vrot.slane %v3787_v28, 1 }
  0x95   : > { %2635 = vmatprep.subr.bf16.mxu1 %v3388_v2  ;;  %2795 = vmatprep.subr.bf16.mxu0 %v3388_v2 }
  0x96   : > { %v3852_v36 = vor.u32 %v2046_v35, %v2043_v34  ;;  %v1597_v45 = vsel %vm1277_vm1, %v3718_v21, %v1596_v43 }
  0x97   : > { %2612 = vmatmul.mubr.msk.bf16.gmra.mrb[8].mxu1 %vm358_vm2, %v2336_v50  ;;  %2772 = vmatmul.mubr.msk.bf16.gmra.mrb[8].mxu0 %vm358_vm2, %v3718_v21  ;;  %v3210_v50 = vld [vmem:[#allocation7 + $0x38] sm:$0xff]  }
  0x98   : > { %2623 = vmatprep.mubr.msk.bf16.mxu1 %vm3389_vm0, %v3388_v2  ;;  %2783 = vmatprep.mubr.msk.bf16.mxu0 %vm3389_vm0, %v3388_v2  ;;  %v3859_v38 = vsel %vm1699_vm4, %v3764_v53, %v3852_v36  ;;  %v3209_v21 = vld [vmem:[%s3580_s5 + $0x1c] ss:$0 sps:$4 sm:$0xff]  }
  0x9f   : > { %2624 = vmatmul.mubr.msk.bf16.vlgmr.msra.gmra.mrb[0].mxu1 %vm358_vm2, %v3188_v5  ;;  %2784 = vmatmul.mubr.msk.bf16.vlgmr.msra.gmra.mrb[0].mxu0 %vm358_vm2, %v3658_v37  ;;  %v3195_v37 = vld [vmem:[#allocation7 + $0x190] sm:$0xff]   ;;  %v3223_v5 = vld [vmem:[#allocation7 + $0x128] sm:$0xff]  }
  0xa0   : > { %2636 = vmatpush3.bf16.msra.mxu1 %v3189_v8  ;;  %2796 = vmatpush3.bf16.msra.mxu0 %v3190_v14  ;;  %v3228_v8 = vld [vmem:[#allocation7 + $0x178] sm:$0xff]   ;;  %v3229_v14 = vld [vmem:[#allocation7 + $0x1a0] sm:$0xff]  }
  0xa1   : > { %2637 = vmatprep.subr.bf16.mxu1 %v3388_v2  ;;  %2797 = vmatprep.subr.bf16.mxu0 %v3388_v2 }
  0xa2   : > { %2627 = vmatprep.mubr.msk.bf16.mxu1 %vm3389_vm0, %v3388_v2  ;;  %2787 = vmatprep.mubr.msk.bf16.mxu0 %vm3389_vm0, %v3388_v2 }
  0xa4   : > { %2638 = vmatpush3.bf16.msra.mxu1 %v3191_v16  ;;  %2798 = vmatpush3.bf16.msra.mxu0 %v3192_v17  ;;  %v3230_v16 = vld [vmem:[#allocation7 + $0x1e0] sm:$0xff]   ;;  %v3231_v17 = vld [vmem:[#allocation7 + $0x1a8] sm:$0xff]  }
  0xa5   : > { %2639 = vmatprep.subr.bf16.mxu1 %v3388_v2  ;;  %2799 = vmatprep.subr.bf16.mxu0 %v3388_v2 }
  0xa7   : > { %2628 = vmatmul.mubr.msk.bf16.gmra.mrb[4].mxu1 %vm358_vm2, %v3193_v10  ;;  %2788 = vmatmul.mubr.msk.bf16.gmra.mrb[4].mxu0 %vm358_vm2, %v1495_v19  ;;  %v1061_v10 = vor.u32 %v1059_v63, %v3778_v61  ;;  %v2458_v63 = vld [vmem:[#allocation2] ss:$0 sm:$0xff] }
  0xa8   : > { %2640 = vmatpush3.bf16.msra.mxu1 %v3195_v37  ;;  %2800 = vmatpush3.bf16.msra.mxu0 %v3196_v20 }
  0xa9   : > { %2631 = vmatprep.mubr.msk.bf16.mxu1 %vm3389_vm0, %v3388_v2  ;;  %2791 = vmatprep.mubr.msk.bf16.mxu0 %vm3389_vm0, %v3388_v2 }
  0xaa   : > { %2641 = vmatprep.subr.bf16.mxu1 %v3388_v2  ;;  %2801 = vmatprep.subr.bf16.mxu0 %v3388_v2 }
  0xac   : > { %2642 = vmatpush3.bf16.msra.mxu1 %v3198_v23  ;;  %2802 = vmatpush3.bf16.msra.mxu0 %v3199_v24 }
  0xad   : > { %2655 = vmatprep.subr.bf16.mxu1 %v3388_v2  ;;  %2815 = vmatprep.subr.bf16.mxu0 %v3388_v2 }
  0xaf   : > { %2632 = vmatmul.mubr.msk.bf16.gmra.mrb[8].mxu1 %vm358_vm2, %v3197_v26  ;;  %2792 = vmatmul.mubr.msk.bf16.gmra.mrb[8].mxu0 %vm358_vm2, %v1494_v18  ;;  %v3236_v18 = vld [vmem:[#allocation7 + $0x1f8] sm:$0xff]  }
  0xb0   : > { %2643 = vmatprep.mubr.msk.bf16.mxu1 %vm3389_vm0, %v3388_v2  ;;  %2803 = vmatprep.mubr.msk.bf16.mxu0 %vm3389_vm0, %v3388_v2 }
  0xb7   : > { %2644 = vmatmul.mubr.msk.bf16.vlgmr.msra.gmra.mrb[0].mxu1 %vm358_vm2, %v3200_v11  ;;  %2804 = vmatmul.mubr.msk.bf16.vlgmr.msra.gmra.mrb[0].mxu0 %vm358_vm2, %v3732_v33  ;;  %v3207_v33 = vld [vmem:[#allocation7 + $0x30] sm:$0xff]  }
  0xb8   : > { %2656 = vmatpush3.bf16.msra.mxu1 %v3201_v29  ;;  %2816 = vmatpush3.bf16.msra.mxu0 %v3202_v40 }
  0xb9   : > { %2657 = vmatprep.subr.bf16.mxu1 %v3388_v2  ;;  %2817 = vmatprep.subr.bf16.mxu0 %v3388_v2 }
  0xba   : > { %2647 = vmatprep.mubr.msk.bf16.mxu1 %vm3389_vm0, %v3388_v2  ;;  %2807 = vmatprep.mubr.msk.bf16.mxu0 %vm3389_vm0, %v3388_v2 }
  0xbc   : > { %2658 = vmatpush3.bf16.msra.mxu1 %v3203_v41  ;;  %2818 = vmatpush3.bf16.msra.mxu0 %v3204_v42 }
  0xbd   : > { %2659 = vmatprep.subr.bf16.mxu1 %v3388_v2  ;;  %2819 = vmatprep.subr.bf16.mxu0 %v3388_v2 }
  0xbf   : > { %2648 = vmatmul.mubr.msk.bf16.gmra.mrb[4].mxu1 %vm358_vm2, %v3205_v44  ;;  %2808 = vmatmul.mubr.msk.bf16.gmra.mrb[4].mxu0 %vm358_vm2, %v1597_v45 }
  0xc0   : > { %2660 = vmatpush3.bf16.msra.mxu1 %v3207_v33  ;;  %2820 = vmatpush3.bf16.msra.mxu0 %v3208_v49 }
  0xc1   : > { %2651 = vmatprep.mubr.msk.bf16.mxu1 %vm3389_vm0, %v3388_v2  ;;  %2811 = vmatprep.mubr.msk.bf16.mxu0 %vm3389_vm0, %v3388_v2 }
  0xc2   : > { %2661 = vmatprep.subr.bf16.mxu1 %v3388_v2  ;;  %2821 = vmatprep.subr.bf16.mxu0 %v3388_v2 }
  0xc4   : > { %2662 = vmatpush3.bf16.msra.mxu1 %v3210_v50  ;;  %2822 = vmatpush3.bf16.msra.mxu0 %v3211_v51 }
  0xc5   : > { %2675 = vmatprep.subr.bf16.mxu1 %v3388_v2  ;;  %2835 = vmatprep.subr.bf16.mxu0 %v3388_v2 }
  0xc7   : > { %2652 = vmatmul.mubr.msk.bf16.gmra.mrb[8].mxu1 %vm358_vm2, %v3209_v21  ;;  %2812 = vmatmul.mubr.msk.bf16.gmra.mrb[8].mxu0 %vm358_vm2, %v1596_v43 }
  0xc8   : > { %2663 = vmatprep.mubr.msk.bf16.mxu1 %vm3389_vm0, %v3388_v2  ;;  %2823 = vmatprep.mubr.msk.bf16.mxu0 %vm3389_vm0, %v3388_v2 }
  0xcf   : > { %2664 = vmatmul.mubr.msk.bf16.vlgmr.msra.gmra.mrb[0].mxu1 %vm358_vm2, %v3798_v1  ;;  %2824 = vmatmul.mubr.msk.bf16.vlgmr.msra.gmra.mrb[0].mxu0 %vm358_vm2, %v3686_v57  ;;  %v3218_v57 = vld [vmem:[#allocation7 + $0xf0] sm:$0xff]   ;;  %v3220_v1 = vld [vmem:[#allocation7 + $0xf8] sm:$0xff]  }
  0xd0   : > { %2676 = vmatpush3.bf16.msra.mxu1 %v3213_v12  ;;  %2836 = vmatpush3.bf16.msra.mxu0 %v3214_v52 }
  0xd1   : > { %2677 = vmatprep.subr.bf16.mxu1 %v3388_v2  ;;  %2837 = vmatprep.subr.bf16.mxu0 %v3388_v2 }
  0xd2   : > { %2667 = vmatprep.mubr.msk.bf16.mxu1 %vm3389_vm0, %v3388_v2  ;;  %2827 = vmatprep.mubr.msk.bf16.mxu0 %vm3389_vm0, %v3388_v2 }
  0xd4   : > { %2678 = vmatpush3.bf16.msra.mxu1 %v3215_v55  ;;  %2838 = vmatpush3.bf16.msra.mxu0 %v3216_v58 }
  0xd5   : > { %2679 = vmatprep.subr.bf16.mxu1 %v3388_v2  ;;  %2839 = vmatprep.subr.bf16.mxu0 %v3388_v2 }
  0xd7   : > { %2668 = vmatmul.mubr.msk.bf16.gmra.mrb[4].mxu1 %vm358_vm2, %v3693_v59  ;;  %2828 = vmatmul.mubr.msk.bf16.gmra.mrb[4].mxu0 %vm358_vm2, %v3708_v6 }
  0xd8   : > { %2680 = vmatpush3.bf16.msra.mxu1 %v3217_v62  ;;  %2840 = vmatpush3.bf16.msra.mxu0 %v3218_v57 }
  0xd9   : > { %2671 = vmatprep.mubr.msk.bf16.mxu1 %vm3389_vm0, %v3388_v2  ;;  %2831 = vmatprep.mubr.msk.bf16.mxu0 %vm3389_vm0, %v3388_v2 }
  0xda   : > { %2681 = vmatprep.subr.bf16.mxu1 %v3388_v2  ;;  %2841 = vmatprep.subr.bf16.mxu0 %v3388_v2 }
  0xdc   : > { %2682 = vmatpush3.bf16.msra.mxu1 %v3219_v56  ;;  %2842 = vmatpush3.bf16.msra.mxu0 %v3220_v1 }
  0xdd   : > { %2695 = vmatprep.subr.bf16.mxu1 %v3388_v2  ;;  %2855 = vmatprep.subr.bf16.mxu0 %v3388_v2 }
  0xdf   : > { %2672 = vmatmul.mubr.msk.bf16.gmra.mrb[8].mxu1 %vm358_vm2, %v3772_v31  ;;  %2832 = vmatmul.mubr.msk.bf16.gmra.mrb[8].mxu0 %vm358_vm2, %v3702_v0  ;;  %v3224_v0 = vld [vmem:[#allocation7 + $0x168] sm:$0xff]   ;;  %v3225_v31 = vld [vmem:[#allocation7 + $0x130] sm:$0xff]  }
  0xe0   : > { %2683 = vmatprep.mubr.msk.bf16.mxu1 %vm3389_vm0, %v3388_v2  ;;  %2843 = vmatprep.mubr.msk.bf16.mxu0 %vm3389_vm0, %v3388_v2 }
  0xe7   : > { %2684 = vmatmul.mubr.msk.bf16.vlgmr.msra.gmra.mrb[0].mxu1 %vm358_vm2, %v3721_v22  ;;  %2844 = vmatmul.mubr.msk.bf16.vlgmr.msra.gmra.mrb[0].mxu0 %vm358_vm2, %v3743_v39  ;;  %v3226_v22 = vld [vmem:[#allocation7 + $0x170] sm:$0xff]   ;;  %v3227_v39 = vld [vmem:[#allocation7 + $0x138] sm:$0xff]  }
  0xe8   : > { %2696 = vmatpush3.bf16.msra.mxu1 %v3221_v3  ;;  %2856 = vmatpush3.bf16.msra.mxu0 %v3222_v4 }
  0xe9   : > { %2697 = vmatprep.subr.bf16.mxu1 %v3388_v2  ;;  %2857 = vmatprep.subr.bf16.mxu0 %v3388_v2 }
  0xea   : > { %2687 = vmatprep.mubr.msk.bf16.mxu1 %vm3389_vm0, %v3388_v2  ;;  %2847 = vmatprep.mubr.msk.bf16.mxu0 %vm3389_vm0, %v3388_v2 }
  0xec   : > { %2698 = vmatpush3.bf16.msra.mxu1 %v3223_v5  ;;  %2858 = vmatpush3.bf16.msra.mxu0 %v3224_v0 }
  0xed   : > { %2699 = vmatprep.subr.bf16.mxu1 %v3388_v2  ;;  %2859 = vmatprep.subr.bf16.mxu0 %v3388_v2 }
  0xef   : > { %2688 = vmatmul.mubr.msk.bf16.gmra.mrb[4].mxu1 %vm358_vm2, %v3758_v48  ;;  %2848 = vmatmul.mubr.msk.bf16.gmra.mrb[4].mxu0 %vm358_vm2, %v3776_v60 }
  0xf0   : > { %2700 = vmatpush3.bf16.msra.mxu1 %v3225_v31  ;;  %2860 = vmatpush3.bf16.msra.mxu0 %v3226_v22 }
  0xf1   : > { %2691 = vmatprep.mubr.msk.bf16.mxu1 %vm3389_vm0, %v3388_v2  ;;  %2851 = vmatprep.mubr.msk.bf16.mxu0 %vm3389_vm0, %v3388_v2 }
  0xf2   : > { %2701 = vmatprep.subr.bf16.mxu1 %v3388_v2  ;;  %2861 = vmatprep.subr.bf16.mxu0 %v3388_v2 }
  0xf4   : > { %2702 = vmatpush3.bf16.msra.mxu1 %v3227_v39  ;;  %2862 = vmatpush3.bf16.msra.mxu0 %v3228_v8 }
  0xf5   : > { %2715 = vmatprep.subr.bf16.mxu1 %v3388_v2  ;;  %2875 = vmatprep.subr.bf16.mxu0 %v3388_v2 }
  0xf7   : > { %2692 = vmatmul.mubr.msk.bf16.gmra.mrb[8].mxu1 %vm358_vm2, %v3806_v9  ;;  %2852 = vmatmul.mubr.msk.bf16.gmra.mrb[8].mxu0 %vm358_vm2, %v3764_v53  ;;  %v3232_v53 = vld [vmem:[#allocation7 + $0x1e8] sm:$0xff]   ;;  %v3233_v9 = vld [vmem:[#allocation7 + $0x1b0] sm:$0xff]  }
  0xf8   : > { %2703 = vmatprep.mubr.msk.bf16.mxu1 %vm3389_vm0, %v3388_v2  ;;  %2863 = vmatprep.mubr.msk.bf16.mxu0 %vm3389_vm0, %v3388_v2 }
  0xff   : > { %2704 = vmatmul.mubr.msk.bf16.vlgmr.msra.gmra.mrb[0].mxu1 %vm358_vm2, %v3693_v59  ;;  %2864 = vmatmul.mubr.msk.bf16.vlgmr.msra.gmra.mrb[0].mxu0 %vm358_vm2, %v3708_v6  ;;  %v3234_v59 = vld [vmem:[#allocation7 + $0x1f0] sm:$0xff]   ;;  %v3235_v6 = vld [vmem:[#allocation7 + $0x1b8] sm:$0xff]  }
 0x100   : > { %2716 = vmatpush3.bf16.msra.mxu1 %v3229_v14  ;;  %2876 = vmatpush3.bf16.msra.mxu0 %v3230_v16 }
 0x101   : > { %2717 = vmatprep.subr.bf16.mxu1 %v3388_v2  ;;  %2877 = vmatprep.subr.bf16.mxu0 %v3388_v2 }
 0x102   : > { %2707 = vmatprep.mubr.msk.bf16.mxu1 %vm3389_vm0, %v3388_v2  ;;  %2867 = vmatprep.mubr.msk.bf16.mxu0 %vm3389_vm0, %v3388_v2 }
 0x104   : > { %2718 = vmatpush3.bf16.msra.mxu1 %v3231_v17  ;;  %2878 = vmatpush3.bf16.msra.mxu0 %v3232_v53 }
 0x105   : > { %2719 = vmatprep.subr.bf16.mxu1 %v3388_v2  ;;  %2879 = vmatprep.subr.bf16.mxu0 %v3388_v2 }
 0x107   : > { %2708 = vmatmul.mubr.msk.bf16.gmra.mrb[4].mxu1 %vm358_vm2, %v3792_v54  ;;  %2868 = vmatmul.mubr.msk.bf16.gmra.mrb[4].mxu0 %vm358_vm2, %v3813_v47 }
 0x108   : > { %2720 = vmatpush3.bf16.msra.mxu1 %v3233_v9  ;;  %2880 = vmatpush3.bf16.msra.mxu0 %v3234_v59 }
 0x109   : > { %2711 = vmatprep.mubr.msk.bf16.mxu1 %vm3389_vm0, %v3388_v2  ;;  %2871 = vmatprep.mubr.msk.bf16.mxu0 %vm3389_vm0, %v3388_v2 }
 0x10a   : > { %2721 = vmatprep.subr.bf16.mxu1 %v3388_v2  ;;  %2881 = vmatprep.subr.bf16.mxu0 %v3388_v2 }
 0x10c   : > { %2722 = vmatpush3.bf16.msra.mxu1 %v3235_v6  ;;  %2882 = vmatpush3.bf16.msra.mxu0 %v3236_v18 }
 0x10f   : > { %2712 = vmatmul.mubr.msk.bf16.gmra.mrb[8].mxu1 %vm358_vm2, %v1061_v10  ;;  %2872 = vmatmul.mubr.msk.bf16.gmra.mrb[8].mxu0 %vm358_vm2, %v3804_v7 }
 0x110   : > { %2723 = vmatprep.mubr.msk.bf16.mxu1 %vm3389_vm0, %v3388_v2  ;;  %2883 = vmatprep.mubr.msk.bf16.mxu0 %vm3389_vm0, %v3388_v2 }
 0x117   : > { %2724 = vmatmul.mubr.msk.bf16.vlgmr.msra.gmra.mrb[0].mxu1 %vm358_vm2, %v3758_v48  ;;  %2884 = vmatmul.mubr.msk.bf16.vlgmr.msra.gmra.mrb[0].mxu0 %vm358_vm2, %v3776_v60  ;;  %v1172_v48 = vor.u32 %v1170_v46, %v3808_v13 }
 0x118   : > { %2727 = vmatprep.mubr.msk.bf16.mxu1 %vm3389_vm0, %v3388_v2  ;;  %2887 = vmatprep.mubr.msk.bf16.mxu0 %vm3389_vm0, %v3388_v2 }
 0x11f   : > { %2728 = vmatmul.mubr.msk.bf16.gmra.mrb[4].mxu1 %vm358_vm2, %v3818_v15  ;;  %2888 = vmatmul.mubr.msk.bf16.gmra.mrb[4].mxu0 %vm358_vm2, %v3859_v38  ;;  %v2459_v15 = vld [vmem:[#allocation3] ss:$0 sm:$0xff] }
 0x120   : > { %2731 = vmatprep.mubr.msk.bf16.mxu1 %vm3389_vm0, %v3388_v2  ;;  %2891 = vmatprep.mubr.msk.bf16.mxu0 %vm3389_vm0, %v3388_v2 }
 0x127   : > { %2732 = vmatmul.mubr.msk.bf16.gmra.mrb[8].mxu1 %vm358_vm2, %v1172_v48  ;;  %2892 = vmatmul.mubr.msk.bf16.gmra.mrb[8].mxu0 %vm358_vm2, %v3852_v36 }
 0x1ea   : > { %v1237_v60 = vpop.f32.mrb[0].mxu1  ;;  %v2113_v61 = vpop.f32.mrb[0].mxu0 }
 0x1eb   : > { %v2725_v28 = vpop.f32.mrb[1].mxu1  ;;  %v2895_v54 = vadd.f32 %v2113_v61, %v1237_v60  ;;  %v2885_v7 = vpop.f32.mrb[1].mxu0 }
 0x1ec   : > { %v1240_v47 = vpop.f32.mrb[2].mxu1  ;;  %v2116_v37 = vpop.f32.mrb[2].mxu0 }
 0x1ed   : > { %v2726_v19 = vpop.f32.mrb[3].mxu1  ;;  %v2147_v20 = vmul.f32 %v2895_v54, %v2458_v63  ;;  %v2896_v2 = vadd.f32 %v2116_v37, %v1240_v47  ;;  %v2886_v23 = vpop.f32.mrb[3].mxu0 }
 0x1ef   : > { %v2159_v13 = vadd.f32 %v2459_v15, %v2147_v20  ;;  %v2148_v24 = vmul.f32 %v2896_v2, %v2458_v63 }
 0x1f1   : > { %2165 = vst.msk [vmem:[%s4012_s27] sm:$0xff] %vm2164_vm5, %v2159_v13  ;;  %v2160_v25 = vadd.f32 %v2459_v15, %v2148_v24 }
 0x1f2   : > { %v1245_v32 = vpop.f32.mrb[4].mxu1  ;;  %v2121_v26 = vpop.f32.mrb[4].mxu0 }
 0x1f3   : > { %v2729_v27 = vpop.f32.mrb[5].mxu1  ;;  %2166 = vst.msk [vmem:[%s4012_s27 + $0x8] sm:$0xff] %vm2164_vm5, %v2160_v25  ;;  %v2897_v30 = vadd.f32 %v2121_v26, %v1245_v32  ;;  %v2889_v34 = vpop.f32.mrb[5].mxu0 }
 0x1f4   : > { %v1248_v35 = vpop.f32.mrb[6].mxu1  ;;  %v2124_v36 = vpop.f32.mrb[6].mxu0 }
 0x1f5   : > { %v2730_v38 = vpop.f32.mrb[7].mxu1  ;;  %v2149_v11 = vmul.f32 %v2897_v30, %v2458_v63  ;;  %v2898_v29 = vadd.f32 %v2124_v36, %v1248_v35  ;;  %v2890_v40 = vpop.f32.mrb[7].mxu0 }
 0x1f7   : > { %v2161_v41 = vadd.f32 %v2459_v15, %v2149_v11  ;;  %v2150_v42 = vmul.f32 %v2898_v29, %v2458_v63 }
 0x1f9   : > { %2167 = vst.msk [vmem:[%s4012_s27 + $0x10] sm:$0xff] %vm2164_vm5, %v2161_v41  ;;  %v2162_v43 = vadd.f32 %v2459_v15, %v2150_v42 }
 0x1fa   : > { %v1253_v44 = vpop.f32.mrb[8].mxu1  ;;  %v2129_v33 = vpop.f32.mrb[8].mxu0 }
 0x1fb   : > { %v2733_v45 = vpop.f32.mrb[9].mxu1  ;;  %2168 = vst.msk [vmem:[%s4012_s27 + $0x18] sm:$0xff] %vm2164_vm5, %v2162_v43  ;;  %v2899_v49 = vadd.f32 %v2129_v33, %v1253_v44  ;;  %v2893_v50 = vpop.f32.mrb[9].mxu0 }
 0x1fc   : > { %v1256_v51 = vpop.f32.mrb[10].mxu1  ;;  %v2132_v21 = vpop.f32.mrb[10].mxu0 }
 0x1fd   : > { %v2734_v12 = vpop.f32.mrb[11].mxu1  ;;  %v2151_v52 = vmul.f32 %v2899_v49, %v2458_v63  ;;  %v2894_v55 = vpop.f32.mrb[11].mxu0 }
 0x1ff   : > { %v2163_v58 = vadd.f32 %v2459_v15, %v2151_v52 }
 0x201   : > { %2169 = vst.msk [vmem:[%s4012_s27 + $0x20] sm:$0xff] %vm2164_vm5, %v2163_v58 }
 0x202   : > { %3309 = shalt.err (!%p3306_p5)
}
 0x203   : > { %s3310_s14 = scalar_lea.hbm %s4027_s13, 640  ;;  %s3314_s6 = scalar_lea.hbm %s4083_s4, 1280 }
 0x204   : > { %p3311_p9 = scmp.ne.s32.totalorder %s4027_s13, %s3310_s14  ;;  %p3315_p3 = scmp.lt.u32.totalorder %s4027_s13, %s4083_s4 }
 0x205   : > { %p3316_p7 = scmp.lt.u32.totalorder %s3314_s6, %s3310_s14  ;;  %p3318_p4 = scmp.lt.u32.totalorder %s3310_s14, %s4027_s13 }
 0x206   : > { %p3312_p1 = pnand %p3311_p9, %p3519_p10 }
 0x207   : > { %p3317_p11 = por %p3316_p7, %p3315_p3 }
 0x208   : > { %p3313_p2 = pneg %p3312_p1 }
 0x209   : > { %p3319_p6 = por %p3318_p4, %p3317_p11 }
 0x20b   : > { %p3320_p8 = pnand %p3319_p6, %p3313_p2 }
 0x20d   : > { %3323 = shalt.err (!%p3320_p8)
}
 0x20e   : > { %s3391_s25 = smov 128   ;;  %s3392_s27 = smov 8  }
 0x20f   : > { %3079 = dma.vmem_to_hbm [thread:$0]  (%p3519_p10), %s4029_s16, 640, %s4027_s13, %s2171_s22, %s3391_s25, %s3391_s25, %s3392_s27  }
 0x210 PF: > { %s2202_s29 = sand.u32 1, %s3362_s19   ;;  %p4101_p12 = scmp.ne.s32.totalorder %s4092_s28, 0 }
 0x211   : > { %p4102_p13 = scmp.ge.s32.totalorder %s3382_s23, 2  ;;  %s2203_s17 = scalar_lea.sflag [#allocation6], %s2202_s29 }
 0x213   : > { %p3090_p0 = pnand %p4102_p13, %p4101_p12 }
 0x215   : > { %3357 = dma.done.wait (!%p3090_p0), %s2203_s17, 640  }
 0x216   : > { %3359 = vsyncadd (!%p3090_p0), %s2203_s17, 4294966656  ;;  %s25_s23 = sadd.s32 1, %s3382_s23   ;;  %s4103_s19 = smov %s3366_s20 }
 0x217   : > { %p22_p5 = scmp.ge.s32.totalorder %s25_s23, 4   ;;  %s4104_s20 = smov %s3370_s21 }
 0x218   : > { %s4105_s21 = smov %s3528_s10  ;;  %s4106_s22 = smov %s3378_s2 }
 0x219   : > { %s4107_s2 = smov %s4109_s7  ;;  %24 = sbr.rel (!%p22_p5) target bundleno = 10 (0xa), region = 107 }
 0x220   :  { %2208 = vsyncpa [#allocation5], 1 }
 0x221   :  { %2210 = vsyncpa [#allocation5 + $0x1], 1 }
 0x222   :  { %2211 = vsyncpa [#allocation8], 1 }
 0x223   :  { %2212 = vsyncpa [#allocation6], 1 }
 0x224   :  { %2214 = vsyncpa [#allocation6 + $0x1], 1 }

</bundles_post_ra>
